<compile_context>
chip_gen: v7x
topology: tpu7x:2x2x1
jax: 0.10.0
libtpu: 0.0.40
codegen_flags: <defaults>
</compile_context>

<pallas_src>
import jax
import jax.numpy as jnp
from jax import lax
from jax.experimental import pallas as pl
from jax.experimental.pallas import tpu as pltpu

C_IN = 1024     # Linear in_features  == W of the input
C_BN = 1024     # BatchNorm2d channels == C of the input
N_OUT = 10      # Linear out_features
EPS = 1e-5
TM = 512        # channel-row tile -> grid of 2 (one tile per TC on v7x megacore)


def _fused_kernel(x_ref, wt_ref, b_ref, o_ref):
    # x_ref: (TM, 1024)  wt_ref: (1024, 10)  b_ref: (1, 10)  o_ref: (TM, 10)
    # Linear along the last dim: (TM, 1024) @ (1024, 10) on the MXU.
    v1 = jnp.dot(x_ref[...], wt_ref[...], preferred_element_type=jnp.float32)
    v1 = v1 + b_ref[...]                                   # broadcast bias

    # BatchNorm2d (training mode): per-channel (per-row, since N=H=1)
    # mean / biased variance over the N*H*W_out = 10 elements; gamma=1, beta=0.
    # Single-pass stats with a clamp: over only 10 samples E[x^2]-mean^2 can
    # cancel slightly negative for near-constant rows -> rsqrt NaN without it.
    inv_n = jnp.float32(1.0 / N_OUT)
    mean = jnp.sum(v1, axis=-1, keepdims=True) * inv_n
    mean_sq = jnp.sum(v1 * v1, axis=-1, keepdims=True) * inv_n
    var = jnp.maximum(mean_sq - mean * mean, 0.0)
    v2 = (v1 - mean) * lax.rsqrt(var + EPS)                # EUP rsqrt (free slot)

    # ReLU
    o_ref[...] = jnp.maximum(v2, 0.0).astype(o_ref.dtype)


def model_forward(x, weight, bias):
    """x: (1, 1024, 1, 1024) f32, weight: (10, 1024), bias: (10,) -> (1, 1024, 1, 10)."""
    n, c, h, w = x.shape
    assert n == 1 and h == 1 and c == C_BN and w == C_IN
    x2d = x.reshape(c, w)                       # (1024, 1024)
    wt = weight.T                               # one-time (1024, 10) transpose in XLA
    b2d = bias.reshape(1, N_OUT)                # (1, 10)

    # Advisory cost hint: ~21 MFLOPs, ~4.2 MiB HBM traffic, one rsqrt per channel.
    flops = 2 * c * C_IN * N_OUT
    bytes_accessed = 4 * (c * C_IN + C_IN * N_OUT + N_OUT + c * N_OUT)

    out2d = pl.pallas_call(
        _fused_kernel,
        out_shape=jax.ShapeDtypeStruct((c, N_OUT), jnp.float32),
        grid_spec=pltpu.PrefetchScalarGridSpec(
            num_scalar_prefetch=0,
            grid=(c // TM,),
            in_specs=[
                pl.BlockSpec((TM, C_IN), lambda i: (i, 0)),      # x tile (2 MiB)
                pl.BlockSpec((C_IN, N_OUT), lambda i: (0, 0)),   # full weight (resident)
                pl.BlockSpec((1, N_OUT), lambda i: (0, 0)),      # bias (resident)
            ],
            out_specs=pl.BlockSpec((TM, N_OUT), lambda i: (i, 0)),
        ),
        compiler_params=pltpu.CompilerParams(
            dimension_semantics=("parallel",)),
        cost_estimate=pl.CostEstimate(
            flops=flops, transcendentals=c, bytes_accessed=bytes_accessed),
    )(x2d, wt, b2d)

    return out2d.reshape(n, c, h, N_OUT)


def _reference(x, weight, bias):
    v1 = jnp.einsum("nchw,ow->ncho", x, weight) + bias       # Linear on last dim
    mean = jnp.mean(v1, axis=(0, 2, 3), keepdims=True)       # per-channel stats
    var = jnp.mean((v1 - mean) ** 2, axis=(0, 2, 3), keepdims=True)
    v2 = (v1 - mean) / jnp.sqrt(var + EPS)
    return jnp.maximum(v2, 0.0)


if __name__ == "__main__":
    key = jax.random.PRNGKey(0)
    kx, kw, kb = jax.random.split(key, 3)

    # Deterministic parameter init (Linear-like fan-in scaling); BN gamma=1, beta=0.
    bound = 1.0 / (C_IN ** 0.5)
    weight = jax.random.uniform(kw, (N_OUT, C_IN), jnp.float32, -bound, bound)
    bias = jax.random.uniform(kb, (N_OUT,), jnp.float32, -bound, bound)

    # Input: NCHW with C=1024 (BatchNorm2d channels) and W=1024 (Linear in_features).
    x = jax.random.normal(kx, (1, C_BN, 1, C_IN), jnp.float32)

    out = model_forward(x, weight, bias)
    jax.block_until_ready(out)

    ref = _reference(x, weight, bias)
    assert out.shape == (1, C_BN, 1, N_OUT)
    assert jnp.allclose(out, ref, atol=1e-4, rtol=1e-4)

    print("KERNEL_OK")
</pallas_src>

<mosaic_0001>
module attributes {stable_mosaic.version = 11 : i64} {
  func.func @_fused_kernel(%arg0: i32, %arg1: memref<512x1024xf32, #tpu.memory_space<vmem>>, %arg2: memref<1024x10xf32, #tpu.memory_space<vmem>>, %arg3: memref<1x10xf32, #tpu.memory_space<vmem>>, %arg4: memref<512x10xf32, #tpu.memory_space<vmem>>) attributes {dimension_semantics = [#tpu.dimension_semantics<parallel>], iteration_bounds = array<i64: 2>, scalar_prefetch = 0 : i64, scratch_operands = 0 : i64, tpu.core_type = #tpu.core_type<tc>, window_params = [{transform_indices = @transform_0, window_bounds = array<i64: 512, 1024>}, {pipeline_mode = #tpu.pipeline_mode<synchronous>, transform_indices = @transform_1, window_bounds = array<i64: 1024, 10>}, {pipeline_mode = #tpu.pipeline_mode<synchronous>, transform_indices = @transform_2, window_bounds = array<i64: 1, 10>}, {transform_indices = @transform_3, window_bounds = array<i64: 512, 10>}]} {
    %c0 = arith.constant 0 : index
    %c0_0 = arith.constant 0 : index
    %0 = vector.load %arg1[%c0, %c0_0] : memref<512x1024xf32, #tpu.memory_space<vmem>>, vector<512x1024xf32>
    %c0_1 = arith.constant 0 : index
    %c0_2 = arith.constant 0 : index
    %1 = vector.load %arg2[%c0_1, %c0_2] : memref<1024x10xf32, #tpu.memory_space<vmem>>, vector<1024x10xf32>
    %cst = arith.constant dense<0.000000e+00> : vector<512x10xf32>
    %2 = tpu.matmul %0, %1, %cst {dimension_numbers = #tpu.dot_dimension_numbers<[1], [0], [0], [1], [0, 0, 1, 1], [], []>} : vector<512x1024xf32>, vector<1024x10xf32>, vector<512x10xf32> -> vector<512x10xf32>
    %c0_3 = arith.constant 0 : index
    %c0_4 = arith.constant 0 : index
    %3 = vector.load %arg3[%c0_3, %c0_4] : memref<1x10xf32, #tpu.memory_space<vmem>>, vector<1x10xf32>
    %4 = vector.broadcast %3 : vector<1x10xf32> to vector<512x10xf32>
    %5 = arith.addf %2, %4 : vector<512x10xf32>
    %cst_5 = arith.constant dense<0.000000e+00> : vector<512xf32>
    %6 = vector.multi_reduction <add>, %5, %cst_5 [1] : vector<512x10xf32> to vector<512xf32>
    %7 = vector.shape_cast %6 : vector<512xf32> to vector<512x1xf32>
    %cst_6 = arith.constant 1.000000e-01 : f32
    %8 = vector.broadcast %cst_6 : f32 to vector<512x1xf32>
    %9 = arith.mulf %7, %8 : vector<512x1xf32>
    %10 = arith.mulf %5, %5 : vector<512x10xf32>
    %cst_7 = arith.constant dense<0.000000e+00> : vector<512xf32>
    %11 = vector.multi_reduction <add>, %10, %cst_7 [1] : vector<512x10xf32> to vector<512xf32>
    %12 = vector.shape_cast %11 : vector<512xf32> to vector<512x1xf32>
    %cst_8 = arith.constant 1.000000e-01 : f32
    %13 = vector.broadcast %cst_8 : f32 to vector<512x1xf32>
    %14 = arith.mulf %12, %13 : vector<512x1xf32>
    %15 = arith.mulf %9, %9 : vector<512x1xf32>
    %16 = arith.subf %14, %15 : vector<512x1xf32>
    %cst_9 = arith.constant 0.000000e+00 : f32
    %17 = vector.broadcast %cst_9 : f32 to vector<512x1xf32>
    %18 = arith.maximumf %16, %17 : vector<512x1xf32>
    %19 = vector.broadcast %9 : vector<512x1xf32> to vector<512x10xf32>
    %20 = arith.subf %5, %19 : vector<512x10xf32>
    %cst_10 = arith.constant 9.99999974E-6 : f32
    %21 = vector.broadcast %cst_10 : f32 to vector<512x1xf32>
    %22 = arith.addf %18, %21 : vector<512x1xf32>
    %23 = math.rsqrt %22 : vector<512x1xf32>
    %24 = vector.broadcast %23 : vector<512x1xf32> to vector<512x10xf32>
    %25 = arith.mulf %20, %24 : vector<512x10xf32>
    %cst_11 = arith.constant 0.000000e+00 : f32
    %26 = vector.broadcast %cst_11 : f32 to vector<512x10xf32>
    %27 = arith.maximumf %25, %26 : vector<512x10xf32>
    %c0_12 = arith.constant 0 : index
    %c0_13 = arith.constant 0 : index
    %28 = vector.load %arg4[%c0_12, %c0_13] : memref<512x10xf32, #tpu.memory_space<vmem>>, vector<512x10xf32>
    tpu.vector_store %arg4[%c0_12, %c0_13], %27 {strides = array<i32>} : memref<512x10xf32, #tpu.memory_space<vmem>>, vector<512x10xf32>,
    return
  }
  func.func @transform_0(%arg0: i32) -> (i32, i32) {
    %c0_i32 = arith.constant 0 : i32
    %c0_i32_0 = arith.constant 0 : i32
    return %arg0, %c0_i32 : i32, i32
  }
  func.func @transform_1(%arg0: i32) -> (i32, i32) {
    %c0_i32 = arith.constant 0 : i32
    %c0_i32_0 = arith.constant 0 : i32
    %c0_i32_1 = arith.constant 0 : i32
    return %c0_i32, %c0_i32_0 : i32, i32
  }
  func.func @transform_2(%arg0: i32) -> (i32, i32) {
    %c0_i32 = arith.constant 0 : i32
    %c0_i32_0 = arith.constant 0 : i32
    %c0_i32_1 = arith.constant 0 : i32
    return %c0_i32, %c0_i32_0 : i32, i32
  }
  func.func @transform_3(%arg0: i32) -> (i32, i32) {
    %c0_i32 = arith.constant 0 : i32
    %c0_i32_0 = arith.constant 0 : i32
    return %arg0, %c0_i32 : i32, i32
  }
}

</mosaic_0001>

<bundles_post_ra>
// kernel: tpu_custom_call.1
= control target key start
LH: loop header
LB: loop body
LE: loop exit
PB: predicated region body
PF: predicated region fallthrough
CT: control target
= control target key end

     0   :  { %8 = vsyncpa [#allocation3], 0  ;;  %s6664_s0 = inlined_call_operand.hbm [shape: f32[1024,1024], index: 0, kind: input, shape index: {}]   ;;  %s6665_s1 = inlined_call_operand.vmem [shape: f32[1024,10], index: 1, kind: input, shape index: {}]   ;;  %s6666_s2 = inlined_call_operand.hbm [shape: f32[1,10], index: 2, kind: input, shape index: {}]   ;;  %s6667_s3 = inlined_call_operand.vmem [shape: f32[1024,10], index: 3, kind: output, shape index: {}]  }
   0x1   :  { %10 = vsyncpa [#allocation3 + $0x1], 0 }
   0x2   :  { %11 = vsyncpa [#allocation5], 0  ;;  %s4525_s12 = smov 0   ;;  %s4527_s13 = smov 0  }
   0x3   :  { %s4529_s14 = smov 0   ;;  %s4531_s15 = smov 0  }
   0x4 LB: > { %s3624_s16 = sadd.s32 4294967295, %s4498_s15   ;;  %s4545_s17 = sadd.s32 1, %s4498_s15   ;;  %s4498_s15 = sphi %s4531_s15, %s6704_s15   ;;  %s4494_s14 = sphi %s4529_s14, %s6703_s14   ;;  %s4490_s13 = sphi %s4527_s13, %s6702_s13   ;;  %s4486_s12 = sphi %s4525_s12, %s6701_s12  }
   0x5   : > { %s21_s18 = ssub.s32 %s4498_s15, %s4545_s17  ;;  %s24_s19 = sadd.s32 1, %s4494_s14 }
   0x6   : > { %p22_p0 = scmp.eq.s32.totalorder %s21_s18, 0  ;;  %p31_p1 = scmp.ne.s32.totalorder %s4494_s14, %s4490_s13 }
   0x7   : > { %p32_p2 = scmp.eq.s32.totalorder %s4498_s15, 0  ;;  %p37_p3 = scmp.ne.s32.totalorder %s4490_s13, %s4486_s12 }
   0x8   : > { %s4555_s20 = scalar_select %p22_p0, %s4494_s14, %s24_s19  }
   0x9   : > { %p4557_p4 = por %p32_p2, %p31_p1  ;;  %p4563_p5 = scmp.eq.s32.totalorder %s3624_s16, 0 }
   0xa   : > { %p3626_p6 = scmp.ge.s32.totalorder %s4498_s15, 1  ;;  %p116_p7 = scmp.lt.s32.totalorder %s4498_s15, 3 }
   0xb   : > { %s6680_s22 = scalar_select %p4563_p5, 1, 0 }
   0xc   : > { %p4571_p8 = por %p4563_p5, %p37_p3  ;;  %p4575_p9 = pnand %p3626_p6, %p116_p7 }
   0xd   : > { %s4500_s25 = smov [#allocation4]   ;;  %p4234_p11 = scmp.lt.s32.totalorder %s4498_s15, 2 }
   0xe   : > { %s6681_s23 = scalar_select %p4571_p8, 1, 0 }
   0xf   : > { %s6682_s24 = scalar_select %p4575_p9, 1, 0 }
  0x10   : > { %s132_s26 = sshll.u32 %s4500_s25, 4  ;;  %p4225_p10 = pneg %p4575_p9  ;;  %s133_s26 = int_to_ptr.vmem [resolvable:$true] %s132_s26 }
  0x11   : > { %s143_s27 = sand.u32 1, %s4494_s14   ;;  %p4591_p13 = pnand %p4234_p11, %p4557_p4 }
  0x12   : > { %p4585_p12 = pnand %p4225_p10, %p4563_p5  ;;  %s3629_s30 = sshll.u32 %s143_s27, 12 }
  0x13   : > { %s6684_s29 = scalar_select %p4591_p13, 1, 0 }
  0x14   : > { %s4402_s6 = scalar_lea.hbm %s6666_s2, 16  ;;  %p4404_p1 = pneg %p4585_p12 }
  0x15   : > { %p4403_p0 = scmp.ne.s32.totalorder %s6666_s2, %s4402_s6  ;;  %p4409_p4 = scmp.lt.u32.totalorder %s4402_s6, %s6666_s2 }
  0x17   : > { %p4405_p2 = pnand %p4404_p1, %p4403_p0 }
  0x19   : > { %p4406_p3 = pneg %p4405_p2 }
  0x1b   : > { %p4411_p6 = pnand %p4409_p4, %p4406_p3 }
  0x1d   : > { %4414 = shalt.err (!%p4411_p6)
}
  0x1e   : > { %s4415_s11 = scalar_lea.vmem %s133_s26, 16  ;;  %s4422_s12 = scalar_lea.vmem %s133_s26, 32 }
  0x1f   : > { %p4416_p7 = scmp.ne.s32.totalorder %s133_s26, %s4415_s11  ;;  %p4423_p5 = scmp.lt.s32.totalorder %s133_s26, %s133_s26 }
  0x20   : > { %p4424_p8 = scmp.lt.s32.totalorder %s4422_s12, %s4415_s11 }
  0x21   : > { %p4418_p10 = pnand %p4416_p7, %p4404_p1 }
  0x22   : > { %p4425_p9 = por %p4424_p8, %p4423_p5 }
  0x23   : > { %p4419_p11 = pneg %p4418_p10 }
  0x25   : > { %p4426_p13 = pnand %p4425_p9, %p4419_p11 }
  0x27   : > { %4429 = shalt.err (!%p4426_p13)
}
  0x28   : > { %4228 = dma.hbm_to_vmem [thread:$0]  (!%p4585_p12), %s6666_s2, 16, %s133_s26, [#allocation5]  }
  0x29   : > { %s3642_s21 = sshll.u32 %s4498_s15, 16  ;;  %s147_s6 = scalar_lea.vmem [#allocation2], %s3629_s30 }
  0x2a   : > { %s4615_s5 = scalar_lea.hbm %s6664_s0, %s3642_s21  ;;  %s155_s7 = sshll.u32 %s147_s6, 4  ;;  %s4617_s7 = int_to_ptr.vmem [resolvable:$true] %s155_s7 }
  0x2b   : > { %s4619_s28 = scalar_lea.sflag [#allocation3], %s143_s27  ;;  %s4430_s8 = scalar_lea.hbm %s4615_s5, 65536 }
  0x2c   : > { %p4431_p5 = scmp.ne.s32.totalorder %s4615_s5, %s4430_s8  ;;  %p6685_p8 = scmp.ne.s32.totalorder %s6684_s29, 0 }
  0x2d   : > { %s4435_s10 = scalar_lea.hbm %s6664_s0, 131072  ;;  %p4436_p0 = scmp.lt.u32.totalorder %s4615_s5, %s6664_s0 }
  0x2e   : > { %p4432_p9 = pneg %p6685_p8  ;;  %p4437_p1 = scmp.lt.u32.totalorder %s4435_s10, %s4430_s8 }
  0x2f   : > { %p4439_p3 = scmp.lt.u32.totalorder %s4430_s8, %s4615_s5 }
  0x30   : > { %p4433_p12 = pnand %p4432_p9, %p4431_p5  ;;  %p4438_p2 = por %p4437_p1, %p4436_p0 }
  0x32   : > { %p4434_p13 = pneg %p4433_p12  ;;  %p4440_p4 = por %p4439_p3, %p4438_p2 }
  0x34   : > { %p4441_p6 = pnand %p4440_p4, %p4434_p13 }
  0x36   : > { %4444 = shalt.err (!%p4441_p6)
}
  0x37   : > { %s4445_s27 = scalar_lea.vmem %s4617_s7, 65536  ;;  %s4501_s30 = smov [#allocation2]  }
  0x38   : > { %p4446_p7 = scmp.ne.s32.totalorder %s4617_s7, %s4445_s27  ;;  %s4450_s18 = sshll.u32 %s4501_s30, 4  ;;  %s4451_s18 = int_to_ptr.vmem [resolvable:$false] %s4450_s18 }
  0x39   : > { %s4452_s19 = scalar_lea.vmem %s4451_s18, 131072  ;;  %p4453_p5 = scmp.lt.s32.totalorder %s4617_s7, %s4451_s18 }
  0x3a   : > { %p4448_p10 = pnand %p4446_p7, %p4432_p9  ;;  %p4454_p12 = scmp.lt.s32.totalorder %s4452_s19, %s4445_s27 }
  0x3c   : > { %p4449_p11 = pneg %p4448_p10  ;;  %p4455_p0 = por %p4454_p12, %p4453_p5 }
  0x3e   : > { %p4456_p1 = pnand %p4455_p0, %p4449_p11 }
  0x40   : > { %4459 = shalt.err (!%p4456_p1)
}
  0x41   : > { %s4502_s21 = smov 1024   ;;  %s4503_s25 = smov 64  }
  0x42   : > { %4232 = dma.hbm_to_vmem [thread:$0]  (!%p6685_p8), %s4615_s5, 65536, %s4617_s7, %s4619_s28, %s4502_s21, %s4502_s21, %s4503_s25  }
  0x43   : > { %p6686_p9 = scmp.ne.s32.totalorder %s6682_s24, 0 }
  0x45   : > { %167 = sbr.rel (%p6686_p9) target bundleno = 1046 (0x416), region = 32 }
  0x4c   : > { %s169_s4 = sand.u32 1, %s4490_s13   ;;  %p6687_p13 = scmp.ne.s32.totalorder %s6681_s23, 0 }
  0x4d   : > { %s3634_s6 = sshll.u32 %s169_s4, 12  ;;  %s170_s8 = scalar_lea.sflag [#allocation3], %s169_s4 }
  0x4e   : > { %s4650_s26 = scalar_lea.vmem [#allocation2], %s3634_s6 }
  0x4f   : > { %4477 = dma.done.wait (%p6687_p13), %s170_s8, 65536  }
  0x50   : > { %4479 = vsyncadd (%p6687_p13), %s170_s8, 4294901760  ;;  %p6688_p2 = scmp.ne.s32.totalorder %s6680_s22, 0 }
  0x52   : > { %4481 = dma.done.wait (%p6688_p2), [#allocation5], 16  }
  0x53   : > { %4483 = vsyncadd (%p6688_p2), [#allocation5], 4294967280  ;;  %v4504_v0 = vmov 0.0|0.0   ;;  %v719_v1 = vld [vmem:[%s6665_s1] sm:$0xff]  ;;  %v720_v2 = vld [vmem:[%s6665_s1 + $0x8] sm:$0xff]  ;;  %vm2394_vm0 = vcmask 80896  }
  0x54   : > { %3643 = vmatprep.subr.bf16.mxu1 %v4504_v0  ;;  %3739 = vmatprep.subr.bf16.mxu0 %v4504_v0  ;;  %v783_v3 = vld [vmem:[%s6665_s1 + $0x200] sm:$0xff]  ;;  %v3644_v4 = vpack.c.bf16 %v720_v2, %v719_v1  ;;  %v784_v5 = vld [vmem:[%s6665_s1 + $0x208] sm:$0xff]  ;;  %v721_v6 = vld [vmem:[%s6665_s1 + $0x10] sm:$0xff] }
  0x55   : > { %v722_v7 = vld [vmem:[%s6665_s1 + $0x18] sm:$0xff]  ;;  %v3740_v8 = vpack.c.bf16 %v784_v5, %v783_v3  ;;  %v785_v9 = vld [vmem:[%s6665_s1 + $0x210] sm:$0xff]  ;;  %v723_v13 = vld [vmem:[%s6665_s1 + $0x20] sm:$0xff] }
  0x56   : > { %v786_v10 = vld [vmem:[%s6665_s1 + $0x218] sm:$0xff]  ;;  %3645 = vmatpush1.bf16.msra.mxu1 %v3644_v4  ;;  %v3647_v11 = vpack.c.bf16 %v722_v7, %v721_v6  ;;  %v724_v14 = vld [vmem:[%s6665_s1 + $0x28] sm:$0xff]  ;;  %v787_v15 = vld [vmem:[%s6665_s1 + $0x220] sm:$0xff] }
  0x57   : > { %3741 = vmatpush1.bf16.msra.mxu0 %v3740_v8  ;;  %3646 = vmatprep.subr.bf16.mxu1 %v4504_v0  ;;  %v3743_v12 = vpack.c.bf16 %v786_v10, %v785_v9  ;;  %v788_v16 = vld [vmem:[%s6665_s1 + $0x228] sm:$0xff]  ;;  %v3650_v17 = vpack.c.bf16 %v724_v14, %v723_v13  ;;  %v725_v19 = vld [vmem:[%s6665_s1 + $0x30] sm:$0xff]  ;;  %v726_v20 = vld [vmem:[%s6665_s1 + $0x38] sm:$0xff] }
  0x58   : > { %3742 = vmatprep.subr.bf16.mxu0 %v4504_v0  ;;  %v3746_v18 = vpack.c.bf16 %v788_v16, %v787_v15  ;;  %v789_v21 = vld [vmem:[%s6665_s1 + $0x230] sm:$0xff]  ;;  %v790_v22 = vld [vmem:[%s6665_s1 + $0x238] sm:$0xff]  ;;  %v3653_v23 = vpack.c.bf16 %v726_v20, %v725_v19  ;;  %v727_v25 = vld [vmem:[%s6665_s1 + $0x40] sm:$0xff] }
  0x59   : > { %v3749_v24 = vpack.c.bf16 %v790_v22, %v789_v21  ;;  %v728_v26 = vld [vmem:[%s6665_s1 + $0x48] sm:$0xff]  ;;  %v791_v27 = vld [vmem:[%s6665_s1 + $0x240] sm:$0xff]  ;;  %v729_v31 = vld [vmem:[%s6665_s1 + $0x50] sm:$0xff] }
  0x5a   : > { %3648 = vmatpush1.bf16.msra.mxu1 %v3647_v11  ;;  %v792_v28 = vld [vmem:[%s6665_s1 + $0x248] sm:$0xff]  ;;  %v3656_v29 = vpack.c.bf16 %v728_v26, %v727_v25  ;;  %v730_v32 = vld [vmem:[%s6665_s1 + $0x58] sm:$0xff]  ;;  %v793_v33 = vld [vmem:[%s6665_s1 + $0x250] sm:$0xff] }
  0x5b   : > { %3744 = vmatpush1.bf16.msra.mxu0 %v3743_v12  ;;  %3649 = vmatprep.subr.bf16.mxu1 %v4504_v0  ;;  %v3752_v30 = vpack.c.bf16 %v792_v28, %v791_v27  ;;  %v794_v34 = vld [vmem:[%s6665_s1 + $0x258] sm:$0xff]  ;;  %v3659_v35 = vpack.c.bf16 %v730_v32, %v729_v31  ;;  %v731_v37 = vld [vmem:[%s6665_s1 + $0x60] sm:$0xff]  ;;  %v732_v38 = vld [vmem:[%s6665_s1 + $0x68] sm:$0xff] }
  0x5c   : > { %3745 = vmatprep.subr.bf16.mxu0 %v4504_v0  ;;  %v3755_v36 = vpack.c.bf16 %v794_v34, %v793_v33  ;;  %v795_v39 = vld [vmem:[%s6665_s1 + $0x260] sm:$0xff]  ;;  %v796_v40 = vld [vmem:[%s6665_s1 + $0x268] sm:$0xff]  ;;  %v3662_v43 = vpack.c.bf16 %v732_v38, %v731_v37  ;;  %v733_v45 = vld [vmem:[%s6665_s1 + $0x70] sm:$0xff] }
  0x5d   : > { %v208_v41 = vld [vmem:[%s4650_s26 + $0x8] sm:$0xff]  ;;  %v3758_v44 = vpack.c.bf16 %v796_v40, %v795_v39  ;;  %v734_v46 = vld [vmem:[%s6665_s1 + $0x78] sm:$0xff]  ;;  %v797_v47 = vld [vmem:[%s6665_s1 + $0x270] sm:$0xff] }
  0x5e   : > { %3651 = vmatpush1.bf16.msra.mxu1 %v3650_v17  ;;  %v212_v42 = vld [vmem:[%s4650_s26 + $0x28] sm:$0xff]  ;;  %918 = vmatprep.mubr.f32.mxu1 %v208_v41  ;;  %v798_v48 = vld [vmem:[%s6665_s1 + $0x278] sm:$0xff]  ;;  %v3665_v49 = vpack.c.bf16 %v734_v46, %v733_v45  ;;  %v735_v51 = vld [vmem:[%s6665_s1 + $0x80] sm:$0xff] }
  0x5f   : > { %3747 = vmatpush1.bf16.msra.mxu0 %v3746_v18  ;;  %3652 = vmatprep.subr.bf16.mxu1 %v4504_v0  ;;  %v3761_v50 = vpack.c.bf16 %v798_v48, %v797_v47  ;;  %v736_v52 = vld [vmem:[%s6665_s1 + $0x88] sm:$0xff]  ;;  %v799_v53 = vld [vmem:[%s6665_s1 + $0x280] sm:$0xff]  ;;  %v737_v57 = vld [vmem:[%s6665_s1 + $0x90] sm:$0xff] }
  0x60   : > { %3748 = vmatprep.subr.bf16.mxu0 %v4504_v0  ;;  %1688 = vmatprep.mubr.f32.mxu0 %v212_v42  ;;  %v800_v54 = vld [vmem:[%s6665_s1 + $0x288] sm:$0xff]  ;;  %v3668_v55 = vpack.c.bf16 %v736_v52, %v735_v51  ;;  %v738_v58 = vld [vmem:[%s6665_s1 + $0x98] sm:$0xff]  ;;  %v801_v59 = vld [vmem:[%s6665_s1 + $0x290] sm:$0xff] }
  0x61   : > { %v3764_v56 = vpack.c.bf16 %v800_v54, %v799_v53  ;;  %v802_v60 = vld [vmem:[%s6665_s1 + $0x298] sm:$0xff]  ;;  %v3671_v61 = vpack.c.bf16 %v738_v58, %v737_v57  ;;  %v739_v63 = vld [vmem:[%s6665_s1 + $0xa0] sm:$0xff]  ;;  %v740_v1 = vld [vmem:[%s6665_s1 + $0xa8] sm:$0xff] }
  0x62   : > { %3654 = vmatpush1.bf16.msra.mxu1 %v3653_v23  ;;  %v3767_v62 = vpack.c.bf16 %v802_v60, %v801_v59  ;;  %v803_v2 = vld [vmem:[%s6665_s1 + $0x2a0] sm:$0xff]  ;;  %v804_v3 = vld [vmem:[%s6665_s1 + $0x2a8] sm:$0xff]  ;;  %v3674_v4 = vpack.c.bf16 %v740_v1, %v739_v63  ;;  %v741_v6 = vld [vmem:[%s6665_s1 + $0xb0] sm:$0xff] }
  0x63   : > { %3750 = vmatpush1.bf16.msra.mxu0 %v3749_v24  ;;  %3655 = vmatprep.subr.bf16.mxu1 %v4504_v0  ;;  %v3770_v5 = vpack.c.bf16 %v804_v3, %v803_v2  ;;  %v742_v7 = vld [vmem:[%s6665_s1 + $0xb8] sm:$0xff]  ;;  %v805_v8 = vld [vmem:[%s6665_s1 + $0x2b0] sm:$0xff]  ;;  %v743_v12 = vld [vmem:[%s6665_s1 + $0xc0] sm:$0xff] }
  0x64   : > { %3751 = vmatprep.subr.bf16.mxu0 %v4504_v0  ;;  %v806_v9 = vld [vmem:[%s6665_s1 + $0x2b8] sm:$0xff]  ;;  %v3677_v10 = vpack.c.bf16 %v742_v7, %v741_v6  ;;  %v744_v13 = vld [vmem:[%s6665_s1 + $0xc8] sm:$0xff]  ;;  %v807_v14 = vld [vmem:[%s6665_s1 + $0x2c0] sm:$0xff] }
  0x65   : > { %v3773_v11 = vpack.c.bf16 %v806_v9, %v805_v8  ;;  %v808_v15 = vld [vmem:[%s6665_s1 + $0x2c8] sm:$0xff]  ;;  %v3680_v16 = vpack.c.bf16 %v744_v13, %v743_v12  ;;  %v745_v18 = vld [vmem:[%s6665_s1 + $0xd0] sm:$0xff]  ;;  %v746_v19 = vld [vmem:[%s6665_s1 + $0xd8] sm:$0xff] }
  0x66   : > { %3657 = vmatpush1.bf16.msra.mxu1 %v3656_v29  ;;  %v3776_v17 = vpack.c.bf16 %v808_v15, %v807_v14  ;;  %v809_v20 = vld [vmem:[%s6665_s1 + $0x2d0] sm:$0xff]  ;;  %v810_v21 = vld [vmem:[%s6665_s1 + $0x2d8] sm:$0xff]  ;;  %v3683_v22 = vpack.c.bf16 %v746_v19, %v745_v18  ;;  %v747_v24 = vld [vmem:[%s6665_s1 + $0xe0] sm:$0xff] }
  0x67   : > { %3753 = vmatpush1.bf16.msra.mxu0 %v3752_v30  ;;  %3658 = vmatprep.subr.bf16.mxu1 %v4504_v0  ;;  %v3779_v23 = vpack.c.bf16 %v810_v21, %v809_v20  ;;  %v748_v25 = vld [vmem:[%s6665_s1 + $0xe8] sm:$0xff]  ;;  %v811_v26 = vld [vmem:[%s6665_s1 + $0x2e0] sm:$0xff]  ;;  %v749_v30 = vld [vmem:[%s6665_s1 + $0xf0] sm:$0xff] }
  0x68   : > { %3754 = vmatprep.subr.bf16.mxu0 %v4504_v0  ;;  %v812_v27 = vld [vmem:[%s6665_s1 + $0x2e8] sm:$0xff]  ;;  %v3686_v28 = vpack.c.bf16 %v748_v25, %v747_v24  ;;  %v750_v31 = vld [vmem:[%s6665_s1 + $0xf8] sm:$0xff]  ;;  %v813_v32 = vld [vmem:[%s6665_s1 + $0x2f0] sm:$0xff] }
  0x69   : > { %v3782_v29 = vpack.c.bf16 %v812_v27, %v811_v26  ;;  %v814_v33 = vld [vmem:[%s6665_s1 + $0x2f8] sm:$0xff]  ;;  %v3689_v34 = vpack.c.bf16 %v750_v31, %v749_v30  ;;  %v752_v37 = vld [vmem:[%s6665_s1 + $0x108] sm:$0xff]  ;;  %v815_v38 = vld [vmem:[%s6665_s1 + $0x300] sm:$0xff] }
  0x6a   : > { %3660 = vmatpush1.bf16.msra.mxu1 %v3659_v35  ;;  %v3785_v35 = vpack.c.bf16 %v814_v33, %v813_v32  ;;  %v816_v39 = vld [vmem:[%s6665_s1 + $0x308] sm:$0xff]  ;;  %v207_v40 = vld [vmem:[%s4650_s26] sm:$0xff]  ;;  %v753_v46 = vld [vmem:[%s6665_s1 + $0x110] sm:$0xff] }
  0x6b   : > { %3756 = vmatpush1.bf16.msra.mxu0 %v3755_v36  ;;  %3661 = vmatprep.subr.bf16.mxu1 %v4504_v0  ;;  %v751_v36 = vld [vmem:[%s6665_s1 + $0x100] sm:$0xff]  ;;  %v3788_v45 = vpack.c.bf16 %v816_v39, %v815_v38  ;;  %v754_v47 = vld [vmem:[%s6665_s1 + $0x118] sm:$0xff]  ;;  %v817_v48 = vld [vmem:[%s6665_s1 + $0x310] sm:$0xff] }
  0x6c   : > { %3757 = vmatprep.subr.bf16.mxu0 %v4504_v0  ;;  %v3692_v41 = vpack.c.bf16 %v752_v37, %v751_v36  ;;  %v211_v42 = vld [vmem:[%s4650_s26 + $0x20] sm:$0xff]  ;;  %v224_v52 = vld [vmem:[%s4650_s26 + $0x88] sm:$0xff]  ;;  %v3695_v53 = vpack.c.bf16 %v754_v47, %v753_v46  ;;  %v757_v3 = vld [vmem:[%s6665_s1 + $0x130] sm:$0xff] }
  0x6d   : > { %v219_v51 = vld [vmem:[%s4650_s26 + $0x60] sm:$0xff]  ;;  %v228_v54 = vld [vmem:[%s4650_s26 + $0xa8] sm:$0xff]  ;;  %v822_v6 = vld [vmem:[%s6665_s1 + $0x338] sm:$0xff] }
  0x6e   : > { %3663 = vmatpush1.bf16.msra.mxu1 %v3662_v43  ;;  %v216_v43 = vld [vmem:[%s4650_s26 + $0x48] sm:$0xff]  ;;  %v819_v58 = vld [vmem:[%s6665_s1 + $0x320] sm:$0xff]  ;;  %v762_v24 = vld [vmem:[%s6665_s1 + $0x158] sm:$0xff] }
  0x6f   : > { %3759 = vmatpush1.bf16.msra.mxu0 %v3758_v44  ;;  %3664 = vmatprep.subr.bf16.mxu1 %v4504_v0  ;;  %v220_v44 = vld [vmem:[%s4650_s26 + $0x68] sm:$0xff]  ;;  %v223_v60 = vld [vmem:[%s4650_s26 + $0x80] sm:$0xff]  ;;  %v825_v25 = vld [vmem:[%s6665_s1 + $0x350] sm:$0xff] }
  0x70   : > { %3760 = vmatprep.subr.bf16.mxu0 %v4504_v0  ;;  %v756_v57 = vld [vmem:[%s6665_s1 + $0x128] sm:$0xff]  ;;  %v231_v7 = vld [vmem:[%s4650_s26 + $0xc0] sm:$0xff]  ;;  %v826_v26 = vld [vmem:[%s6665_s1 + $0x358] sm:$0xff] }
  0x71   : > { %v820_v59 = vld [vmem:[%s6665_s1 + $0x328] sm:$0xff]  ;;  %v235_v8 = vld [vmem:[%s4650_s26 + $0xe0] sm:$0xff]  ;;  %v3803_v32 = vpack.c.bf16 %v826_v26, %v825_v25  ;;  %v830_v46 = vld [vmem:[%s6665_s1 + $0x378] sm:$0xff] }
  0x72   : > { %3666 = vmatpush1.bf16.msra.mxu1 %v3665_v49  ;;  %v818_v49 = vld [vmem:[%s6665_s1 + $0x318] sm:$0xff]  ;;  %v236_v1 = vld [vmem:[%s4650_s26 + $0xe8] sm:$0xff]  ;;  %v3794_v2 = vpack.c.bf16 %v820_v59, %v819_v58  ;;  %v759_v13 = vld [vmem:[%s6665_s1 + $0x140] sm:$0xff] }
  0x73   : > { %3762 = vmatpush1.bf16.msra.mxu0 %v3761_v50  ;;  %3667 = vmatprep.subr.bf16.mxu1 %v4504_v0  ;;  %v215_v50 = vld [vmem:[%s4650_s26 + $0x40] sm:$0xff]  ;;  %v240_v9 = vld [vmem:[%s4650_s26 + $0x108] sm:$0xff] }
  0x74   : > { %3763 = vmatprep.subr.bf16.mxu0 %v4504_v0  ;;  %v760_v14 = vld [vmem:[%s6665_s1 + $0x148] sm:$0xff]  ;;  %v823_v15 = vld [vmem:[%s6665_s1 + $0x340] sm:$0xff] }
  0x75   : > { %v243_v18 = vld [vmem:[%s4650_s26 + $0x120] sm:$0xff]  ;;  %v248_v19 = vld [vmem:[%s4650_s26 + $0x148] sm:$0xff]  ;;  %v3704_v20 = vpack.c.bf16 %v760_v14, %v759_v13 }
  0x76   : > { %3669 = vmatpush1.bf16.msra.mxu1 %v3668_v55  ;;  %v3791_v55 = vpack.c.bf16 %v818_v49, %v817_v48  ;;  %v252_v21 = vld [vmem:[%s4650_s26 + $0x168] sm:$0xff]  ;;  %v247_v27 = vld [vmem:[%s4650_s26 + $0x140] sm:$0xff] }
  0x77   : > { %3765 = vmatpush1.bf16.msra.mxu0 %v3764_v56  ;;  %3670 = vmatprep.subr.bf16.mxu1 %v4504_v0  ;;  %v755_v56 = vld [vmem:[%s6665_s1 + $0x120] sm:$0xff]  ;;  %v260_v31 = vld [vmem:[%s4650_s26 + $0x1a8] sm:$0xff] }
  0x78   : > { %3766 = vmatprep.subr.bf16.mxu0 %v4504_v0  ;;  %v3698_v63 = vpack.c.bf16 %v756_v57, %v755_v56  ;;  %v763_v33 = vld [vmem:[%s6665_s1 + $0x160] sm:$0xff]  ;;  %v828_v36 = vld [vmem:[%s6665_s1 + $0x368] sm:$0xff] }
  0x79   : > { %v255_v37 = vld [vmem:[%s4650_s26 + $0x180] sm:$0xff]  ;;  %v264_v39 = vld [vmem:[%s4650_s26 + $0x1c8] sm:$0xff] }
  0x7a   : > { %3672 = vmatpush1.bf16.msra.mxu1 %v3671_v61  ;;  %v227_v61 = vld [vmem:[%s4650_s26 + $0xa0] sm:$0xff]  ;;  %v272_v49 = vld [vmem:[%s4650_s26 + $0x208] sm:$0xff] }
  0x7b   : > { %3768 = vmatpush1.bf16.msra.mxu0 %v3767_v62  ;;  %3673 = vmatprep.subr.bf16.mxu1 %v4504_v0  ;;  %v232_v62 = vld [vmem:[%s4650_s26 + $0xc8] sm:$0xff]  ;;  %v259_v38 = vld [vmem:[%s4650_s26 + $0x1a0] sm:$0xff] }
  0x7c   : > { %3769 = vmatprep.subr.bf16.mxu0 %v4504_v0  ;;  %v263_v47 = vld [vmem:[%s4650_s26 + $0x1c0] sm:$0xff]  ;;  %v832_v56 = vld [vmem:[%s6665_s1 + $0x388] sm:$0xff] }
  0x7d   : > { %v267_v48 = vld [vmem:[%s4650_s26 + $0x1e0] sm:$0xff]  ;;  %v280_v59 = vld [vmem:[%s4650_s26 + $0x248] sm:$0xff] }
  0x7e   : > { %3675 = vmatpush1.bf16.msra.mxu1 %v3674_v4  ;;  %v758_v4 = vld [vmem:[%s6665_s1 + $0x138] sm:$0xff]  ;;  %v271_v57 = vld [vmem:[%s4650_s26 + $0x200] sm:$0xff]  ;;  %v836_v13 = vld [vmem:[%s6665_s1 + $0x3a8] sm:$0xff] }
  0x7f   : > { %3771 = vmatpush1.bf16.msra.mxu0 %v3770_v5  ;;  %3676 = vmatprep.subr.bf16.mxu1 %v4504_v0  ;;  %v821_v5 = vld [vmem:[%s6665_s1 + $0x330] sm:$0xff]  ;;  %v275_v58 = vld [vmem:[%s4650_s26 + $0x220] sm:$0xff]  ;;  %v312_v26 = vld [vmem:[%s4650_s26 + $0x348] sm:$0xff] }
  0x80   : > { %3772 = vmatprep.subr.bf16.mxu0 %v4504_v0  ;;  %v3797_v12 = vpack.c.bf16 %v822_v6, %v821_v5  ;;  %v283_v5 = vld [vmem:[%s4650_s26 + $0x260] sm:$0xff]  ;;  %v288_v6 = vld [vmem:[%s4650_s26 + $0x288] sm:$0xff] }
  0x81   : > { %v287_v14 = vld [vmem:[%s4650_s26 + $0x280] sm:$0xff] }
  0x82   : > { %3678 = vmatpush1.bf16.msra.mxu1 %v3677_v10  ;;  %v3701_v10 = vpack.c.bf16 %v758_v4, %v757_v3  ;;  %v834_v3 = vld [vmem:[%s6665_s1 + $0x398] sm:$0xff]  ;;  %v279_v4 = vld [vmem:[%s4650_s26 + $0x240] sm:$0xff] }
  0x83   : > { %3774 = vmatpush1.bf16.msra.mxu0 %v3773_v11  ;;  %3679 = vmatprep.subr.bf16.mxu1 %v4504_v0  ;;  %v244_v11 = vld [vmem:[%s4650_s26 + $0x128] sm:$0xff]  ;;  %v307_v25 = vld [vmem:[%s4650_s26 + $0x320] sm:$0xff] }
  0x84   : > { %3775 = vmatprep.subr.bf16.mxu0 %v4504_v0 }
  0x86   : > { %3681 = vmatpush1.bf16.msra.mxu1 %v3680_v16  ;;  %v824_v16 = vld [vmem:[%s6665_s1 + $0x348] sm:$0xff] }
  0x87   : > { %3777 = vmatpush1.bf16.msra.mxu0 %v3776_v17  ;;  %3682 = vmatprep.subr.bf16.mxu1 %v4504_v0  ;;  %v239_v17 = vld [vmem:[%s4650_s26 + $0x100] sm:$0xff] }
  0x88   : > { %3778 = vmatprep.subr.bf16.mxu0 %v4504_v0 }
  0x8a   : > { %3684 = vmatpush1.bf16.msra.mxu1 %v3683_v22  ;;  %v3800_v22 = vpack.c.bf16 %v824_v16, %v823_v15  ;;  %v291_v15 = vld [vmem:[%s4650_s26 + $0x2a0] sm:$0xff]  ;;  %v296_v16 = vld [vmem:[%s4650_s26 + $0x2c8] sm:$0xff] }
  0x8b   : > { %3780 = vmatpush1.bf16.msra.mxu0 %v3779_v23  ;;  %3685 = vmatprep.subr.bf16.mxu1 %v4504_v0  ;;  %v761_v23 = vld [vmem:[%s6665_s1 + $0x150] sm:$0xff] }
  0x8c   : > { %3781 = vmatprep.subr.bf16.mxu0 %v4504_v0  ;;  %v3707_v30 = vpack.c.bf16 %v762_v24, %v761_v23  ;;  %v308_v23 = vld [vmem:[%s4650_s26 + $0x328] sm:$0xff]  ;;  %v303_v24 = vld [vmem:[%s4650_s26 + $0x300] sm:$0xff] }
  0x8e   : > { %3687 = vmatpush1.bf16.msra.mxu1 %v3686_v28  ;;  %v251_v28 = vld [vmem:[%s4650_s26 + $0x160] sm:$0xff] }
  0x8f   : > { %3783 = vmatpush1.bf16.msra.mxu0 %v3782_v29  ;;  %3688 = vmatprep.subr.bf16.mxu1 %v4504_v0  ;;  %v256_v29 = vld [vmem:[%s4650_s26 + $0x188] sm:$0xff] }
  0x90   : > { %3784 = vmatprep.subr.bf16.mxu0 %v4504_v0 }
  0x92   : > { %3690 = vmatpush1.bf16.msra.mxu1 %v3689_v34  ;;  %v764_v34 = vld [vmem:[%s6665_s1 + $0x168] sm:$0xff] }
  0x93   : > { %3786 = vmatpush1.bf16.msra.mxu0 %v3785_v35  ;;  %3691 = vmatprep.subr.bf16.mxu1 %v4504_v0  ;;  %v827_v35 = vld [vmem:[%s6665_s1 + $0x360] sm:$0xff] }
  0x94   : > { %3787 = vmatprep.subr.bf16.mxu0 %v4504_v0 }
  0x95   : > { %919 = vmatmul.mubr.f32.vlgmr.msra.gmra.mrb[0].mxu1 %v207_v40  ;;  %v3710_v40 = vpack.c.bf16 %v764_v34, %v763_v33  ;;  %v837_v34 = vld [vmem:[%s6665_s1 + $0x3b0] sm:$0xff] }
  0x96   : > { %1689 = vmatmul.mubr.f32.vlgmr.msra.gmra.mrb[0].mxu0 %v211_v42  ;;  %3693 = vmatpush1.bf16.msra.mxu1 %v3692_v41  ;;  %v268_v41 = vld [vmem:[%s4650_s26 + $0x1e8] sm:$0xff]  ;;  %v3806_v42 = vpack.c.bf16 %v828_v36, %v827_v35  ;;  %v838_v35 = vld [vmem:[%s6665_s1 + $0x3b8] sm:$0xff] }
  0x97   : > { %923 = vmatprep.mubr.f32.mxu1 %v216_v43  ;;  %1693 = vmatprep.mubr.f32.mxu0 %v220_v44  ;;  %v765_v43 = vld [vmem:[%s6665_s1 + $0x170] sm:$0xff]  ;;  %v766_v44 = vld [vmem:[%s6665_s1 + $0x178] sm:$0xff]  ;;  %v324_v36 = vld [vmem:[%s4650_s26 + $0x3a8] sm:$0xff] }
  0x98   : > { %3789 = vmatpush1.bf16.msra.mxu0 %v3788_v45  ;;  %3694 = vmatprep.subr.bf16.mxu1 %v4504_v0  ;;  %v829_v45 = vld [vmem:[%s6665_s1 + $0x370] sm:$0xff] }
  0x99   : > { %924 = vmatmul.mubr.f32.gmra.mrb[2].mxu1 %v215_v50  ;;  %3790 = vmatprep.subr.bf16.mxu0 %v4504_v0  ;;  %v3713_v50 = vpack.c.bf16 %v766_v44, %v765_v43  ;;  %v331_v43 = vld [vmem:[%s4650_s26 + $0x3e0] sm:$0xff]  ;;  %v336_v44 = vld [vmem:[%s4650_s26 + $0x408] sm:$0xff] }
  0x9a   : > { %1694 = vmatmul.mubr.f32.gmra.mrb[2].mxu0 %v219_v51  ;;  %928 = vmatprep.mubr.f32.mxu1 %v224_v52  ;;  %v276_v51 = vld [vmem:[%s4650_s26 + $0x228] sm:$0xff]  ;;  %v3809_v52 = vpack.c.bf16 %v830_v46, %v829_v45  ;;  %v335_v46 = vld [vmem:[%s4650_s26 + $0x400] sm:$0xff] }
  0x9b   : > { %1698 = vmatprep.mubr.f32.mxu0 %v228_v54  ;;  %3696 = vmatpush1.bf16.msra.mxu1 %v3695_v53  ;;  %v767_v53 = vld [vmem:[%s6665_s1 + $0x180] sm:$0xff]  ;;  %v768_v54 = vld [vmem:[%s6665_s1 + $0x188] sm:$0xff] }
  0x9c   : > { %3792 = vmatpush1.bf16.msra.mxu0 %v3791_v55  ;;  %3697 = vmatprep.subr.bf16.mxu1 %v4504_v0  ;;  %v831_v55 = vld [vmem:[%s6665_s1 + $0x380] sm:$0xff]  ;;  %v340_v45 = vld [vmem:[%s4650_s26 + $0x428] sm:$0xff] }
  0x9d   : > { %929 = vmatmul.mubr.f32.gmra.mrb[4].mxu1 %v223_v60  ;;  %3793 = vmatprep.subr.bf16.mxu0 %v4504_v0  ;;  %v3716_v60 = vpack.c.bf16 %v768_v54, %v767_v53  ;;  %v776_v53 = vld [vmem:[%s6665_s1 + $0x1c8] sm:$0xff] }
  0x9e   : > { %1699 = vmatmul.mubr.f32.gmra.mrb[4].mxu0 %v227_v61  ;;  %933 = vmatprep.mubr.f32.mxu1 %v232_v62  ;;  %v284_v61 = vld [vmem:[%s4650_s26 + $0x268] sm:$0xff]  ;;  %v3812_v62 = vpack.c.bf16 %v832_v56, %v831_v55  ;;  %v839_v56 = vld [vmem:[%s6665_s1 + $0x3c0] sm:$0xff] }
  0x9f   : > { %1703 = vmatprep.mubr.f32.mxu0 %v236_v1  ;;  %3699 = vmatpush1.bf16.msra.mxu1 %v3698_v63  ;;  %v769_v63 = vld [vmem:[%s6665_s1 + $0x190] sm:$0xff]  ;;  %v770_v1 = vld [vmem:[%s6665_s1 + $0x198] sm:$0xff]  ;;  %v352_v54 = vld [vmem:[%s4650_s26 + $0x488] sm:$0xff] }
  0xa0   : > { %3795 = vmatpush1.bf16.msra.mxu0 %v3794_v2  ;;  %3700 = vmatprep.subr.bf16.mxu1 %v4504_v0  ;;  %v833_v2 = vld [vmem:[%s6665_s1 + $0x390] sm:$0xff] }
  0xa1   : > { %934 = vmatmul.mubr.f32.gmra.mrb[6].mxu1 %v231_v7  ;;  %3796 = vmatprep.subr.bf16.mxu0 %v4504_v0  ;;  %v3719_v7 = vpack.c.bf16 %v770_v1, %v769_v63  ;;  %v364_v63 = vld [vmem:[%s4650_s26 + $0x4e8] sm:$0xff]  ;;  %v359_v1 = vld [vmem:[%s4650_s26 + $0x4c0] sm:$0xff] }
  0xa2   : > { %1704 = vmatmul.mubr.f32.gmra.mrb[6].mxu0 %v235_v8  ;;  %938 = vmatprep.mubr.f32.mxu1 %v240_v9  ;;  %v292_v8 = vld [vmem:[%s4650_s26 + $0x2a8] sm:$0xff]  ;;  %v3815_v9 = vpack.c.bf16 %v834_v3, %v833_v2  ;;  %v363_v2 = vld [vmem:[%s4650_s26 + $0x4e0] sm:$0xff] }
  0xa3   : > { %1708 = vmatprep.mubr.f32.mxu0 %v244_v11  ;;  %3702 = vmatpush1.bf16.msra.mxu1 %v3701_v10  ;;  %v771_v10 = vld [vmem:[%s6665_s1 + $0x1a0] sm:$0xff]  ;;  %v772_v11 = vld [vmem:[%s6665_s1 + $0x1a8] sm:$0xff] }
  0xa4   : > { %3798 = vmatpush1.bf16.msra.mxu0 %v3797_v12  ;;  %3703 = vmatprep.subr.bf16.mxu1 %v4504_v0  ;;  %v835_v12 = vld [vmem:[%s6665_s1 + $0x3a0] sm:$0xff]  ;;  %v368_v3 = vld [vmem:[%s4650_s26 + $0x508] sm:$0xff] }
  0xa5   : > { %939 = vmatmul.mubr.f32.gmra.mrb[8].mxu1 %v239_v17  ;;  %3799 = vmatprep.subr.bf16.mxu0 %v4504_v0  ;;  %v3722_v17 = vpack.c.bf16 %v772_v11, %v771_v10  ;;  %v379_v10 = vld [vmem:[%s4650_s26 + $0x560] sm:$0xff]  ;;  %v777_v11 = vld [vmem:[%s6665_s1 + $0x1d0] sm:$0xff] }
  0xa6   : > { %1709 = vmatmul.mubr.f32.gmra.mrb[8].mxu0 %v243_v18  ;;  %943 = vmatprep.mubr.f32.mxu1 %v248_v19  ;;  %v300_v18 = vld [vmem:[%s4650_s26 + $0x2e8] sm:$0xff]  ;;  %v3818_v19 = vpack.c.bf16 %v836_v13, %v835_v12  ;;  %v778_v12 = vld [vmem:[%s6665_s1 + $0x1d8] sm:$0xff] }
  0xa7   : > { %1713 = vmatprep.mubr.f32.mxu0 %v252_v21  ;;  %3705 = vmatpush1.bf16.msra.mxu1 %v3704_v20  ;;  %v295_v20 = vld [vmem:[%s4650_s26 + $0x2c0] sm:$0xff]  ;;  %v384_v13 = vld [vmem:[%s4650_s26 + $0x588] sm:$0xff] }
  0xa8   : > { %3801 = vmatpush1.bf16.msra.mxu0 %v3800_v22  ;;  %3706 = vmatprep.subr.bf16.mxu1 %v4504_v0  ;;  %v299_v21 = vld [vmem:[%s4650_s26 + $0x2e0] sm:$0xff]  ;;  %v304_v22 = vld [vmem:[%s4650_s26 + $0x308] sm:$0xff] }
  0xa9   : > { %944 = vmatmul.mubr.f32.gmra.mrb[10].mxu1 %v247_v27  ;;  %3802 = vmatprep.subr.bf16.mxu0 %v4504_v0  ;;  %v316_v27 = vld [vmem:[%s4650_s26 + $0x368] sm:$0xff] }
  0xaa   : > { %1714 = vmatmul.mubr.f32.gmra.mrb[10].mxu0 %v251_v28  ;;  %948 = vmatprep.mubr.f32.mxu1 %v256_v29  ;;  %v311_v28 = vld [vmem:[%s4650_s26 + $0x340] sm:$0xff] }
  0xab   : > { %1718 = vmatprep.mubr.f32.mxu0 %v260_v31  ;;  %3708 = vmatpush1.bf16.msra.mxu1 %v3707_v30  ;;  %v315_v29 = vld [vmem:[%s4650_s26 + $0x360] sm:$0xff]  ;;  %v773_v30 = vld [vmem:[%s6665_s1 + $0x1b0] sm:$0xff]  ;;  %v774_v31 = vld [vmem:[%s6665_s1 + $0x1b8] sm:$0xff] }
  0xac   : > { %3804 = vmatpush1.bf16.msra.mxu0 %v3803_v32  ;;  %3709 = vmatprep.subr.bf16.mxu1 %v4504_v0  ;;  %v320_v32 = vld [vmem:[%s4650_s26 + $0x388] sm:$0xff]  ;;  %v3725_v33 = vpack.c.bf16 %v774_v31, %v773_v30  ;;  %v407_v31 = vld [vmem:[%s4650_s26 + $0x640] sm:$0xff] }
  0xad   : > { %949 = vmatmul.mubr.f32.gmra.mrb[12].mxu1 %v255_v37  ;;  %3805 = vmatprep.subr.bf16.mxu0 %v4504_v0  ;;  %v3821_v37 = vpack.c.bf16 %v838_v35, %v837_v34  ;;  %v412_v30 = vld [vmem:[%s4650_s26 + $0x668] sm:$0xff] }
  0xae   : > { %1719 = vmatmul.mubr.f32.gmra.mrb[12].mxu0 %v259_v38  ;;  %953 = vmatprep.mubr.f32.mxu1 %v264_v39  ;;  %v319_v38 = vld [vmem:[%s4650_s26 + $0x380] sm:$0xff]  ;;  %v780_v34 = vld [vmem:[%s6665_s1 + $0x1e8] sm:$0xff] }
  0xaf   : > { %1723 = vmatprep.mubr.f32.mxu0 %v268_v41  ;;  %3711 = vmatpush1.bf16.msra.mxu1 %v3710_v40  ;;  %v323_v39 = vld [vmem:[%s4650_s26 + $0x3a0] sm:$0xff]  ;;  %v328_v40 = vld [vmem:[%s4650_s26 + $0x3c8] sm:$0xff] }
  0xb0   : > { %3807 = vmatpush1.bf16.msra.mxu0 %v3806_v42  ;;  %3712 = vmatprep.subr.bf16.mxu1 %v4504_v0  ;;  %v332_v41 = vld [vmem:[%s4650_s26 + $0x3e8] sm:$0xff]  ;;  %v327_v42 = vld [vmem:[%s4650_s26 + $0x3c0] sm:$0xff] }
  0xb1   : > { %954 = vmatmul.mubr.f32.gmra.mrb[14].mxu1 %v263_v47  ;;  %3808 = vmatprep.subr.bf16.mxu0 %v4504_v0  ;;  %v339_v47 = vld [vmem:[%s4650_s26 + $0x420] sm:$0xff]  ;;  %v416_v35 = vld [vmem:[%s4650_s26 + $0x688] sm:$0xff] }
  0xb2   : > { %1724 = vmatmul.mubr.f32.gmra.mrb[14].mxu0 %v267_v48  ;;  %958 = vmatprep.mubr.f32.mxu1 %v272_v49  ;;  %v344_v48 = vld [vmem:[%s4650_s26 + $0x448] sm:$0xff] }
  0xb3   : > { %1728 = vmatprep.mubr.f32.mxu0 %v276_v51  ;;  %3714 = vmatpush1.bf16.msra.mxu1 %v3713_v50  ;;  %v348_v49 = vld [vmem:[%s4650_s26 + $0x468] sm:$0xff]  ;;  %v343_v50 = vld [vmem:[%s4650_s26 + $0x440] sm:$0xff] }
  0xb4   : > { %3810 = vmatpush1.bf16.msra.mxu0 %v3809_v52  ;;  %3715 = vmatprep.subr.bf16.mxu1 %v4504_v0  ;;  %v347_v51 = vld [vmem:[%s4650_s26 + $0x460] sm:$0xff] }
  0xb5   : > { %959 = vmatmul.mubr.f32.gmra.mrb[16].mxu1 %v271_v57  ;;  %3811 = vmatprep.subr.bf16.mxu0 %v4504_v0  ;;  %v775_v52 = vld [vmem:[%s6665_s1 + $0x1c0] sm:$0xff]  ;;  %v840_v57 = vld [vmem:[%s6665_s1 + $0x3c8] sm:$0xff] }
  0xb6   : > { %1729 = vmatmul.mubr.f32.gmra.mrb[16].mxu0 %v275_v58  ;;  %963 = vmatprep.mubr.f32.mxu1 %v280_v59  ;;  %v3728_v55 = vpack.c.bf16 %v776_v53, %v775_v52  ;;  %v356_v58 = vld [vmem:[%s4650_s26 + $0x4a8] sm:$0xff]  ;;  %v3824_v59 = vpack.c.bf16 %v840_v57, %v839_v56  ;;  %v443_v53 = vld [vmem:[%s4650_s26 + $0x760] sm:$0xff] }
  0xb7   : > { %1733 = vmatprep.mubr.f32.mxu0 %v284_v61  ;;  %3717 = vmatpush1.bf16.msra.mxu1 %v3716_v60  ;;  %v351_v60 = vld [vmem:[%s4650_s26 + $0x480] sm:$0xff]  ;;  %v444_v52 = vld [vmem:[%s4650_s26 + $0x768] sm:$0xff] }
  0xb8   : > { %3813 = vmatpush1.bf16.msra.mxu0 %v3812_v62  ;;  %3718 = vmatprep.subr.bf16.mxu1 %v4504_v0  ;;  %v355_v61 = vld [vmem:[%s4650_s26 + $0x4a0] sm:$0xff]  ;;  %v360_v62 = vld [vmem:[%s4650_s26 + $0x4c8] sm:$0xff] }
  0xb9   : > { %964 = vmatmul.mubr.f32.gmra.mrb[18].mxu1 %v279_v4  ;;  %3814 = vmatprep.subr.bf16.mxu0 %v4504_v0  ;;  %v372_v4 = vld [vmem:[%s4650_s26 + $0x528] sm:$0xff] }
  0xba   : > { %1734 = vmatmul.mubr.f32.gmra.mrb[18].mxu0 %v283_v5  ;;  %968 = vmatprep.mubr.f32.mxu1 %v288_v6  ;;  %v367_v5 = vld [vmem:[%s4650_s26 + $0x500] sm:$0xff]  ;;  %v448_v56 = vld [vmem:[%s4650_s26 + $0x788] sm:$0xff] }
  0xbb   : > { %1738 = vmatprep.mubr.f32.mxu0 %v292_v8  ;;  %3720 = vmatpush1.bf16.msra.mxu1 %v3719_v7  ;;  %v371_v6 = vld [vmem:[%s4650_s26 + $0x520] sm:$0xff]  ;;  %v376_v7 = vld [vmem:[%s4650_s26 + $0x548] sm:$0xff] }
  0xbc   : > { %3816 = vmatpush1.bf16.msra.mxu0 %v3815_v9  ;;  %3721 = vmatprep.subr.bf16.mxu1 %v4504_v0  ;;  %v380_v8 = vld [vmem:[%s4650_s26 + $0x568] sm:$0xff]  ;;  %v375_v9 = vld [vmem:[%s4650_s26 + $0x540] sm:$0xff] }
  0xbd   : > { %969 = vmatmul.mubr.f32.gmra.mrb[20].mxu1 %v287_v14  ;;  %3817 = vmatprep.subr.bf16.mxu0 %v4504_v0  ;;  %v3731_v14 = vpack.c.bf16 %v778_v12, %v777_v11  ;;  %v471_v11 = vld [vmem:[%s4650_s26 + $0x840] sm:$0xff] }
  0xbe   : > { %1739 = vmatmul.mubr.f32.gmra.mrb[20].mxu0 %v291_v15  ;;  %973 = vmatprep.mubr.f32.mxu1 %v296_v16  ;;  %v841_v15 = vld [vmem:[%s6665_s1 + $0x3d0] sm:$0xff]  ;;  %v842_v16 = vld [vmem:[%s6665_s1 + $0x3d8] sm:$0xff]  ;;  %v475_v12 = vld [vmem:[%s4650_s26 + $0x860] sm:$0xff] }
  0xbf   : > { %1743 = vmatprep.mubr.f32.mxu0 %v300_v18  ;;  %3723 = vmatpush1.bf16.msra.mxu1 %v3722_v17  ;;  %v388_v17 = vld [vmem:[%s4650_s26 + $0x5a8] sm:$0xff]  ;;  %v3827_v18 = vpack.c.bf16 %v842_v16, %v841_v15  ;;  %v479_v15 = vld [vmem:[%s4650_s26 + $0x880] sm:$0xff] }
  0xc0   : > { %3819 = vmatpush1.bf16.msra.mxu0 %v3818_v19  ;;  %3724 = vmatprep.subr.bf16.mxu1 %v4504_v0  ;;  %v383_v19 = vld [vmem:[%s4650_s26 + $0x580] sm:$0xff] }
  0xc1   : > { %974 = vmatmul.mubr.f32.gmra.mrb[22].mxu1 %v295_v20  ;;  %3820 = vmatprep.subr.bf16.mxu0 %v4504_v0  ;;  %v387_v20 = vld [vmem:[%s4650_s26 + $0x5a0] sm:$0xff] }
  0xc2   : > { %1744 = vmatmul.mubr.f32.gmra.mrb[22].mxu0 %v299_v21  ;;  %978 = vmatprep.mubr.f32.mxu1 %v304_v22  ;;  %v392_v21 = vld [vmem:[%s4650_s26 + $0x5c8] sm:$0xff]  ;;  %v483_v16 = vld [vmem:[%s4650_s26 + $0x8a0] sm:$0xff] }
  0xc3   : > { %1748 = vmatprep.mubr.f32.mxu0 %v308_v23  ;;  %3726 = vmatpush1.bf16.msra.mxu1 %v3725_v33  ;;  %v396_v22 = vld [vmem:[%s4650_s26 + $0x5e8] sm:$0xff]  ;;  %v391_v23 = vld [vmem:[%s4650_s26 + $0x5c0] sm:$0xff] }
  0xc4   : > { %3822 = vmatpush1.bf16.msra.mxu0 %v3821_v37  ;;  %3727 = vmatprep.subr.bf16.mxu1 %v4504_v0  ;;  %v779_v33 = vld [vmem:[%s6665_s1 + $0x1e0] sm:$0xff] }
  0xc5   : > { %979 = vmatmul.mubr.f32.gmra.mrb[24].mxu1 %v303_v24  ;;  %3823 = vmatprep.subr.bf16.mxu0 %v4504_v0  ;;  %v395_v24 = vld [vmem:[%s4650_s26 + $0x5e0] sm:$0xff] }
  0xc6   : > { %1749 = vmatmul.mubr.f32.gmra.mrb[24].mxu0 %v307_v25  ;;  %983 = vmatprep.mubr.f32.mxu1 %v312_v26  ;;  %v400_v25 = vld [vmem:[%s4650_s26 + $0x608] sm:$0xff]  ;;  %v843_v37 = vld [vmem:[%s6665_s1 + $0x3e0] sm:$0xff] }
  0xc7   : > { %1753 = vmatprep.mubr.f32.mxu0 %v316_v27  ;;  %3729 = vmatpush1.bf16.msra.mxu1 %v3728_v55  ;;  %v404_v26 = vld [vmem:[%s4650_s26 + $0x628] sm:$0xff]  ;;  %v399_v27 = vld [vmem:[%s4650_s26 + $0x600] sm:$0xff]  ;;  %v782_v55 = vld [vmem:[%s6665_s1 + $0x1f8] sm:$0xff] }
  0xc8   : > { %3825 = vmatpush1.bf16.msra.mxu0 %v3824_v59  ;;  %3730 = vmatprep.subr.bf16.mxu1 %v4504_v0  ;;  %v846_v59 = vld [vmem:[%s6665_s1 + $0x3f8] sm:$0xff] }
  0xc9   : > { %984 = vmatmul.mubr.f32.gmra.mrb[26].mxu1 %v311_v28  ;;  %3826 = vmatprep.subr.bf16.mxu0 %v4504_v0  ;;  %v403_v28 = vld [vmem:[%s4650_s26 + $0x620] sm:$0xff] }
  0xca   : > { %1754 = vmatmul.mubr.f32.gmra.mrb[26].mxu0 %v315_v29  ;;  %988 = vmatprep.mubr.f32.mxu1 %v320_v32  ;;  %v408_v29 = vld [vmem:[%s4650_s26 + $0x648] sm:$0xff]  ;;  %v411_v32 = vld [vmem:[%s4650_s26 + $0x660] sm:$0xff] }
  0xcb   : > { %1758 = vmatprep.mubr.f32.mxu0 %v324_v36  ;;  %3732 = vmatpush1.bf16.msra.mxu1 %v3731_v14  ;;  %v3734_v36 = vpack.c.bf16 %v780_v34, %v779_v33  ;;  %v484_v14 = vld [vmem:[%s4650_s26 + $0x8a8] sm:$0xff] }
  0xcc   : > { %3828 = vmatpush1.bf16.msra.mxu0 %v3827_v18  ;;  %3733 = vmatprep.subr.bf16.mxu1 %v4504_v0  ;;  %v492_v18 = vld [vmem:[%s4650_s26 + $0x8e8] sm:$0xff] }
  0xcd   : > { %989 = vmatmul.mubr.f32.gmra.mrb[28].mxu1 %v319_v38  ;;  %3829 = vmatprep.subr.bf16.mxu0 %v4504_v0  ;;  %v844_v38 = vld [vmem:[%s6665_s1 + $0x3e8] sm:$0xff] }
  0xce   : > { %1759 = vmatmul.mubr.f32.gmra.mrb[28].mxu0 %v323_v39  ;;  %993 = vmatprep.mubr.f32.mxu1 %v328_v40  ;;  %v420_v39 = vld [vmem:[%s4650_s26 + $0x6a8] sm:$0xff]  ;;  %v3830_v40 = vpack.c.bf16 %v844_v38, %v843_v37 }
  0xcf   : > { %1763 = vmatprep.mubr.f32.mxu0 %v332_v41  ;;  %v415_v41 = vld [vmem:[%s4650_s26 + $0x680] sm:$0xff]  ;;  %3735 = vmatpush1.bf16.msra.mxu1 %v3734_v36  ;;  %v520_v33 = vld [vmem:[%s4650_s26 + $0x9c8] sm:$0xff] }
  0xd0   : > { %3831 = vmatpush1.bf16.msra.mxu0 %v3830_v40  ;;  %3736 = vmatprep.subr.bf16.mxu1 %v4504_v0  ;;  %v524_v34 = vld [vmem:[%s4650_s26 + $0x9e8] sm:$0xff]  ;;  %v523_v36 = vld [vmem:[%s4650_s26 + $0x9e0] sm:$0xff] }
  0xd1   : > { %994 = vmatmul.mubr.f32.gmra.mrb[30].mxu1 %v327_v42  ;;  %v419_v42 = vld [vmem:[%s4650_s26 + $0x6a0] sm:$0xff]  ;;  %3832 = vmatprep.subr.bf16.mxu0 %v4504_v0  ;;  %v528_v37 = vld [vmem:[%s4650_s26 + $0xa08] sm:$0xff] }
  0xd2   : > { %1764 = vmatmul.mubr.f32.gmra.mrb[30].mxu0 %v331_v43  ;;  %998 = vmatprep.mubr.f32.mxu1 %v336_v44  ;;  %v424_v43 = vld [vmem:[%s4650_s26 + $0x6c8] sm:$0xff]  ;;  %v439_v0 = vld [vmem:[%s4650_s26 + $0x740] sm:$0xff] }
  0xd3   : > { %1768 = vmatprep.mubr.f32.mxu0 %v340_v45  ;;  %v428_v44 = vld [vmem:[%s4650_s26 + $0x6e8] sm:$0xff]  ;;  %v423_v45 = vld [vmem:[%s4650_s26 + $0x6c0] sm:$0xff] }
  0xd4   : > { %v532_v38 = vld [vmem:[%s4650_s26 + $0xa28] sm:$0xff]  ;;  %v531_v40 = vld [vmem:[%s4650_s26 + $0xa20] sm:$0xff] }
  0xd5   : > { %999 = vmatmul.mubr.f32.gmra.mrb[32].mxu1 %v335_v46  ;;  %v427_v46 = vld [vmem:[%s4650_s26 + $0x6e0] sm:$0xff] }
  0xd6   : > { %1769 = vmatmul.mubr.f32.gmra.mrb[32].mxu0 %v339_v47  ;;  %1003 = vmatprep.mubr.f32.mxu1 %v344_v48  ;;  %v432_v47 = vld [vmem:[%s4650_s26 + $0x708] sm:$0xff] }
  0xd7   : > { %1773 = vmatprep.mubr.f32.mxu0 %v348_v49  ;;  %v436_v48 = vld [vmem:[%s4650_s26 + $0x728] sm:$0xff]  ;;  %v431_v49 = vld [vmem:[%s4650_s26 + $0x700] sm:$0xff] }
  0xd9   : > { %1004 = vmatmul.mubr.f32.gmra.mrb[34].mxu1 %v343_v50  ;;  %v435_v50 = vld [vmem:[%s4650_s26 + $0x720] sm:$0xff] }
  0xda   : > { %1774 = vmatmul.mubr.f32.gmra.mrb[34].mxu0 %v347_v51  ;;  %1008 = vmatprep.mubr.f32.mxu1 %v352_v54  ;;  %v440_v51 = vld [vmem:[%s4650_s26 + $0x748] sm:$0xff]  ;;  %v781_v54 = vld [vmem:[%s6665_s1 + $0x1f0] sm:$0xff] }
  0xdb   : > { %1778 = vmatprep.mubr.f32.mxu0 %v356_v58  ;;  %v3737_v57 = vpack.c.bf16 %v782_v55, %v781_v54  ;;  %v845_v58 = vld [vmem:[%s6665_s1 + $0x3f0] sm:$0xff]  ;;  %v559_v54 = vld [vmem:[%s4650_s26 + $0xb00] sm:$0xff] }
  0xdc   : > { %v563_v55 = vld [vmem:[%s4650_s26 + $0xb20] sm:$0xff] }
  0xdd   : > { %1009 = vmatmul.mubr.f32.gmra.mrb[36].mxu1 %v351_v60  ;;  %v452_v60 = vld [vmem:[%s4650_s26 + $0x7a8] sm:$0xff] }
  0xde   : > { %1779 = vmatmul.mubr.f32.gmra.mrb[36].mxu0 %v355_v61  ;;  %1013 = vmatprep.mubr.f32.mxu1 %v360_v62  ;;  %v3833_v61 = vpack.c.bf16 %v846_v59, %v845_v58  ;;  %v447_v62 = vld [vmem:[%s4650_s26 + $0x780] sm:$0xff] }
  0xdf   : > { %1783 = vmatprep.mubr.f32.mxu0 %v364_v63  ;;  %v451_v63 = vld [vmem:[%s4650_s26 + $0x7a0] sm:$0xff]  ;;  %3738 = vmatpush1.bf16.msra.mxu1 %v3737_v57  ;;  %v572_v57 = vld [vmem:[%s4650_s26 + $0xb68] sm:$0xff] }
  0xe0   : > { %3834 = vmatpush1.bf16.msra.mxu0 %v3833_v61  ;;  %v567_v58 = vld [vmem:[%s4650_s26 + $0xb40] sm:$0xff]  ;;  %v580_v61 = vld [vmem:[%s4650_s26 + $0xba8] sm:$0xff] }
  0xe1   : > { %1014 = vmatmul.mubr.f32.gmra.mrb[38].mxu1 %v359_v1  ;;  %v456_v1 = vld [vmem:[%s4650_s26 + $0x7c8] sm:$0xff]  ;;  %v571_v59 = vld [vmem:[%s4650_s26 + $0xb60] sm:$0xff] }
  0xe2   : > { %1784 = vmatmul.mubr.f32.gmra.mrb[38].mxu0 %v363_v2  ;;  %1018 = vmatprep.mubr.f32.mxu1 %v368_v3  ;;  %v460_v2 = vld [vmem:[%s4650_s26 + $0x7e8] sm:$0xff]  ;;  %v455_v3 = vld [vmem:[%s4650_s26 + $0x7c0] sm:$0xff] }
  0xe3   : > { %1788 = vmatprep.mubr.f32.mxu0 %v372_v4  ;;  %v459_v4 = vld [vmem:[%s4650_s26 + $0x7e0] sm:$0xff] }
  0xe5   : > { %1019 = vmatmul.mubr.f32.gmra.mrb[40].mxu1 %v367_v5  ;;  %v464_v5 = vld [vmem:[%s4650_s26 + $0x808] sm:$0xff] }
  0xe6   : > { %1789 = vmatmul.mubr.f32.gmra.mrb[40].mxu0 %v371_v6  ;;  %1023 = vmatprep.mubr.f32.mxu1 %v376_v7  ;;  %v468_v6 = vld [vmem:[%s4650_s26 + $0x828] sm:$0xff]  ;;  %v463_v7 = vld [vmem:[%s4650_s26 + $0x800] sm:$0xff] }
  0xe7   : > { %1793 = vmatprep.mubr.f32.mxu0 %v380_v8  ;;  %v467_v8 = vld [vmem:[%s4650_s26 + $0x820] sm:$0xff] }
  0xe9   : > { %1024 = vmatmul.mubr.f32.gmra.mrb[42].mxu1 %v375_v9  ;;  %v472_v9 = vld [vmem:[%s4650_s26 + $0x848] sm:$0xff] }
  0xea   : > { %1794 = vmatmul.mubr.f32.gmra.mrb[42].mxu0 %v379_v10  ;;  %1028 = vmatprep.mubr.f32.mxu1 %v384_v13  ;;  %v476_v10 = vld [vmem:[%s4650_s26 + $0x868] sm:$0xff] }
  0xeb   : > { %1798 = vmatprep.mubr.f32.mxu0 %v388_v17  ;;  %v480_v13 = vld [vmem:[%s4650_s26 + $0x888] sm:$0xff] }
  0xec   : > { %v488_v17 = vld [vmem:[%s4650_s26 + $0x8c8] sm:$0xff] }
  0xed   : > { %1029 = vmatmul.mubr.f32.gmra.mrb[44].mxu1 %v383_v19  ;;  %v487_v19 = vld [vmem:[%s4650_s26 + $0x8c0] sm:$0xff] }
  0xee   : > { %1799 = vmatmul.mubr.f32.gmra.mrb[44].mxu0 %v387_v20  ;;  %1033 = vmatprep.mubr.f32.mxu1 %v392_v21  ;;  %v491_v20 = vld [vmem:[%s4650_s26 + $0x8e0] sm:$0xff]  ;;  %v496_v21 = vld [vmem:[%s4650_s26 + $0x908] sm:$0xff] }
  0xef   : > { %1803 = vmatprep.mubr.f32.mxu0 %v396_v22  ;;  %v500_v22 = vld [vmem:[%s4650_s26 + $0x928] sm:$0xff] }
  0xf1   : > { %1034 = vmatmul.mubr.f32.gmra.mrb[46].mxu1 %v391_v23  ;;  %v495_v23 = vld [vmem:[%s4650_s26 + $0x900] sm:$0xff] }
  0xf2   : > { %1804 = vmatmul.mubr.f32.gmra.mrb[46].mxu0 %v395_v24  ;;  %1038 = vmatprep.mubr.f32.mxu1 %v400_v25  ;;  %v499_v24 = vld [vmem:[%s4650_s26 + $0x920] sm:$0xff]  ;;  %v504_v25 = vld [vmem:[%s4650_s26 + $0x948] sm:$0xff] }
  0xf3   : > { %1808 = vmatprep.mubr.f32.mxu0 %v404_v26  ;;  %v508_v26 = vld [vmem:[%s4650_s26 + $0x968] sm:$0xff] }
  0xf5   : > { %1039 = vmatmul.mubr.f32.gmra.mrb[48].mxu1 %v399_v27  ;;  %v503_v27 = vld [vmem:[%s4650_s26 + $0x940] sm:$0xff] }
  0xf6   : > { %1809 = vmatmul.mubr.f32.gmra.mrb[48].mxu0 %v403_v28  ;;  %1043 = vmatprep.mubr.f32.mxu1 %v408_v29  ;;  %v507_v28 = vld [vmem:[%s4650_s26 + $0x960] sm:$0xff]  ;;  %v512_v29 = vld [vmem:[%s4650_s26 + $0x988] sm:$0xff] }
  0xf7   : > { %1813 = vmatprep.mubr.f32.mxu0 %v412_v30  ;;  %v516_v30 = vld [vmem:[%s4650_s26 + $0x9a8] sm:$0xff] }
  0xf9   : > { %1044 = vmatmul.mubr.f32.gmra.mrb[50].mxu1 %v407_v31  ;;  %v511_v31 = vld [vmem:[%s4650_s26 + $0x980] sm:$0xff] }
  0xfa   : > { %1814 = vmatmul.mubr.f32.gmra.mrb[50].mxu0 %v411_v32  ;;  %1048 = vmatprep.mubr.f32.mxu1 %v416_v35  ;;  %v515_v32 = vld [vmem:[%s4650_s26 + $0x9a0] sm:$0xff] }
  0xfb   : > { %1818 = vmatprep.mubr.f32.mxu0 %v420_v39  ;;  %v519_v35 = vld [vmem:[%s4650_s26 + $0x9c0] sm:$0xff] }
  0xfc   : > { %v527_v39 = vld [vmem:[%s4650_s26 + $0xa00] sm:$0xff] }
  0xfd   : > { %1049 = vmatmul.mubr.f32.gmra.mrb[52].mxu1 %v415_v41  ;;  %v536_v41 = vld [vmem:[%s4650_s26 + $0xa48] sm:$0xff] }
  0xfe   : > { %1819 = vmatmul.mubr.f32.gmra.mrb[52].mxu0 %v419_v42  ;;  %1053 = vmatprep.mubr.f32.mxu1 %v424_v43  ;;  %v540_v42 = vld [vmem:[%s4650_s26 + $0xa68] sm:$0xff]  ;;  %v535_v43 = vld [vmem:[%s4650_s26 + $0xa40] sm:$0xff] }
  0xff   : > { %1823 = vmatprep.mubr.f32.mxu0 %v428_v44  ;;  %v539_v44 = vld [vmem:[%s4650_s26 + $0xa60] sm:$0xff] }
 0x101   : > { %1054 = vmatmul.mubr.f32.gmra.mrb[54].mxu1 %v423_v45  ;;  %v544_v45 = vld [vmem:[%s4650_s26 + $0xa88] sm:$0xff] }
 0x102   : > { %1824 = vmatmul.mubr.f32.gmra.mrb[54].mxu0 %v427_v46  ;;  %1058 = vmatprep.mubr.f32.mxu1 %v432_v47  ;;  %v548_v46 = vld [vmem:[%s4650_s26 + $0xaa8] sm:$0xff]  ;;  %v543_v47 = vld [vmem:[%s4650_s26 + $0xa80] sm:$0xff] }
 0x103   : > { %1828 = vmatprep.mubr.f32.mxu0 %v436_v48  ;;  %v547_v48 = vld [vmem:[%s4650_s26 + $0xaa0] sm:$0xff] }
 0x105   : > { %1059 = vmatmul.mubr.f32.gmra.mrb[56].mxu1 %v431_v49  ;;  %v552_v49 = vld [vmem:[%s4650_s26 + $0xac8] sm:$0xff] }
 0x106   : > { %1829 = vmatmul.mubr.f32.gmra.mrb[56].mxu0 %v435_v50  ;;  %1063 = vmatprep.mubr.f32.mxu1 %v440_v51  ;;  %v556_v50 = vld [vmem:[%s4650_s26 + $0xae8] sm:$0xff]  ;;  %v551_v51 = vld [vmem:[%s4650_s26 + $0xac0] sm:$0xff] }
 0x107   : > { %1833 = vmatprep.mubr.f32.mxu0 %v444_v52  ;;  %v555_v52 = vld [vmem:[%s4650_s26 + $0xae0] sm:$0xff] }
 0x109   : > { %1064 = vmatmul.mubr.f32.gmra.mrb[58].mxu1 %v439_v0  ;;  %v560_v0 = vld [vmem:[%s4650_s26 + $0xb08] sm:$0xff] }
 0x10a   : > { %1834 = vmatmul.mubr.f32.gmra.mrb[58].mxu0 %v443_v53  ;;  %1068 = vmatprep.mubr.f32.mxu1 %v448_v56  ;;  %v564_v53 = vld [vmem:[%s4650_s26 + $0xb28] sm:$0xff] }
 0x10b   : > { %1838 = vmatprep.mubr.f32.mxu0 %v452_v60  ;;  %v568_v56 = vld [vmem:[%s4650_s26 + $0xb48] sm:$0xff] }
 0x10c   : > { %v576_v60 = vld [vmem:[%s4650_s26 + $0xb88] sm:$0xff] }
 0x10d   : > { %1069 = vmatmul.mubr.f32.gmra.mrb[60].mxu1 %v447_v62  ;;  %v575_v62 = vld [vmem:[%s4650_s26 + $0xb80] sm:$0xff] }
 0x10e   : > { %1839 = vmatmul.mubr.f32.gmra.mrb[60].mxu0 %v451_v63  ;;  %1073 = vmatprep.mubr.f32.mxu1 %v456_v1  ;;  %v579_v63 = vld [vmem:[%s4650_s26 + $0xba0] sm:$0xff]  ;;  %v584_v1 = vld [vmem:[%s4650_s26 + $0xbc8] sm:$0xff] }
 0x10f   : > { %1843 = vmatprep.mubr.f32.mxu0 %v460_v2  ;;  %v588_v2 = vld [vmem:[%s4650_s26 + $0xbe8] sm:$0xff] }
 0x111   : > { %1074 = vmatmul.mubr.f32.gmra.mrb[62].mxu1 %v455_v3  ;;  %v583_v3 = vld [vmem:[%s4650_s26 + $0xbc0] sm:$0xff] }
 0x112   : > { %1844 = vmatmul.mubr.f32.gmra.mrb[62].mxu0 %v459_v4  ;;  %1078 = vmatprep.mubr.f32.mxu1 %v464_v5  ;;  %v587_v4 = vld [vmem:[%s4650_s26 + $0xbe0] sm:$0xff]  ;;  %v592_v5 = vld [vmem:[%s4650_s26 + $0xc08] sm:$0xff] }
 0x113   : > { %1848 = vmatprep.mubr.f32.mxu0 %v468_v6  ;;  %v596_v6 = vld [vmem:[%s4650_s26 + $0xc28] sm:$0xff] }
 0x115   : > { %1079 = vmatmul.mubr.f32.gmra.mrb[64].mxu1 %v463_v7  ;;  %v591_v7 = vld [vmem:[%s4650_s26 + $0xc00] sm:$0xff] }
 0x116   : > { %1849 = vmatmul.mubr.f32.gmra.mrb[64].mxu0 %v467_v8  ;;  %1083 = vmatprep.mubr.f32.mxu1 %v472_v9  ;;  %v595_v8 = vld [vmem:[%s4650_s26 + $0xc20] sm:$0xff]  ;;  %v600_v9 = vld [vmem:[%s4650_s26 + $0xc48] sm:$0xff] }
 0x117   : > { %1853 = vmatprep.mubr.f32.mxu0 %v476_v10  ;;  %v604_v10 = vld [vmem:[%s4650_s26 + $0xc68] sm:$0xff] }
 0x119   : > { %1084 = vmatmul.mubr.f32.gmra.mrb[66].mxu1 %v471_v11  ;;  %v599_v11 = vld [vmem:[%s4650_s26 + $0xc40] sm:$0xff] }
 0x11a   : > { %1854 = vmatmul.mubr.f32.gmra.mrb[66].mxu0 %v475_v12  ;;  %1088 = vmatprep.mubr.f32.mxu1 %v480_v13  ;;  %v603_v12 = vld [vmem:[%s4650_s26 + $0xc60] sm:$0xff]  ;;  %v608_v13 = vld [vmem:[%s4650_s26 + $0xc88] sm:$0xff] }
 0x11b   : > { %1858 = vmatprep.mubr.f32.mxu0 %v484_v14  ;;  %v612_v14 = vld [vmem:[%s4650_s26 + $0xca8] sm:$0xff] }
 0x11d   : > { %1089 = vmatmul.mubr.f32.gmra.mrb[68].mxu1 %v479_v15  ;;  %v607_v15 = vld [vmem:[%s4650_s26 + $0xc80] sm:$0xff] }
 0x11e   : > { %1859 = vmatmul.mubr.f32.gmra.mrb[68].mxu0 %v483_v16  ;;  %1093 = vmatprep.mubr.f32.mxu1 %v488_v17  ;;  %v611_v16 = vld [vmem:[%s4650_s26 + $0xca0] sm:$0xff]  ;;  %v616_v17 = vld [vmem:[%s4650_s26 + $0xcc8] sm:$0xff] }
 0x11f   : > { %1863 = vmatprep.mubr.f32.mxu0 %v492_v18  ;;  %v620_v18 = vld [vmem:[%s4650_s26 + $0xce8] sm:$0xff] }
 0x121   : > { %1094 = vmatmul.mubr.f32.gmra.mrb[70].mxu1 %v487_v19  ;;  %v615_v19 = vld [vmem:[%s4650_s26 + $0xcc0] sm:$0xff] }
 0x122   : > { %1864 = vmatmul.mubr.f32.gmra.mrb[70].mxu0 %v491_v20  ;;  %1098 = vmatprep.mubr.f32.mxu1 %v496_v21  ;;  %v619_v20 = vld [vmem:[%s4650_s26 + $0xce0] sm:$0xff]  ;;  %v624_v21 = vld [vmem:[%s4650_s26 + $0xd08] sm:$0xff] }
 0x123   : > { %1868 = vmatprep.mubr.f32.mxu0 %v500_v22  ;;  %v628_v22 = vld [vmem:[%s4650_s26 + $0xd28] sm:$0xff] }
 0x125   : > { %1099 = vmatmul.mubr.f32.gmra.mrb[72].mxu1 %v495_v23  ;;  %v623_v23 = vld [vmem:[%s4650_s26 + $0xd00] sm:$0xff] }
 0x126   : > { %1869 = vmatmul.mubr.f32.gmra.mrb[72].mxu0 %v499_v24  ;;  %1103 = vmatprep.mubr.f32.mxu1 %v504_v25  ;;  %v627_v24 = vld [vmem:[%s4650_s26 + $0xd20] sm:$0xff]  ;;  %v632_v25 = vld [vmem:[%s4650_s26 + $0xd48] sm:$0xff] }
 0x127   : > { %1873 = vmatprep.mubr.f32.mxu0 %v508_v26  ;;  %v636_v26 = vld [vmem:[%s4650_s26 + $0xd68] sm:$0xff] }
 0x129   : > { %1104 = vmatmul.mubr.f32.gmra.mrb[74].mxu1 %v503_v27  ;;  %v631_v27 = vld [vmem:[%s4650_s26 + $0xd40] sm:$0xff] }
 0x12a   : > { %1874 = vmatmul.mubr.f32.gmra.mrb[74].mxu0 %v507_v28  ;;  %1108 = vmatprep.mubr.f32.mxu1 %v512_v29  ;;  %v635_v28 = vld [vmem:[%s4650_s26 + $0xd60] sm:$0xff]  ;;  %v640_v29 = vld [vmem:[%s4650_s26 + $0xd88] sm:$0xff] }
 0x12b   : > { %1878 = vmatprep.mubr.f32.mxu0 %v516_v30  ;;  %v644_v30 = vld [vmem:[%s4650_s26 + $0xda8] sm:$0xff] }
 0x12d   : > { %1109 = vmatmul.mubr.f32.gmra.mrb[76].mxu1 %v511_v31  ;;  %v639_v31 = vld [vmem:[%s4650_s26 + $0xd80] sm:$0xff] }
 0x12e   : > { %1879 = vmatmul.mubr.f32.gmra.mrb[76].mxu0 %v515_v32  ;;  %1113 = vmatprep.mubr.f32.mxu1 %v520_v33  ;;  %v643_v32 = vld [vmem:[%s4650_s26 + $0xda0] sm:$0xff]  ;;  %v648_v33 = vld [vmem:[%s4650_s26 + $0xdc8] sm:$0xff] }
 0x12f   : > { %1883 = vmatprep.mubr.f32.mxu0 %v524_v34  ;;  %v652_v34 = vld [vmem:[%s4650_s26 + $0xde8] sm:$0xff] }
 0x131   : > { %1114 = vmatmul.mubr.f32.gmra.mrb[78].mxu1 %v519_v35  ;;  %v647_v35 = vld [vmem:[%s4650_s26 + $0xdc0] sm:$0xff] }
 0x132   : > { %1884 = vmatmul.mubr.f32.gmra.mrb[78].mxu0 %v523_v36  ;;  %1118 = vmatprep.mubr.f32.mxu1 %v528_v37  ;;  %v651_v36 = vld [vmem:[%s4650_s26 + $0xde0] sm:$0xff]  ;;  %v656_v37 = vld [vmem:[%s4650_s26 + $0xe08] sm:$0xff] }
 0x133   : > { %1888 = vmatprep.mubr.f32.mxu0 %v532_v38  ;;  %v660_v38 = vld [vmem:[%s4650_s26 + $0xe28] sm:$0xff] }
 0x135   : > { %1119 = vmatmul.mubr.f32.gmra.mrb[80].mxu1 %v527_v39  ;;  %v655_v39 = vld [vmem:[%s4650_s26 + $0xe00] sm:$0xff] }
 0x136   : > { %1889 = vmatmul.mubr.f32.gmra.mrb[80].mxu0 %v531_v40  ;;  %1123 = vmatprep.mubr.f32.mxu1 %v536_v41  ;;  %v659_v40 = vld [vmem:[%s4650_s26 + $0xe20] sm:$0xff]  ;;  %v664_v41 = vld [vmem:[%s4650_s26 + $0xe48] sm:$0xff] }
 0x137   : > { %1893 = vmatprep.mubr.f32.mxu0 %v540_v42  ;;  %v668_v42 = vld [vmem:[%s4650_s26 + $0xe68] sm:$0xff] }
 0x139   : > { %1124 = vmatmul.mubr.f32.gmra.mrb[82].mxu1 %v535_v43  ;;  %v663_v43 = vld [vmem:[%s4650_s26 + $0xe40] sm:$0xff] }
 0x13a   : > { %1894 = vmatmul.mubr.f32.gmra.mrb[82].mxu0 %v539_v44  ;;  %1128 = vmatprep.mubr.f32.mxu1 %v544_v45  ;;  %v667_v44 = vld [vmem:[%s4650_s26 + $0xe60] sm:$0xff]  ;;  %v672_v45 = vld [vmem:[%s4650_s26 + $0xe88] sm:$0xff] }
 0x13b   : > { %1898 = vmatprep.mubr.f32.mxu0 %v548_v46  ;;  %v676_v46 = vld [vmem:[%s4650_s26 + $0xea8] sm:$0xff] }
 0x13d   : > { %1129 = vmatmul.mubr.f32.gmra.mrb[84].mxu1 %v543_v47  ;;  %v671_v47 = vld [vmem:[%s4650_s26 + $0xe80] sm:$0xff] }
 0x13e   : > { %1899 = vmatmul.mubr.f32.gmra.mrb[84].mxu0 %v547_v48  ;;  %1133 = vmatprep.mubr.f32.mxu1 %v552_v49  ;;  %v675_v48 = vld [vmem:[%s4650_s26 + $0xea0] sm:$0xff]  ;;  %v680_v49 = vld [vmem:[%s4650_s26 + $0xec8] sm:$0xff] }
 0x13f   : > { %1903 = vmatprep.mubr.f32.mxu0 %v556_v50  ;;  %v684_v50 = vld [vmem:[%s4650_s26 + $0xee8] sm:$0xff] }
 0x141   : > { %1134 = vmatmul.mubr.f32.gmra.mrb[86].mxu1 %v551_v51  ;;  %v679_v51 = vld [vmem:[%s4650_s26 + $0xec0] sm:$0xff] }
 0x142   : > { %1904 = vmatmul.mubr.f32.gmra.mrb[86].mxu0 %v555_v52  ;;  %1138 = vmatprep.mubr.f32.mxu1 %v560_v0  ;;  %v683_v52 = vld [vmem:[%s4650_s26 + $0xee0] sm:$0xff]  ;;  %v688_v0 = vld [vmem:[%s4650_s26 + $0xf08] sm:$0xff] }
 0x143   : > { %1908 = vmatprep.mubr.f32.mxu0 %v564_v53  ;;  %v692_v53 = vld [vmem:[%s4650_s26 + $0xf28] sm:$0xff] }
 0x145   : > { %1139 = vmatmul.mubr.f32.gmra.mrb[88].mxu1 %v559_v54  ;;  %v687_v54 = vld [vmem:[%s4650_s26 + $0xf00] sm:$0xff] }
 0x146   : > { %1909 = vmatmul.mubr.f32.gmra.mrb[88].mxu0 %v563_v55  ;;  %1143 = vmatprep.mubr.f32.mxu1 %v568_v56  ;;  %v691_v55 = vld [vmem:[%s4650_s26 + $0xf20] sm:$0xff]  ;;  %v696_v56 = vld [vmem:[%s4650_s26 + $0xf48] sm:$0xff] }
 0x147   : > { %1913 = vmatprep.mubr.f32.mxu0 %v572_v57  ;;  %v700_v57 = vld [vmem:[%s4650_s26 + $0xf68] sm:$0xff] }
 0x149   : > { %1144 = vmatmul.mubr.f32.gmra.mrb[90].mxu1 %v567_v58  ;;  %v695_v58 = vld [vmem:[%s4650_s26 + $0xf40] sm:$0xff] }
 0x14a   : > { %1914 = vmatmul.mubr.f32.gmra.mrb[90].mxu0 %v571_v59  ;;  %1148 = vmatprep.mubr.f32.mxu1 %v576_v60  ;;  %v699_v59 = vld [vmem:[%s4650_s26 + $0xf60] sm:$0xff]  ;;  %v704_v60 = vld [vmem:[%s4650_s26 + $0xf88] sm:$0xff] }
 0x14b   : > { %1918 = vmatprep.mubr.f32.mxu0 %v580_v61  ;;  %v708_v61 = vld [vmem:[%s4650_s26 + $0xfa8] sm:$0xff] }
 0x14d   : > { %1149 = vmatmul.mubr.f32.gmra.mrb[92].mxu1 %v575_v62  ;;  %v703_v62 = vld [vmem:[%s4650_s26 + $0xf80] sm:$0xff] }
 0x14e   : > { %1919 = vmatmul.mubr.f32.gmra.mrb[92].mxu0 %v579_v63  ;;  %1153 = vmatprep.mubr.f32.mxu1 %v584_v1  ;;  %v707_v63 = vld [vmem:[%s4650_s26 + $0xfa0] sm:$0xff]  ;;  %v712_v1 = vld [vmem:[%s4650_s26 + $0xfc8] sm:$0xff] }
 0x14f   : > { %1923 = vmatprep.mubr.f32.mxu0 %v588_v2  ;;  %v716_v2 = vld [vmem:[%s4650_s26 + $0xfe8] sm:$0xff] }
 0x151   : > { %1154 = vmatmul.mubr.f32.gmra.mrb[94].mxu1 %v583_v3  ;;  %v711_v3 = vld [vmem:[%s4650_s26 + $0xfc0] sm:$0xff] }
 0x152   : > { %1924 = vmatmul.mubr.f32.gmra.mrb[94].mxu0 %v587_v4  ;;  %1158 = vmatprep.mubr.f32.mxu1 %v592_v5  ;;  %v715_v4 = vld [vmem:[%s4650_s26 + $0xfe0] sm:$0xff]  ;;  %v210_v5 = vld [vmem:[%s4650_s26 + $0x18] sm:$0xff] }
 0x153   : > { %1928 = vmatprep.mubr.f32.mxu0 %v596_v6  ;;  %v214_v6 = vld [vmem:[%s4650_s26 + $0x38] sm:$0xff] }
 0x155   : > { %1159 = vmatmul.mubr.f32.gmra.mrb[96].mxu1 %v591_v7  ;;  %v209_v7 = vld [vmem:[%s4650_s26 + $0x10] sm:$0xff] }
 0x156   : > { %1929 = vmatmul.mubr.f32.gmra.mrb[96].mxu0 %v595_v8  ;;  %1163 = vmatprep.mubr.f32.mxu1 %v600_v9  ;;  %v213_v8 = vld [vmem:[%s4650_s26 + $0x30] sm:$0xff]  ;;  %v218_v9 = vld [vmem:[%s4650_s26 + $0x58] sm:$0xff] }
 0x157   : > { %1933 = vmatprep.mubr.f32.mxu0 %v604_v10  ;;  %v222_v10 = vld [vmem:[%s4650_s26 + $0x78] sm:$0xff] }
 0x159   : > { %1164 = vmatmul.mubr.f32.gmra.mrb[98].mxu1 %v599_v11  ;;  %v217_v11 = vld [vmem:[%s4650_s26 + $0x50] sm:$0xff] }
 0x15a   : > { %1934 = vmatmul.mubr.f32.gmra.mrb[98].mxu0 %v603_v12  ;;  %1168 = vmatprep.mubr.f32.mxu1 %v608_v13  ;;  %v221_v12 = vld [vmem:[%s4650_s26 + $0x70] sm:$0xff]  ;;  %v226_v13 = vld [vmem:[%s4650_s26 + $0x98] sm:$0xff] }
 0x15b   : > { %1938 = vmatprep.mubr.f32.mxu0 %v612_v14  ;;  %v230_v14 = vld [vmem:[%s4650_s26 + $0xb8] sm:$0xff] }
 0x15d   : > { %1169 = vmatmul.mubr.f32.gmra.mrb[100].mxu1 %v607_v15  ;;  %v225_v15 = vld [vmem:[%s4650_s26 + $0x90] sm:$0xff] }
 0x15e   : > { %1939 = vmatmul.mubr.f32.gmra.mrb[100].mxu0 %v611_v16  ;;  %1173 = vmatprep.mubr.f32.mxu1 %v616_v17  ;;  %v229_v16 = vld [vmem:[%s4650_s26 + $0xb0] sm:$0xff]  ;;  %v234_v17 = vld [vmem:[%s4650_s26 + $0xd8] sm:$0xff] }
 0x15f   : > { %1943 = vmatprep.mubr.f32.mxu0 %v620_v18  ;;  %v238_v18 = vld [vmem:[%s4650_s26 + $0xf8] sm:$0xff] }
 0x161   : > { %1174 = vmatmul.mubr.f32.gmra.mrb[102].mxu1 %v615_v19  ;;  %v233_v19 = vld [vmem:[%s4650_s26 + $0xd0] sm:$0xff] }
 0x162   : > { %1944 = vmatmul.mubr.f32.gmra.mrb[102].mxu0 %v619_v20  ;;  %1178 = vmatprep.mubr.f32.mxu1 %v624_v21  ;;  %v237_v20 = vld [vmem:[%s4650_s26 + $0xf0] sm:$0xff]  ;;  %v242_v21 = vld [vmem:[%s4650_s26 + $0x118] sm:$0xff] }
 0x163   : > { %1948 = vmatprep.mubr.f32.mxu0 %v628_v22  ;;  %v246_v22 = vld [vmem:[%s4650_s26 + $0x138] sm:$0xff] }
 0x165   : > { %1179 = vmatmul.mubr.f32.gmra.mrb[104].mxu1 %v623_v23  ;;  %v241_v23 = vld [vmem:[%s4650_s26 + $0x110] sm:$0xff] }
 0x166   : > { %1949 = vmatmul.mubr.f32.gmra.mrb[104].mxu0 %v627_v24  ;;  %1183 = vmatprep.mubr.f32.mxu1 %v632_v25  ;;  %v245_v24 = vld [vmem:[%s4650_s26 + $0x130] sm:$0xff]  ;;  %v250_v25 = vld [vmem:[%s4650_s26 + $0x158] sm:$0xff] }
 0x167   : > { %1953 = vmatprep.mubr.f32.mxu0 %v636_v26  ;;  %v254_v26 = vld [vmem:[%s4650_s26 + $0x178] sm:$0xff] }
 0x169   : > { %1184 = vmatmul.mubr.f32.gmra.mrb[106].mxu1 %v631_v27  ;;  %v249_v27 = vld [vmem:[%s4650_s26 + $0x150] sm:$0xff] }
 0x16a   : > { %1954 = vmatmul.mubr.f32.gmra.mrb[106].mxu0 %v635_v28  ;;  %1188 = vmatprep.mubr.f32.mxu1 %v640_v29  ;;  %v253_v28 = vld [vmem:[%s4650_s26 + $0x170] sm:$0xff]  ;;  %v258_v29 = vld [vmem:[%s4650_s26 + $0x198] sm:$0xff] }
 0x16b   : > { %1958 = vmatprep.mubr.f32.mxu0 %v644_v30  ;;  %v262_v30 = vld [vmem:[%s4650_s26 + $0x1b8] sm:$0xff] }
 0x16d   : > { %1189 = vmatmul.mubr.f32.gmra.mrb[108].mxu1 %v639_v31  ;;  %v257_v31 = vld [vmem:[%s4650_s26 + $0x190] sm:$0xff] }
 0x16e   : > { %1959 = vmatmul.mubr.f32.gmra.mrb[108].mxu0 %v643_v32  ;;  %1193 = vmatprep.mubr.f32.mxu1 %v648_v33  ;;  %v261_v32 = vld [vmem:[%s4650_s26 + $0x1b0] sm:$0xff]  ;;  %v266_v33 = vld [vmem:[%s4650_s26 + $0x1d8] sm:$0xff] }
 0x16f   : > { %1963 = vmatprep.mubr.f32.mxu0 %v652_v34  ;;  %v270_v34 = vld [vmem:[%s4650_s26 + $0x1f8] sm:$0xff] }
 0x171   : > { %1194 = vmatmul.mubr.f32.gmra.mrb[110].mxu1 %v647_v35  ;;  %v265_v35 = vld [vmem:[%s4650_s26 + $0x1d0] sm:$0xff] }
 0x172   : > { %1964 = vmatmul.mubr.f32.gmra.mrb[110].mxu0 %v651_v36  ;;  %1198 = vmatprep.mubr.f32.mxu1 %v656_v37  ;;  %v269_v36 = vld [vmem:[%s4650_s26 + $0x1f0] sm:$0xff]  ;;  %v274_v37 = vld [vmem:[%s4650_s26 + $0x218] sm:$0xff] }
 0x173   : > { %1968 = vmatprep.mubr.f32.mxu0 %v660_v38  ;;  %v278_v38 = vld [vmem:[%s4650_s26 + $0x238] sm:$0xff] }
 0x175   : > { %1199 = vmatmul.mubr.f32.gmra.mrb[112].mxu1 %v655_v39  ;;  %v273_v39 = vld [vmem:[%s4650_s26 + $0x210] sm:$0xff] }
 0x176   : > { %1969 = vmatmul.mubr.f32.gmra.mrb[112].mxu0 %v659_v40  ;;  %1203 = vmatprep.mubr.f32.mxu1 %v664_v41  ;;  %v277_v40 = vld [vmem:[%s4650_s26 + $0x230] sm:$0xff]  ;;  %v282_v41 = vld [vmem:[%s4650_s26 + $0x258] sm:$0xff] }
 0x177   : > { %1973 = vmatprep.mubr.f32.mxu0 %v668_v42  ;;  %v286_v42 = vld [vmem:[%s4650_s26 + $0x278] sm:$0xff] }
 0x179   : > { %1204 = vmatmul.mubr.f32.gmra.mrb[114].mxu1 %v663_v43  ;;  %v281_v43 = vld [vmem:[%s4650_s26 + $0x250] sm:$0xff] }
 0x17a   : > { %1974 = vmatmul.mubr.f32.gmra.mrb[114].mxu0 %v667_v44  ;;  %1208 = vmatprep.mubr.f32.mxu1 %v672_v45  ;;  %v285_v44 = vld [vmem:[%s4650_s26 + $0x270] sm:$0xff]  ;;  %v290_v45 = vld [vmem:[%s4650_s26 + $0x298] sm:$0xff] }
 0x17b   : > { %1978 = vmatprep.mubr.f32.mxu0 %v676_v46  ;;  %v294_v46 = vld [vmem:[%s4650_s26 + $0x2b8] sm:$0xff] }
 0x17d   : > { %1209 = vmatmul.mubr.f32.gmra.mrb[116].mxu1 %v671_v47  ;;  %v289_v47 = vld [vmem:[%s4650_s26 + $0x290] sm:$0xff] }
 0x17e   : > { %1979 = vmatmul.mubr.f32.gmra.mrb[116].mxu0 %v675_v48  ;;  %1213 = vmatprep.mubr.f32.mxu1 %v680_v49  ;;  %v293_v48 = vld [vmem:[%s4650_s26 + $0x2b0] sm:$0xff]  ;;  %v298_v49 = vld [vmem:[%s4650_s26 + $0x2d8] sm:$0xff] }
 0x17f   : > { %1983 = vmatprep.mubr.f32.mxu0 %v684_v50  ;;  %v302_v50 = vld [vmem:[%s4650_s26 + $0x2f8] sm:$0xff] }
 0x181   : > { %1214 = vmatmul.mubr.f32.gmra.mrb[118].mxu1 %v679_v51  ;;  %v297_v51 = vld [vmem:[%s4650_s26 + $0x2d0] sm:$0xff] }
 0x182   : > { %1984 = vmatmul.mubr.f32.gmra.mrb[118].mxu0 %v683_v52  ;;  %1218 = vmatprep.mubr.f32.mxu1 %v688_v0  ;;  %v301_v52 = vld [vmem:[%s4650_s26 + $0x2f0] sm:$0xff]  ;;  %v306_v0 = vld [vmem:[%s4650_s26 + $0x318] sm:$0xff] }
 0x183   : > { %1988 = vmatprep.mubr.f32.mxu0 %v692_v53  ;;  %v310_v53 = vld [vmem:[%s4650_s26 + $0x338] sm:$0xff] }
 0x185   : > { %1219 = vmatmul.mubr.f32.gmra.mrb[120].mxu1 %v687_v54  ;;  %v305_v54 = vld [vmem:[%s4650_s26 + $0x310] sm:$0xff] }
 0x186   : > { %1989 = vmatmul.mubr.f32.gmra.mrb[120].mxu0 %v691_v55  ;;  %1223 = vmatprep.mubr.f32.mxu1 %v696_v56  ;;  %v309_v55 = vld [vmem:[%s4650_s26 + $0x330] sm:$0xff]  ;;  %v314_v56 = vld [vmem:[%s4650_s26 + $0x358] sm:$0xff] }
 0x187   : > { %1993 = vmatprep.mubr.f32.mxu0 %v700_v57  ;;  %v318_v57 = vld [vmem:[%s4650_s26 + $0x378] sm:$0xff] }
 0x189   : > { %1224 = vmatmul.mubr.f32.gmra.mrb[122].mxu1 %v695_v58  ;;  %v313_v58 = vld [vmem:[%s4650_s26 + $0x350] sm:$0xff] }
 0x18a   : > { %1994 = vmatmul.mubr.f32.gmra.mrb[122].mxu0 %v699_v59  ;;  %1228 = vmatprep.mubr.f32.mxu1 %v704_v60  ;;  %v317_v59 = vld [vmem:[%s4650_s26 + $0x370] sm:$0xff]  ;;  %v322_v60 = vld [vmem:[%s4650_s26 + $0x398] sm:$0xff] }
 0x18b   : > { %1998 = vmatprep.mubr.f32.mxu0 %v708_v61  ;;  %v326_v61 = vld [vmem:[%s4650_s26 + $0x3b8] sm:$0xff] }
 0x18d   : > { %1229 = vmatmul.mubr.f32.gmra.mrb[124].mxu1 %v703_v62  ;;  %v321_v62 = vld [vmem:[%s4650_s26 + $0x390] sm:$0xff] }
 0x18e   : > { %1999 = vmatmul.mubr.f32.gmra.mrb[124].mxu0 %v707_v63  ;;  %1233 = vmatprep.mubr.f32.mxu1 %v712_v1  ;;  %v325_v63 = vld [vmem:[%s4650_s26 + $0x3b0] sm:$0xff]  ;;  %v330_v1 = vld [vmem:[%s4650_s26 + $0x3d8] sm:$0xff] }
 0x18f   : > { %2003 = vmatprep.mubr.f32.mxu0 %v716_v2  ;;  %v334_v2 = vld [vmem:[%s4650_s26 + $0x3f8] sm:$0xff] }
 0x191   : > { %1234 = vmatmul.mubr.f32.gmra.mrb[126].mxu1 %v711_v3  ;;  %v329_v3 = vld [vmem:[%s4650_s26 + $0x3d0] sm:$0xff] }
 0x192   : > { %2004 = vmatmul.mubr.f32.gmra.mrb[126].mxu0 %v715_v4  ;;  %1303 = vmatprep.mubr.f32.mxu1 %v210_v5  ;;  %v333_v4 = vld [vmem:[%s4650_s26 + $0x3f0] sm:$0xff]  ;;  %v338_v5 = vld [vmem:[%s4650_s26 + $0x418] sm:$0xff] }
 0x193   : > { %2073 = vmatprep.mubr.f32.mxu0 %v214_v6  ;;  %v342_v6 = vld [vmem:[%s4650_s26 + $0x438] sm:$0xff] }
 0x195   : > { %1304 = vmatmul.mubr.f32.vlgmr.msra.gmra.mrb[0].mxu1 %v209_v7  ;;  %v337_v7 = vld [vmem:[%s4650_s26 + $0x410] sm:$0xff] }
 0x196   : > { %2074 = vmatmul.mubr.f32.vlgmr.msra.gmra.mrb[0].mxu0 %v213_v8  ;;  %1308 = vmatprep.mubr.f32.mxu1 %v218_v9  ;;  %v341_v8 = vld [vmem:[%s4650_s26 + $0x430] sm:$0xff]  ;;  %v346_v9 = vld [vmem:[%s4650_s26 + $0x458] sm:$0xff] }
 0x197   : > { %2078 = vmatprep.mubr.f32.mxu0 %v222_v10  ;;  %v350_v10 = vld [vmem:[%s4650_s26 + $0x478] sm:$0xff] }
 0x199   : > { %1309 = vmatmul.mubr.f32.gmra.mrb[2].mxu1 %v217_v11  ;;  %v345_v11 = vld [vmem:[%s4650_s26 + $0x450] sm:$0xff] }
 0x19a   : > { %2079 = vmatmul.mubr.f32.gmra.mrb[2].mxu0 %v221_v12  ;;  %1313 = vmatprep.mubr.f32.mxu1 %v226_v13  ;;  %v349_v12 = vld [vmem:[%s4650_s26 + $0x470] sm:$0xff]  ;;  %v354_v13 = vld [vmem:[%s4650_s26 + $0x498] sm:$0xff] }
 0x19b   : > { %2083 = vmatprep.mubr.f32.mxu0 %v230_v14  ;;  %v358_v14 = vld [vmem:[%s4650_s26 + $0x4b8] sm:$0xff] }
 0x19d   : > { %1314 = vmatmul.mubr.f32.gmra.mrb[4].mxu1 %v225_v15  ;;  %v353_v15 = vld [vmem:[%s4650_s26 + $0x490] sm:$0xff] }
 0x19e   : > { %2084 = vmatmul.mubr.f32.gmra.mrb[4].mxu0 %v229_v16  ;;  %1318 = vmatprep.mubr.f32.mxu1 %v234_v17  ;;  %v357_v16 = vld [vmem:[%s4650_s26 + $0x4b0] sm:$0xff]  ;;  %v362_v17 = vld [vmem:[%s4650_s26 + $0x4d8] sm:$0xff] }
 0x19f   : > { %2088 = vmatprep.mubr.f32.mxu0 %v238_v18  ;;  %v366_v18 = vld [vmem:[%s4650_s26 + $0x4f8] sm:$0xff] }
 0x1a1   : > { %1319 = vmatmul.mubr.f32.gmra.mrb[6].mxu1 %v233_v19  ;;  %v361_v19 = vld [vmem:[%s4650_s26 + $0x4d0] sm:$0xff] }
 0x1a2   : > { %2089 = vmatmul.mubr.f32.gmra.mrb[6].mxu0 %v237_v20  ;;  %1323 = vmatprep.mubr.f32.mxu1 %v242_v21  ;;  %v365_v20 = vld [vmem:[%s4650_s26 + $0x4f0] sm:$0xff]  ;;  %v370_v21 = vld [vmem:[%s4650_s26 + $0x518] sm:$0xff] }
 0x1a3   : > { %2093 = vmatprep.mubr.f32.mxu0 %v246_v22  ;;  %v374_v22 = vld [vmem:[%s4650_s26 + $0x538] sm:$0xff] }
 0x1a5   : > { %1324 = vmatmul.mubr.f32.gmra.mrb[8].mxu1 %v241_v23  ;;  %v369_v23 = vld [vmem:[%s4650_s26 + $0x510] sm:$0xff] }
 0x1a6   : > { %2094 = vmatmul.mubr.f32.gmra.mrb[8].mxu0 %v245_v24  ;;  %1328 = vmatprep.mubr.f32.mxu1 %v250_v25  ;;  %v373_v24 = vld [vmem:[%s4650_s26 + $0x530] sm:$0xff]  ;;  %v378_v25 = vld [vmem:[%s4650_s26 + $0x558] sm:$0xff] }
 0x1a7   : > { %2098 = vmatprep.mubr.f32.mxu0 %v254_v26  ;;  %v382_v26 = vld [vmem:[%s4650_s26 + $0x578] sm:$0xff] }
 0x1a9   : > { %1329 = vmatmul.mubr.f32.gmra.mrb[10].mxu1 %v249_v27  ;;  %v377_v27 = vld [vmem:[%s4650_s26 + $0x550] sm:$0xff] }
 0x1aa   : > { %2099 = vmatmul.mubr.f32.gmra.mrb[10].mxu0 %v253_v28  ;;  %1333 = vmatprep.mubr.f32.mxu1 %v258_v29  ;;  %v381_v28 = vld [vmem:[%s4650_s26 + $0x570] sm:$0xff]  ;;  %v386_v29 = vld [vmem:[%s4650_s26 + $0x598] sm:$0xff] }
 0x1ab   : > { %2103 = vmatprep.mubr.f32.mxu0 %v262_v30  ;;  %v390_v30 = vld [vmem:[%s4650_s26 + $0x5b8] sm:$0xff] }
 0x1ad   : > { %1334 = vmatmul.mubr.f32.gmra.mrb[12].mxu1 %v257_v31  ;;  %v385_v31 = vld [vmem:[%s4650_s26 + $0x590] sm:$0xff] }
 0x1ae   : > { %2104 = vmatmul.mubr.f32.gmra.mrb[12].mxu0 %v261_v32  ;;  %1338 = vmatprep.mubr.f32.mxu1 %v266_v33  ;;  %v389_v32 = vld [vmem:[%s4650_s26 + $0x5b0] sm:$0xff]  ;;  %v394_v33 = vld [vmem:[%s4650_s26 + $0x5d8] sm:$0xff] }
 0x1af   : > { %2108 = vmatprep.mubr.f32.mxu0 %v270_v34  ;;  %v398_v34 = vld [vmem:[%s4650_s26 + $0x5f8] sm:$0xff] }
 0x1b1   : > { %1339 = vmatmul.mubr.f32.gmra.mrb[14].mxu1 %v265_v35  ;;  %v393_v35 = vld [vmem:[%s4650_s26 + $0x5d0] sm:$0xff] }
 0x1b2   : > { %2109 = vmatmul.mubr.f32.gmra.mrb[14].mxu0 %v269_v36  ;;  %1343 = vmatprep.mubr.f32.mxu1 %v274_v37  ;;  %v397_v36 = vld [vmem:[%s4650_s26 + $0x5f0] sm:$0xff]  ;;  %v402_v37 = vld [vmem:[%s4650_s26 + $0x618] sm:$0xff] }
 0x1b3   : > { %2113 = vmatprep.mubr.f32.mxu0 %v278_v38  ;;  %v406_v38 = vld [vmem:[%s4650_s26 + $0x638] sm:$0xff] }
 0x1b5   : > { %1344 = vmatmul.mubr.f32.gmra.mrb[16].mxu1 %v273_v39  ;;  %v401_v39 = vld [vmem:[%s4650_s26 + $0x610] sm:$0xff] }
 0x1b6   : > { %2114 = vmatmul.mubr.f32.gmra.mrb[16].mxu0 %v277_v40  ;;  %1348 = vmatprep.mubr.f32.mxu1 %v282_v41  ;;  %v405_v40 = vld [vmem:[%s4650_s26 + $0x630] sm:$0xff]  ;;  %v410_v41 = vld [vmem:[%s4650_s26 + $0x658] sm:$0xff] }
 0x1b7   : > { %2118 = vmatprep.mubr.f32.mxu0 %v286_v42  ;;  %v414_v42 = vld [vmem:[%s4650_s26 + $0x678] sm:$0xff] }
 0x1b9   : > { %1349 = vmatmul.mubr.f32.gmra.mrb[18].mxu1 %v281_v43  ;;  %v409_v43 = vld [vmem:[%s4650_s26 + $0x650] sm:$0xff] }
 0x1ba   : > { %2119 = vmatmul.mubr.f32.gmra.mrb[18].mxu0 %v285_v44  ;;  %1353 = vmatprep.mubr.f32.mxu1 %v290_v45  ;;  %v413_v44 = vld [vmem:[%s4650_s26 + $0x670] sm:$0xff]  ;;  %v418_v45 = vld [vmem:[%s4650_s26 + $0x698] sm:$0xff] }
 0x1bb   : > { %2123 = vmatprep.mubr.f32.mxu0 %v294_v46  ;;  %v422_v46 = vld [vmem:[%s4650_s26 + $0x6b8] sm:$0xff] }
 0x1bd   : > { %1354 = vmatmul.mubr.f32.gmra.mrb[20].mxu1 %v289_v47  ;;  %v417_v47 = vld [vmem:[%s4650_s26 + $0x690] sm:$0xff] }
 0x1be   : > { %2124 = vmatmul.mubr.f32.gmra.mrb[20].mxu0 %v293_v48  ;;  %1358 = vmatprep.mubr.f32.mxu1 %v298_v49  ;;  %v421_v48 = vld [vmem:[%s4650_s26 + $0x6b0] sm:$0xff]  ;;  %v426_v49 = vld [vmem:[%s4650_s26 + $0x6d8] sm:$0xff] }
 0x1bf   : > { %2128 = vmatprep.mubr.f32.mxu0 %v302_v50  ;;  %v430_v50 = vld [vmem:[%s4650_s26 + $0x6f8] sm:$0xff] }
 0x1c1   : > { %1359 = vmatmul.mubr.f32.gmra.mrb[22].mxu1 %v297_v51  ;;  %v425_v51 = vld [vmem:[%s4650_s26 + $0x6d0] sm:$0xff] }
 0x1c2   : > { %2129 = vmatmul.mubr.f32.gmra.mrb[22].mxu0 %v301_v52  ;;  %1363 = vmatprep.mubr.f32.mxu1 %v306_v0  ;;  %v429_v52 = vld [vmem:[%s4650_s26 + $0x6f0] sm:$0xff]  ;;  %v434_v0 = vld [vmem:[%s4650_s26 + $0x718] sm:$0xff] }
 0x1c3   : > { %2133 = vmatprep.mubr.f32.mxu0 %v310_v53  ;;  %v438_v53 = vld [vmem:[%s4650_s26 + $0x738] sm:$0xff] }
 0x1c5   : > { %1364 = vmatmul.mubr.f32.gmra.mrb[24].mxu1 %v305_v54  ;;  %v433_v54 = vld [vmem:[%s4650_s26 + $0x710] sm:$0xff] }
 0x1c6   : > { %2134 = vmatmul.mubr.f32.gmra.mrb[24].mxu0 %v309_v55  ;;  %1368 = vmatprep.mubr.f32.mxu1 %v314_v56  ;;  %v437_v55 = vld [vmem:[%s4650_s26 + $0x730] sm:$0xff]  ;;  %v442_v56 = vld [vmem:[%s4650_s26 + $0x758] sm:$0xff] }
 0x1c7   : > { %2138 = vmatprep.mubr.f32.mxu0 %v318_v57  ;;  %v446_v57 = vld [vmem:[%s4650_s26 + $0x778] sm:$0xff] }
 0x1c9   : > { %1369 = vmatmul.mubr.f32.gmra.mrb[26].mxu1 %v313_v58  ;;  %v441_v58 = vld [vmem:[%s4650_s26 + $0x750] sm:$0xff] }
 0x1ca   : > { %2139 = vmatmul.mubr.f32.gmra.mrb[26].mxu0 %v317_v59  ;;  %1373 = vmatprep.mubr.f32.mxu1 %v322_v60  ;;  %v445_v59 = vld [vmem:[%s4650_s26 + $0x770] sm:$0xff]  ;;  %v450_v60 = vld [vmem:[%s4650_s26 + $0x798] sm:$0xff] }
 0x1cb   : > { %2143 = vmatprep.mubr.f32.mxu0 %v326_v61  ;;  %v454_v61 = vld [vmem:[%s4650_s26 + $0x7b8] sm:$0xff] }
 0x1cd   : > { %1374 = vmatmul.mubr.f32.gmra.mrb[28].mxu1 %v321_v62  ;;  %v449_v62 = vld [vmem:[%s4650_s26 + $0x790] sm:$0xff] }
 0x1ce   : > { %2144 = vmatmul.mubr.f32.gmra.mrb[28].mxu0 %v325_v63  ;;  %1378 = vmatprep.mubr.f32.mxu1 %v330_v1  ;;  %v453_v63 = vld [vmem:[%s4650_s26 + $0x7b0] sm:$0xff]  ;;  %v458_v1 = vld [vmem:[%s4650_s26 + $0x7d8] sm:$0xff] }
 0x1cf   : > { %2148 = vmatprep.mubr.f32.mxu0 %v334_v2  ;;  %v462_v2 = vld [vmem:[%s4650_s26 + $0x7f8] sm:$0xff] }
 0x1d1   : > { %1379 = vmatmul.mubr.f32.gmra.mrb[30].mxu1 %v329_v3  ;;  %v457_v3 = vld [vmem:[%s4650_s26 + $0x7d0] sm:$0xff] }
 0x1d2   : > { %2149 = vmatmul.mubr.f32.gmra.mrb[30].mxu0 %v333_v4  ;;  %1383 = vmatprep.mubr.f32.mxu1 %v338_v5  ;;  %v461_v4 = vld [vmem:[%s4650_s26 + $0x7f0] sm:$0xff]  ;;  %v466_v5 = vld [vmem:[%s4650_s26 + $0x818] sm:$0xff] }
 0x1d3   : > { %2153 = vmatprep.mubr.f32.mxu0 %v342_v6  ;;  %v470_v6 = vld [vmem:[%s4650_s26 + $0x838] sm:$0xff] }
 0x1d5   : > { %1384 = vmatmul.mubr.f32.gmra.mrb[32].mxu1 %v337_v7  ;;  %v465_v7 = vld [vmem:[%s4650_s26 + $0x810] sm:$0xff] }
 0x1d6   : > { %2154 = vmatmul.mubr.f32.gmra.mrb[32].mxu0 %v341_v8  ;;  %1388 = vmatprep.mubr.f32.mxu1 %v346_v9  ;;  %v469_v8 = vld [vmem:[%s4650_s26 + $0x830] sm:$0xff]  ;;  %v474_v9 = vld [vmem:[%s4650_s26 + $0x858] sm:$0xff] }
 0x1d7   : > { %2158 = vmatprep.mubr.f32.mxu0 %v350_v10  ;;  %v478_v10 = vld [vmem:[%s4650_s26 + $0x878] sm:$0xff] }
 0x1d9   : > { %1389 = vmatmul.mubr.f32.gmra.mrb[34].mxu1 %v345_v11  ;;  %v473_v11 = vld [vmem:[%s4650_s26 + $0x850] sm:$0xff] }
 0x1da   : > { %2159 = vmatmul.mubr.f32.gmra.mrb[34].mxu0 %v349_v12  ;;  %1393 = vmatprep.mubr.f32.mxu1 %v354_v13  ;;  %v477_v12 = vld [vmem:[%s4650_s26 + $0x870] sm:$0xff]  ;;  %v482_v13 = vld [vmem:[%s4650_s26 + $0x898] sm:$0xff] }
 0x1db   : > { %2163 = vmatprep.mubr.f32.mxu0 %v358_v14  ;;  %v486_v14 = vld [vmem:[%s4650_s26 + $0x8b8] sm:$0xff] }
 0x1dd   : > { %1394 = vmatmul.mubr.f32.gmra.mrb[36].mxu1 %v353_v15  ;;  %v481_v15 = vld [vmem:[%s4650_s26 + $0x890] sm:$0xff] }
 0x1de   : > { %2164 = vmatmul.mubr.f32.gmra.mrb[36].mxu0 %v357_v16  ;;  %1398 = vmatprep.mubr.f32.mxu1 %v362_v17  ;;  %v485_v16 = vld [vmem:[%s4650_s26 + $0x8b0] sm:$0xff]  ;;  %v490_v17 = vld [vmem:[%s4650_s26 + $0x8d8] sm:$0xff] }
 0x1df   : > { %2168 = vmatprep.mubr.f32.mxu0 %v366_v18  ;;  %v494_v18 = vld [vmem:[%s4650_s26 + $0x8f8] sm:$0xff] }
 0x1e1   : > { %1399 = vmatmul.mubr.f32.gmra.mrb[38].mxu1 %v361_v19  ;;  %v489_v19 = vld [vmem:[%s4650_s26 + $0x8d0] sm:$0xff] }
 0x1e2   : > { %2169 = vmatmul.mubr.f32.gmra.mrb[38].mxu0 %v365_v20  ;;  %1403 = vmatprep.mubr.f32.mxu1 %v370_v21  ;;  %v493_v20 = vld [vmem:[%s4650_s26 + $0x8f0] sm:$0xff]  ;;  %v498_v21 = vld [vmem:[%s4650_s26 + $0x918] sm:$0xff] }
 0x1e3   : > { %2173 = vmatprep.mubr.f32.mxu0 %v374_v22  ;;  %v502_v22 = vld [vmem:[%s4650_s26 + $0x938] sm:$0xff] }
 0x1e5   : > { %1404 = vmatmul.mubr.f32.gmra.mrb[40].mxu1 %v369_v23  ;;  %v497_v23 = vld [vmem:[%s4650_s26 + $0x910] sm:$0xff] }
 0x1e6   : > { %2174 = vmatmul.mubr.f32.gmra.mrb[40].mxu0 %v373_v24  ;;  %1408 = vmatprep.mubr.f32.mxu1 %v378_v25  ;;  %v501_v24 = vld [vmem:[%s4650_s26 + $0x930] sm:$0xff]  ;;  %v506_v25 = vld [vmem:[%s4650_s26 + $0x958] sm:$0xff] }
 0x1e7   : > { %2178 = vmatprep.mubr.f32.mxu0 %v382_v26  ;;  %v510_v26 = vld [vmem:[%s4650_s26 + $0x978] sm:$0xff] }
 0x1e9   : > { %1409 = vmatmul.mubr.f32.gmra.mrb[42].mxu1 %v377_v27  ;;  %v505_v27 = vld [vmem:[%s4650_s26 + $0x950] sm:$0xff] }
 0x1ea   : > { %2179 = vmatmul.mubr.f32.gmra.mrb[42].mxu0 %v381_v28  ;;  %1413 = vmatprep.mubr.f32.mxu1 %v386_v29  ;;  %v509_v28 = vld [vmem:[%s4650_s26 + $0x970] sm:$0xff]  ;;  %v514_v29 = vld [vmem:[%s4650_s26 + $0x998] sm:$0xff] }
 0x1eb   : > { %2183 = vmatprep.mubr.f32.mxu0 %v390_v30  ;;  %v518_v30 = vld [vmem:[%s4650_s26 + $0x9b8] sm:$0xff] }
 0x1ed   : > { %1414 = vmatmul.mubr.f32.gmra.mrb[44].mxu1 %v385_v31  ;;  %v513_v31 = vld [vmem:[%s4650_s26 + $0x990] sm:$0xff] }
 0x1ee   : > { %2184 = vmatmul.mubr.f32.gmra.mrb[44].mxu0 %v389_v32  ;;  %1418 = vmatprep.mubr.f32.mxu1 %v394_v33  ;;  %v517_v32 = vld [vmem:[%s4650_s26 + $0x9b0] sm:$0xff]  ;;  %v522_v33 = vld [vmem:[%s4650_s26 + $0x9d8] sm:$0xff] }
 0x1ef   : > { %2188 = vmatprep.mubr.f32.mxu0 %v398_v34  ;;  %v526_v34 = vld [vmem:[%s4650_s26 + $0x9f8] sm:$0xff] }
 0x1f1   : > { %1419 = vmatmul.mubr.f32.gmra.mrb[46].mxu1 %v393_v35  ;;  %v521_v35 = vld [vmem:[%s4650_s26 + $0x9d0] sm:$0xff] }
 0x1f2   : > { %2189 = vmatmul.mubr.f32.gmra.mrb[46].mxu0 %v397_v36  ;;  %1423 = vmatprep.mubr.f32.mxu1 %v402_v37  ;;  %v525_v36 = vld [vmem:[%s4650_s26 + $0x9f0] sm:$0xff]  ;;  %v530_v37 = vld [vmem:[%s4650_s26 + $0xa18] sm:$0xff] }
 0x1f3   : > { %2193 = vmatprep.mubr.f32.mxu0 %v406_v38  ;;  %v534_v38 = vld [vmem:[%s4650_s26 + $0xa38] sm:$0xff] }
 0x1f5   : > { %1424 = vmatmul.mubr.f32.gmra.mrb[48].mxu1 %v401_v39  ;;  %v529_v39 = vld [vmem:[%s4650_s26 + $0xa10] sm:$0xff] }
 0x1f6   : > { %2194 = vmatmul.mubr.f32.gmra.mrb[48].mxu0 %v405_v40  ;;  %1428 = vmatprep.mubr.f32.mxu1 %v410_v41  ;;  %v533_v40 = vld [vmem:[%s4650_s26 + $0xa30] sm:$0xff]  ;;  %v538_v41 = vld [vmem:[%s4650_s26 + $0xa58] sm:$0xff] }
 0x1f7   : > { %2198 = vmatprep.mubr.f32.mxu0 %v414_v42  ;;  %v542_v42 = vld [vmem:[%s4650_s26 + $0xa78] sm:$0xff] }
 0x1f9   : > { %1429 = vmatmul.mubr.f32.gmra.mrb[50].mxu1 %v409_v43  ;;  %v537_v43 = vld [vmem:[%s4650_s26 + $0xa50] sm:$0xff] }
 0x1fa   : > { %2199 = vmatmul.mubr.f32.gmra.mrb[50].mxu0 %v413_v44  ;;  %1433 = vmatprep.mubr.f32.mxu1 %v418_v45  ;;  %v541_v44 = vld [vmem:[%s4650_s26 + $0xa70] sm:$0xff]  ;;  %v546_v45 = vld [vmem:[%s4650_s26 + $0xa98] sm:$0xff] }
 0x1fb   : > { %2203 = vmatprep.mubr.f32.mxu0 %v422_v46  ;;  %v550_v46 = vld [vmem:[%s4650_s26 + $0xab8] sm:$0xff] }
 0x1fd   : > { %1434 = vmatmul.mubr.f32.gmra.mrb[52].mxu1 %v417_v47  ;;  %v545_v47 = vld [vmem:[%s4650_s26 + $0xa90] sm:$0xff] }
 0x1fe   : > { %2204 = vmatmul.mubr.f32.gmra.mrb[52].mxu0 %v421_v48  ;;  %1438 = vmatprep.mubr.f32.mxu1 %v426_v49  ;;  %v549_v48 = vld [vmem:[%s4650_s26 + $0xab0] sm:$0xff]  ;;  %v554_v49 = vld [vmem:[%s4650_s26 + $0xad8] sm:$0xff] }
 0x1ff   : > { %2208 = vmatprep.mubr.f32.mxu0 %v430_v50  ;;  %v558_v50 = vld [vmem:[%s4650_s26 + $0xaf8] sm:$0xff] }
 0x201   : > { %1439 = vmatmul.mubr.f32.gmra.mrb[54].mxu1 %v425_v51  ;;  %v553_v51 = vld [vmem:[%s4650_s26 + $0xad0] sm:$0xff] }
 0x202   : > { %2209 = vmatmul.mubr.f32.gmra.mrb[54].mxu0 %v429_v52  ;;  %1443 = vmatprep.mubr.f32.mxu1 %v434_v0  ;;  %v557_v52 = vld [vmem:[%s4650_s26 + $0xaf0] sm:$0xff]  ;;  %v562_v0 = vld [vmem:[%s4650_s26 + $0xb18] sm:$0xff] }
 0x203   : > { %2213 = vmatprep.mubr.f32.mxu0 %v438_v53  ;;  %v566_v53 = vld [vmem:[%s4650_s26 + $0xb38] sm:$0xff] }
 0x205   : > { %1444 = vmatmul.mubr.f32.gmra.mrb[56].mxu1 %v433_v54  ;;  %v561_v54 = vld [vmem:[%s4650_s26 + $0xb10] sm:$0xff] }
 0x206   : > { %2214 = vmatmul.mubr.f32.gmra.mrb[56].mxu0 %v437_v55  ;;  %1448 = vmatprep.mubr.f32.mxu1 %v442_v56  ;;  %v565_v55 = vld [vmem:[%s4650_s26 + $0xb30] sm:$0xff]  ;;  %v570_v56 = vld [vmem:[%s4650_s26 + $0xb58] sm:$0xff] }
 0x207   : > { %2218 = vmatprep.mubr.f32.mxu0 %v446_v57  ;;  %v574_v57 = vld [vmem:[%s4650_s26 + $0xb78] sm:$0xff] }
 0x209   : > { %1449 = vmatmul.mubr.f32.gmra.mrb[58].mxu1 %v441_v58  ;;  %v569_v58 = vld [vmem:[%s4650_s26 + $0xb50] sm:$0xff] }
 0x20a   : > { %2219 = vmatmul.mubr.f32.gmra.mrb[58].mxu0 %v445_v59  ;;  %1453 = vmatprep.mubr.f32.mxu1 %v450_v60  ;;  %v573_v59 = vld [vmem:[%s4650_s26 + $0xb70] sm:$0xff]  ;;  %v578_v60 = vld [vmem:[%s4650_s26 + $0xb98] sm:$0xff] }
 0x20b   : > { %2223 = vmatprep.mubr.f32.mxu0 %v454_v61  ;;  %v582_v61 = vld [vmem:[%s4650_s26 + $0xbb8] sm:$0xff] }
 0x20d   : > { %1454 = vmatmul.mubr.f32.gmra.mrb[60].mxu1 %v449_v62  ;;  %v577_v62 = vld [vmem:[%s4650_s26 + $0xb90] sm:$0xff] }
 0x20e   : > { %2224 = vmatmul.mubr.f32.gmra.mrb[60].mxu0 %v453_v63  ;;  %1458 = vmatprep.mubr.f32.mxu1 %v458_v1  ;;  %v581_v63 = vld [vmem:[%s4650_s26 + $0xbb0] sm:$0xff]  ;;  %v586_v1 = vld [vmem:[%s4650_s26 + $0xbd8] sm:$0xff] }
 0x20f   : > { %2228 = vmatprep.mubr.f32.mxu0 %v462_v2  ;;  %v590_v2 = vld [vmem:[%s4650_s26 + $0xbf8] sm:$0xff] }
 0x211   : > { %1459 = vmatmul.mubr.f32.gmra.mrb[62].mxu1 %v457_v3  ;;  %v585_v3 = vld [vmem:[%s4650_s26 + $0xbd0] sm:$0xff] }
 0x212   : > { %2229 = vmatmul.mubr.f32.gmra.mrb[62].mxu0 %v461_v4  ;;  %1463 = vmatprep.mubr.f32.mxu1 %v466_v5  ;;  %v589_v4 = vld [vmem:[%s4650_s26 + $0xbf0] sm:$0xff]  ;;  %v594_v5 = vld [vmem:[%s4650_s26 + $0xc18] sm:$0xff] }
 0x213   : > { %2233 = vmatprep.mubr.f32.mxu0 %v470_v6  ;;  %v598_v6 = vld [vmem:[%s4650_s26 + $0xc38] sm:$0xff] }
 0x215   : > { %1464 = vmatmul.mubr.f32.gmra.mrb[64].mxu1 %v465_v7  ;;  %v593_v7 = vld [vmem:[%s4650_s26 + $0xc10] sm:$0xff] }
 0x216   : > { %2234 = vmatmul.mubr.f32.gmra.mrb[64].mxu0 %v469_v8  ;;  %1468 = vmatprep.mubr.f32.mxu1 %v474_v9  ;;  %v597_v8 = vld [vmem:[%s4650_s26 + $0xc30] sm:$0xff]  ;;  %v602_v9 = vld [vmem:[%s4650_s26 + $0xc58] sm:$0xff] }
 0x217   : > { %2238 = vmatprep.mubr.f32.mxu0 %v478_v10  ;;  %v606_v10 = vld [vmem:[%s4650_s26 + $0xc78] sm:$0xff] }
 0x219   : > { %1469 = vmatmul.mubr.f32.gmra.mrb[66].mxu1 %v473_v11  ;;  %v601_v11 = vld [vmem:[%s4650_s26 + $0xc50] sm:$0xff] }
 0x21a   : > { %2239 = vmatmul.mubr.f32.gmra.mrb[66].mxu0 %v477_v12  ;;  %1473 = vmatprep.mubr.f32.mxu1 %v482_v13  ;;  %v605_v12 = vld [vmem:[%s4650_s26 + $0xc70] sm:$0xff]  ;;  %v610_v13 = vld [vmem:[%s4650_s26 + $0xc98] sm:$0xff] }
 0x21b   : > { %2243 = vmatprep.mubr.f32.mxu0 %v486_v14  ;;  %v614_v14 = vld [vmem:[%s4650_s26 + $0xcb8] sm:$0xff] }
 0x21d   : > { %1474 = vmatmul.mubr.f32.gmra.mrb[68].mxu1 %v481_v15  ;;  %v609_v15 = vld [vmem:[%s4650_s26 + $0xc90] sm:$0xff] }
 0x21e   : > { %2244 = vmatmul.mubr.f32.gmra.mrb[68].mxu0 %v485_v16  ;;  %1478 = vmatprep.mubr.f32.mxu1 %v490_v17  ;;  %v613_v16 = vld [vmem:[%s4650_s26 + $0xcb0] sm:$0xff]  ;;  %v618_v17 = vld [vmem:[%s4650_s26 + $0xcd8] sm:$0xff] }
 0x21f   : > { %2248 = vmatprep.mubr.f32.mxu0 %v494_v18  ;;  %v622_v18 = vld [vmem:[%s4650_s26 + $0xcf8] sm:$0xff] }
 0x221   : > { %1479 = vmatmul.mubr.f32.gmra.mrb[70].mxu1 %v489_v19  ;;  %v617_v19 = vld [vmem:[%s4650_s26 + $0xcd0] sm:$0xff] }
 0x222   : > { %2249 = vmatmul.mubr.f32.gmra.mrb[70].mxu0 %v493_v20  ;;  %1483 = vmatprep.mubr.f32.mxu1 %v498_v21  ;;  %v621_v20 = vld [vmem:[%s4650_s26 + $0xcf0] sm:$0xff]  ;;  %v626_v21 = vld [vmem:[%s4650_s26 + $0xd18] sm:$0xff] }
 0x223   : > { %2253 = vmatprep.mubr.f32.mxu0 %v502_v22  ;;  %v630_v22 = vld [vmem:[%s4650_s26 + $0xd38] sm:$0xff] }
 0x225   : > { %1484 = vmatmul.mubr.f32.gmra.mrb[72].mxu1 %v497_v23  ;;  %v625_v23 = vld [vmem:[%s4650_s26 + $0xd10] sm:$0xff] }
 0x226   : > { %2254 = vmatmul.mubr.f32.gmra.mrb[72].mxu0 %v501_v24  ;;  %1488 = vmatprep.mubr.f32.mxu1 %v506_v25  ;;  %v629_v24 = vld [vmem:[%s4650_s26 + $0xd30] sm:$0xff]  ;;  %v634_v25 = vld [vmem:[%s4650_s26 + $0xd58] sm:$0xff] }
 0x227   : > { %2258 = vmatprep.mubr.f32.mxu0 %v510_v26  ;;  %v638_v26 = vld [vmem:[%s4650_s26 + $0xd78] sm:$0xff] }
 0x229   : > { %1489 = vmatmul.mubr.f32.gmra.mrb[74].mxu1 %v505_v27  ;;  %v5578_v27 = vld [vmem:[#allocation4] ss:$0 sm:$0xff] }
 0x22a   : > { %2259 = vmatmul.mubr.f32.gmra.mrb[74].mxu0 %v509_v28  ;;  %1493 = vmatprep.mubr.f32.mxu1 %v514_v29  ;;  %v633_v28 = vld [vmem:[%s4650_s26 + $0xd50] sm:$0xff] }
 0x22b   : > { %2263 = vmatprep.mubr.f32.mxu0 %v518_v30  ;;  %v637_v29 = vld [vmem:[%s4650_s26 + $0xd70] sm:$0xff]  ;;  %v642_v30 = vld [vmem:[%s4650_s26 + $0xd98] sm:$0xff] }
 0x22d   : > { %1494 = vmatmul.mubr.f32.gmra.mrb[76].mxu1 %v513_v31 }
 0x22e   : > { %2264 = vmatmul.mubr.f32.gmra.mrb[76].mxu0 %v517_v32  ;;  %1498 = vmatprep.mubr.f32.mxu1 %v522_v33  ;;  %v646_v32 = vld [vmem:[%s4650_s26 + $0xdb8] sm:$0xff] }
 0x22f   : > { %2268 = vmatprep.mubr.f32.mxu0 %v526_v34 }
 0x231   : > { %1499 = vmatmul.mubr.f32.gmra.mrb[78].mxu1 %v521_v35 }
 0x232   : > { %2269 = vmatmul.mubr.f32.gmra.mrb[78].mxu0 %v525_v36  ;;  %1503 = vmatprep.mubr.f32.mxu1 %v530_v37  ;;  %v641_v37 = vld [vmem:[%s4650_s26 + $0xd90] sm:$0xff] }
 0x233   : > { %2273 = vmatprep.mubr.f32.mxu0 %v534_v38 }
 0x235   : > { %1504 = vmatmul.mubr.f32.gmra.mrb[80].mxu1 %v529_v39  ;;  %v645_v39 = vld [vmem:[%s4650_s26 + $0xdb0] sm:$0xff] }
 0x236   : > { %2274 = vmatmul.mubr.f32.gmra.mrb[80].mxu0 %v533_v40  ;;  %1508 = vmatprep.mubr.f32.mxu1 %v538_v41  ;;  %v650_v41 = vld [vmem:[%s4650_s26 + $0xdd8] sm:$0xff] }
 0x237   : > { %2278 = vmatprep.mubr.f32.mxu0 %v542_v42  ;;  %v654_v42 = vld [vmem:[%s4650_s26 + $0xdf8] sm:$0xff] }
 0x239   : > { %1509 = vmatmul.mubr.f32.gmra.mrb[82].mxu1 %v537_v43 }
 0x23a   : > { %2279 = vmatmul.mubr.f32.gmra.mrb[82].mxu0 %v541_v44  ;;  %1513 = vmatprep.mubr.f32.mxu1 %v546_v45 }
 0x23b   : > { %2283 = vmatprep.mubr.f32.mxu0 %v550_v46 }
 0x23d   : > { %1514 = vmatmul.mubr.f32.gmra.mrb[84].mxu1 %v545_v47 }
 0x23e   : > { %2284 = vmatmul.mubr.f32.gmra.mrb[84].mxu0 %v549_v48  ;;  %1518 = vmatprep.mubr.f32.mxu1 %v554_v49  ;;  %v649_v49 = vld [vmem:[%s4650_s26 + $0xdd0] sm:$0xff] }
 0x23f   : > { %2288 = vmatprep.mubr.f32.mxu0 %v558_v50 }
 0x241   : > { %1519 = vmatmul.mubr.f32.gmra.mrb[86].mxu1 %v553_v51  ;;  %v653_v51 = vld [vmem:[%s4650_s26 + $0xdf0] sm:$0xff] }
 0x242   : > { %2289 = vmatmul.mubr.f32.gmra.mrb[86].mxu0 %v557_v52  ;;  %1523 = vmatprep.mubr.f32.mxu1 %v562_v0  ;;  %v658_v0 = vld [vmem:[%s4650_s26 + $0xe18] sm:$0xff] }
 0x243   : > { %2293 = vmatprep.mubr.f32.mxu0 %v566_v53  ;;  %v662_v53 = vld [vmem:[%s4650_s26 + $0xe38] sm:$0xff] }
 0x245   : > { %1524 = vmatmul.mubr.f32.gmra.mrb[88].mxu1 %v561_v54 }
 0x246   : > { %2294 = vmatmul.mubr.f32.gmra.mrb[88].mxu0 %v565_v55  ;;  %1528 = vmatprep.mubr.f32.mxu1 %v570_v56 }
 0x247   : > { %2298 = vmatprep.mubr.f32.mxu0 %v574_v57 }
 0x249   : > { %1529 = vmatmul.mubr.f32.gmra.mrb[90].mxu1 %v569_v58 }
 0x24a   : > { %2299 = vmatmul.mubr.f32.gmra.mrb[90].mxu0 %v573_v59  ;;  %1533 = vmatprep.mubr.f32.mxu1 %v578_v60  ;;  %v657_v60 = vld [vmem:[%s4650_s26 + $0xe10] sm:$0xff] }
 0x24b   : > { %2303 = vmatprep.mubr.f32.mxu0 %v582_v61 }
 0x24d   : > { %1534 = vmatmul.mubr.f32.gmra.mrb[92].mxu1 %v577_v62 }
 0x24e   : > { %2304 = vmatmul.mubr.f32.gmra.mrb[92].mxu0 %v581_v63  ;;  %1538 = vmatprep.mubr.f32.mxu1 %v586_v1  ;;  %v661_v63 = vld [vmem:[%s4650_s26 + $0xe30] sm:$0xff] }
 0x24f   : > { %2308 = vmatprep.mubr.f32.mxu0 %v590_v2  ;;  %v666_v2 = vld [vmem:[%s4650_s26 + $0xe58] sm:$0xff] }
 0x251   : > { %1539 = vmatmul.mubr.f32.gmra.mrb[94].mxu1 %v585_v3  ;;  %v670_v3 = vld [vmem:[%s4650_s26 + $0xe78] sm:$0xff] }
 0x252   : > { %2309 = vmatmul.mubr.f32.gmra.mrb[94].mxu0 %v589_v4  ;;  %1543 = vmatprep.mubr.f32.mxu1 %v594_v5 }
 0x253   : > { %2313 = vmatprep.mubr.f32.mxu0 %v598_v6 }
 0x255   : > { %1544 = vmatmul.mubr.f32.gmra.mrb[96].mxu1 %v593_v7 }
 0x256   : > { %2314 = vmatmul.mubr.f32.gmra.mrb[96].mxu0 %v597_v8  ;;  %1548 = vmatprep.mubr.f32.mxu1 %v602_v9 }
 0x257   : > { %2318 = vmatprep.mubr.f32.mxu0 %v606_v10  ;;  %v665_v10 = vld [vmem:[%s4650_s26 + $0xe50] sm:$0xff] }
 0x259   : > { %1549 = vmatmul.mubr.f32.gmra.mrb[98].mxu1 %v601_v11 }
 0x25a   : > { %2319 = vmatmul.mubr.f32.gmra.mrb[98].mxu0 %v605_v12  ;;  %1553 = vmatprep.mubr.f32.mxu1 %v610_v13  ;;  %v669_v13 = vld [vmem:[%s4650_s26 + $0xe70] sm:$0xff] }
 0x25b   : > { %2323 = vmatprep.mubr.f32.mxu0 %v614_v14 }
 0x25d   : > { %1554 = vmatmul.mubr.f32.gmra.mrb[100].mxu1 %v609_v15  ;;  %v674_v15 = vld [vmem:[%s4650_s26 + $0xe98] sm:$0xff] }
 0x25e   : > { %2324 = vmatmul.mubr.f32.gmra.mrb[100].mxu0 %v613_v16  ;;  %1558 = vmatprep.mubr.f32.mxu1 %v618_v17  ;;  %v678_v16 = vld [vmem:[%s4650_s26 + $0xeb8] sm:$0xff] }
 0x25f   : > { %2328 = vmatprep.mubr.f32.mxu0 %v622_v18 }
 0x261   : > { %1559 = vmatmul.mubr.f32.gmra.mrb[102].mxu1 %v617_v19 }
 0x262   : > { %2329 = vmatmul.mubr.f32.gmra.mrb[102].mxu0 %v621_v20  ;;  %1563 = vmatprep.mubr.f32.mxu1 %v626_v21 }
 0x263   : > { %2333 = vmatprep.mubr.f32.mxu0 %v630_v22  ;;  %v673_v22 = vld [vmem:[%s4650_s26 + $0xe90] sm:$0xff] }
 0x265   : > { %1564 = vmatmul.mubr.f32.gmra.mrb[104].mxu1 %v625_v23 }
 0x266   : > { %2334 = vmatmul.mubr.f32.gmra.mrb[104].mxu0 %v629_v24  ;;  %1568 = vmatprep.mubr.f32.mxu1 %v634_v25  ;;  %v677_v25 = vld [vmem:[%s4650_s26 + $0xeb0] sm:$0xff] }
 0x267   : > { %2338 = vmatprep.mubr.f32.mxu0 %v638_v26 }
 0x268   : > { %v1305_v31 = vpop.f32.mrb[0].mxu1 }
 0x269   : > { %v3835_v33 = vadd.f32 %v5578_v27, %v1305_v31  ;;  %v2075_v34 = vpop.f32.mrb[0].mxu0  ;;  %v1307_v35 = vpop.f32.mrb[1].mxu1  ;;  %1569 = vmatmul.mubr.f32.gmra.mrb[106].mxu1 %v633_v28 }
 0x26a   : > { %v2077_v36 = vpop.f32.mrb[1].mxu0  ;;  %2339 = vmatmul.mubr.f32.gmra.mrb[106].mxu0 %v637_v29  ;;  %1573 = vmatprep.mubr.f32.mxu1 %v642_v30  ;;  %v682_v29 = vld [vmem:[%s4650_s26 + $0xed8] sm:$0xff] }
 0x26b   : > { %v5586_v38 = vadd.f32 %v3835_v33, %v2075_v34  ;;  %2343 = vmatprep.mubr.f32.mxu0 %v646_v32  ;;  %v686_v30 = vld [vmem:[%s4650_s26 + $0xef8] sm:$0xff] }
 0x26c   : > { %v1310_v40 = vpop.f32.mrb[2].mxu1 }
 0x26d   : > { %v3837_v43 = vadd.f32 %v5578_v27, %v1310_v40  ;;  %v2080_v44 = vpop.f32.mrb[2].mxu0  ;;  %v1312_v45 = vpop.f32.mrb[3].mxu1  ;;  %1574 = vmatmul.mubr.f32.gmra.mrb[108].mxu1 %v641_v37  ;;  %v2395_v46 = vsel %vm2394_vm0, %v5586_v38, 0.0  ;;  %v2651_v47 = vmul.f32 %v5586_v38, %v5586_v38  ;;  %v681_v37 = vld [vmem:[%s4650_s26 + $0xed0] sm:$0xff] }
 0x26e   : > { %v2082_v48 = vpop.f32.mrb[3].mxu0  ;;  %2344 = vmatmul.mubr.f32.gmra.mrb[108].mxu0 %v645_v39  ;;  %2396 = vadd.xlane.f32.xlu0 %v2395_v46 }
 0x26f   : > { %v5597_v50 = vadd.f32 %v3837_v43, %v2080_v44  ;;  %1578 = vmatprep.mubr.f32.mxu1 %v650_v41  ;;  %2348 = vmatprep.mubr.f32.mxu0 %v654_v42  ;;  %v2715_v57 = vsel %vm2394_vm0, %v2651_v47, 0.0  ;;  %v685_v41 = vld [vmem:[%s4650_s26 + $0xef0] sm:$0xff]  ;;  %v690_v43 = vld [vmem:[%s4650_s26 + $0xf18] sm:$0xff] }
 0x270   : > { %v1315_v52 = vpop.f32.mrb[4].mxu1  ;;  %v694_v44 = vld [vmem:[%s4650_s26 + $0xf38] sm:$0xff] }
 0x271   : > { %v3839_v54 = vadd.f32 %v5578_v27, %v1315_v52  ;;  %v2085_v55 = vpop.f32.mrb[4].mxu0  ;;  %v1317_v56 = vpop.f32.mrb[5].mxu1  ;;  %1579 = vmatmul.mubr.f32.gmra.mrb[110].mxu1 %v649_v49  ;;  %v2652_v58 = vmul.f32 %v5597_v50, %v5597_v50  ;;  %v2398_v7 = vsel %vm2394_vm0, %v5597_v50, 0.0 }
 0x272   : > { %v2087_v59 = vpop.f32.mrb[5].mxu0  ;;  %2349 = vmatmul.mubr.f32.gmra.mrb[110].mxu0 %v653_v51  ;;  %2716 = vadd.xlane.f32.xlu0 %v2715_v57  ;;  %v689_v51 = vld [vmem:[%s4650_s26 + $0xf10] sm:$0xff]  ;;  %v698_v56 = vld [vmem:[%s4650_s26 + $0xf58] sm:$0xff] }
 0x273   : > { %v5607_v61 = vadd.f32 %v3839_v54, %v2085_v55  ;;  %1583 = vmatprep.mubr.f32.mxu1 %v658_v0  ;;  %2353 = vmatprep.mubr.f32.mxu0 %v662_v53  ;;  %v2718_v62 = vsel %vm2394_vm0, %v2652_v58, 0.0  ;;  %v693_v53 = vld [vmem:[%s4650_s26 + $0xf30] sm:$0xff]  ;;  %v702_v57 = vld [vmem:[%s4650_s26 + $0xf78] sm:$0xff] }
 0x274   : > { %2719 = vadd.xlane.f32.xlu1 %v2718_v62  ;;  %v1320_v1 = vpop.f32.mrb[6].mxu1 }
 0x275   : > { %v2090_v4 = vpop.f32.mrb[6].mxu0  ;;  %v3841_v5 = vadd.f32 %v5578_v27, %v1320_v1  ;;  %v1322_v6 = vpop.f32.mrb[7].mxu1  ;;  %1584 = vmatmul.mubr.f32.gmra.mrb[112].mxu1 %v657_v60  ;;  %v2653_v8 = vmul.f32 %v5607_v61, %v5607_v61  ;;  %v2401_v12 = vsel %vm2394_vm0, %v5607_v61, 0.0 }
 0x276   : > { %v2092_v9 = vpop.f32.mrb[7].mxu0  ;;  %2354 = vmatmul.mubr.f32.gmra.mrb[112].mxu0 %v661_v63  ;;  %2399 = vadd.xlane.f32.xlu0 %v2398_v7  ;;  %v706_v7 = vld [vmem:[%s4650_s26 + $0xf98] sm:$0xff] }
 0x277   : > { %v5619_v11 = vadd.f32 %v3841_v5, %v2090_v4  ;;  %1588 = vmatprep.mubr.f32.mxu1 %v666_v2  ;;  %2358 = vmatprep.mubr.f32.mxu0 %v670_v3  ;;  %v2721_v20 = vsel %vm2394_vm0, %v2653_v8, 0.0  ;;  %v697_v2 = vld [vmem:[%s4650_s26 + $0xf50] sm:$0xff]  ;;  %v710_v8 = vld [vmem:[%s4650_s26 + $0xfb8] sm:$0xff] }
 0x278   : > { %2402 = vadd.xlane.f32.xlu1 %v2401_v12  ;;  %v1325_v14 = vpop.f32.mrb[8].mxu1  ;;  %v701_v5 = vld [vmem:[%s4650_s26 + $0xf70] sm:$0xff] }
 0x279   : > { %v2095_v17 = vpop.f32.mrb[8].mxu0  ;;  %v3843_v18 = vadd.f32 %v5578_v27, %v1325_v14  ;;  %v1327_v19 = vpop.f32.mrb[9].mxu1  ;;  %1589 = vmatmul.mubr.f32.gmra.mrb[114].mxu1 %v665_v10  ;;  %v2404_v24 = vsel %vm2394_vm0, %v5619_v11, 0.0  ;;  %v2654_v26 = vmul.f32 %v5619_v11, %v5619_v11 }
 0x27a   : > { %v2097_v21 = vpop.f32.mrb[9].mxu0  ;;  %2359 = vmatmul.mubr.f32.gmra.mrb[114].mxu0 %v669_v13  ;;  %2722 = vadd.xlane.f32.xlu0 %v2721_v20 }
 0x27b   : > { %v5629_v23 = vadd.f32 %v3843_v18, %v2095_v17  ;;  %1593 = vmatprep.mubr.f32.mxu1 %v674_v15  ;;  %2363 = vmatprep.mubr.f32.mxu0 %v678_v16  ;;  %v2724_v40 = vsel %vm2394_vm0, %v2654_v26, 0.0  ;;  %v705_v15 = vld [vmem:[%s4650_s26 + $0xf90] sm:$0xff]  ;;  %v714_v21 = vld [vmem:[%s4650_s26 + $0xfd8] sm:$0xff] }
 0x27c   : > { %2405 = vadd.xlane.f32.xlu1 %v2404_v24  ;;  %v1330_v28 = vpop.f32.mrb[10].mxu1  ;;  %v709_v18 = vld [vmem:[%s4650_s26 + $0xfb0] sm:$0xff] }
 0x27d   : > { %v2100_v31 = vpop.f32.mrb[10].mxu0  ;;  %v3845_v32 = vadd.f32 %v5578_v27, %v1330_v28  ;;  %v1332_v33 = vpop.f32.mrb[11].mxu1  ;;  %1594 = vmatmul.mubr.f32.gmra.mrb[116].mxu1 %v673_v22  ;;  %v2407_v34 = vsel %vm2394_vm0, %v5629_v23, 0.0  ;;  %v2655_v35 = vmul.f32 %v5629_v23, %v5629_v23  ;;  %v718_v22 = vld [vmem:[%s4650_s26 + $0xff8] sm:$0xff] }
 0x27e   : > { %v2102_v36 = vpop.f32.mrb[11].mxu0  ;;  %2364 = vmatmul.mubr.f32.gmra.mrb[116].mxu0 %v677_v25  ;;  %2408 = vadd.xlane.f32.xlu0 %v2407_v34  ;;  %v717_v34 = vld [vmem:[%s4650_s26 + $0xff0] sm:$0xff] }
 0x27f   : > { %v5644_v39 = vadd.f32 %v3845_v32, %v2100_v31  ;;  %1598 = vmatprep.mubr.f32.mxu1 %v682_v29  ;;  %2368 = vmatprep.mubr.f32.mxu0 %v686_v30  ;;  %v2727_v48 = vsel %vm2394_vm0, %v2655_v35, 0.0  ;;  %v713_v31 = vld [vmem:[%s4650_s26 + $0xfd0] sm:$0xff]  ;;  %s5936_s26 = sshll.u32 %s3624_s16, 6 }
 0x280   : > { %2725 = vadd.xlane.f32.xlu1 %v2724_v40  ;;  %v1335_v42 = vpop.f32.mrb[12].mxu1  ;;  %p202_p8 = scmp.lt.s32.totalorder %s5936_s26, 127 }
 0x281   : > { %v2105_v45 = vpop.f32.mrb[12].mxu0  ;;  %v3847_v46 = vadd.f32 %v5578_v27, %v1335_v42  ;;  %v1337_v47 = vpop.f32.mrb[13].mxu1  ;;  %1599 = vmatmul.mubr.f32.gmra.mrb[118].mxu1 %v681_v37  ;;  %v2410_v0 = vsel %vm2394_vm0, %v5644_v39, 0.0  ;;  %v2656_v54 = vmul.f32 %v5644_v39, %v5644_v39 }
 0x282   : > { %v2107_v49 = vpop.f32.mrb[13].mxu0  ;;  %2369 = vmatmul.mubr.f32.gmra.mrb[118].mxu0 %v685_v41  ;;  %2728 = vadd.xlane.f32.xlu0 %v2727_v48  ;;  %s6706_s26 = smov (!%p202_p8, %s5936_s26), 127 }
 0x283   : > { %v5653_v52 = vadd.f32 %v3847_v46, %v2105_v45  ;;  %1603 = vmatprep.mubr.f32.mxu1 %v690_v43  ;;  %2373 = vmatprep.mubr.f32.mxu0 %v694_v44  ;;  %v2730_v4 = vsel %vm2394_vm0, %v2656_v54, 0.0  ;;  %s3637_s15 = sshll.u32 %s6706_s26, 3 }
 0x284   : > { %2411 = vadd.xlane.f32.xlu1 %v2410_v0  ;;  %v1340_v55 = vpop.f32.mrb[14].mxu1  ;;  %s6000_s4 = scalar_lea.vmem %s6667_s3, %s3637_s15 }
 0x285   : > { %v2110_v58 = vpop.f32.mrb[14].mxu0  ;;  %v3849_v59 = vadd.f32 %v5578_v27, %v1340_v55  ;;  %v1342_v60 = vpop.f32.mrb[15].mxu1  ;;  %1604 = vmatmul.mubr.f32.gmra.mrb[120].mxu1 %v689_v51  ;;  %v2413_v62 = vsel %vm2394_vm0, %v5653_v52, 0.0  ;;  %v2657_v63 = vmul.f32 %v5653_v52, %v5653_v52 }
 0x286   : > { %v2112_v1 = vpop.f32.mrb[15].mxu0  ;;  %2374 = vmatmul.mubr.f32.gmra.mrb[120].mxu0 %v693_v53  ;;  %2414 = vadd.xlane.f32.xlu0 %v2413_v62 }
 0x287   : > { %v5668_v3 = vadd.f32 %v3849_v59, %v2110_v58  ;;  %1608 = vmatprep.mubr.f32.mxu1 %v698_v56  ;;  %2378 = vmatprep.mubr.f32.mxu0 %v702_v57  ;;  %v2733_v13 = vsel %vm2394_vm0, %v2657_v63, 0.0 }
 0x288   : > { %2731 = vadd.xlane.f32.xlu1 %v2730_v4  ;;  %v1345_v6 = vpop.f32.mrb[16].mxu1 }
 0x289   : > { %v2115_v9 = vpop.f32.mrb[16].mxu0  ;;  %v3851_v10 = vadd.f32 %v5578_v27, %v1345_v6  ;;  %v1347_v12 = vpop.f32.mrb[17].mxu1  ;;  %1609 = vmatmul.mubr.f32.gmra.mrb[122].mxu1 %v697_v2  ;;  %v2416_v17 = vsel %vm2394_vm0, %v5668_v3, 0.0  ;;  %v2658_v19 = vmul.f32 %v5668_v3, %v5668_v3 }
 0x28a   : > { %v2117_v14 = vpop.f32.mrb[17].mxu0  ;;  %2379 = vmatmul.mubr.f32.gmra.mrb[122].mxu0 %v701_v5  ;;  %2734 = vadd.xlane.f32.xlu0 %v2733_v13 }
 0x28b   : > { %v5677_v16 = vadd.f32 %v3851_v10, %v2115_v9  ;;  %1613 = vmatprep.mubr.f32.mxu1 %v706_v7  ;;  %2383 = vmatprep.mubr.f32.mxu0 %v710_v8  ;;  %v2736_v33 = vsel %vm2394_vm0, %v2658_v19, 0.0 }
 0x28c   : > { %2417 = vadd.xlane.f32.xlu1 %v2416_v17  ;;  %v1350_v20 = vpop.f32.mrb[18].mxu1 }
 0x28d   : > { %v2120_v24 = vpop.f32.mrb[18].mxu0  ;;  %v3853_v25 = vadd.f32 %v5578_v27, %v1350_v20  ;;  %v1352_v26 = vpop.f32.mrb[19].mxu1  ;;  %1614 = vmatmul.mubr.f32.gmra.mrb[124].mxu1 %v705_v15  ;;  %v2419_v28 = vsel %vm2394_vm0, %v5677_v16, 0.0  ;;  %v2659_v29 = vmul.f32 %v5677_v16, %v5677_v16 }
 0x28e   : > { %v2122_v30 = vpop.f32.mrb[19].mxu0  ;;  %2384 = vmatmul.mubr.f32.gmra.mrb[124].mxu0 %v709_v18  ;;  %2420 = vadd.xlane.f32.xlu0 %v2419_v28 }
 0x28f   : > { %v5692_v32 = vadd.f32 %v3853_v25, %v2120_v24  ;;  %1618 = vmatprep.mubr.f32.mxu1 %v714_v21  ;;  %2388 = vmatprep.mubr.f32.mxu0 %v718_v22  ;;  %v2739_v41 = vsel %vm2394_vm0, %v2659_v29, 0.0 }
 0x290   : > { %2737 = vadd.xlane.f32.xlu1 %v2736_v33  ;;  %v1355_v35 = vpop.f32.mrb[20].mxu1 }
 0x291   : > { %v2125_v36 = vpop.f32.mrb[20].mxu0  ;;  %v3855_v37 = vadd.f32 %v5578_v27, %v1355_v35  ;;  %v1357_v40 = vpop.f32.mrb[21].mxu1  ;;  %1619 = vmatmul.mubr.f32.gmra.mrb[126].mxu1 %v713_v31  ;;  %v2422_v44 = vsel %vm2394_vm0, %v5692_v32, 0.0  ;;  %v2660_v45 = vmul.f32 %v5692_v32, %v5692_v32 }
 0x292   : > { %v2127_v42 = vpop.f32.mrb[21].mxu0  ;;  %2389 = vmatmul.mubr.f32.gmra.mrb[126].mxu0 %v717_v34  ;;  %2740 = vadd.xlane.f32.xlu0 %v2739_v41 }
 0x293   : > { %v5698_v43 = vadd.f32 %v3855_v37, %v2125_v36  ;;  %v2742_v55 = vsel %vm2394_vm0, %v2660_v45, 0.0 }
 0x294   : > { %2423 = vadd.xlane.f32.xlu1 %v2422_v44  ;;  %v1360_v46 = vpop.f32.mrb[22].mxu1 }
 0x295   : > { %v2130_v47 = vpop.f32.mrb[22].mxu0  ;;  %v3857_v48 = vadd.f32 %v5578_v27, %v1360_v46  ;;  %v1362_v49 = vpop.f32.mrb[23].mxu1  ;;  %v2425_v51 = vsel %vm2394_vm0, %v5698_v43, 0.0  ;;  %v2661_v0 = vmul.f32 %v5698_v43, %v5698_v43 }
 0x296   : > { %v2132_v53 = vpop.f32.mrb[23].mxu0  ;;  %2426 = vadd.xlane.f32.xlu0 %v2425_v51 }
 0x297   : > { %v5709_v54 = vadd.f32 %v3857_v48, %v2130_v47  ;;  %v2745_v60 = vsel %vm2394_vm0, %v2661_v0, 0.0 }
 0x298   : > { %2743 = vadd.xlane.f32.xlu1 %v2742_v55  ;;  %v1365_v56 = vpop.f32.mrb[24].mxu1 }
 0x299   : > { %v2135_v57 = vpop.f32.mrb[24].mxu0  ;;  %v3859_v58 = vadd.f32 %v5578_v27, %v1365_v56  ;;  %v1367_v59 = vpop.f32.mrb[25].mxu1  ;;  %v2428_v1 = vsel %vm2394_vm0, %v5709_v54, 0.0  ;;  %v2662_v2 = vmul.f32 %v5709_v54, %v5709_v54 }
 0x29a   : > { %v2137_v62 = vpop.f32.mrb[25].mxu0  ;;  %2746 = vadd.xlane.f32.xlu0 %v2745_v60 }
 0x29b   : > { %v5714_v63 = vadd.f32 %v3859_v58, %v2135_v57  ;;  %v2748_v13 = vsel %vm2394_vm0, %v2662_v2, 0.0 }
 0x29c   : > { %2429 = vadd.xlane.f32.xlu1 %v2428_v1  ;;  %v1370_v4 = vpop.f32.mrb[26].mxu1 }
 0x29d   : > { %v2140_v5 = vpop.f32.mrb[26].mxu0  ;;  %v3861_v6 = vadd.f32 %v5578_v27, %v1370_v4  ;;  %v1372_v7 = vpop.f32.mrb[27].mxu1  ;;  %v2431_v8 = vsel %vm2394_vm0, %v5714_v63, 0.0  ;;  %v2663_v9 = vmul.f32 %v5714_v63, %v5714_v63 }
 0x29e   : > { %v2142_v10 = vpop.f32.mrb[27].mxu0  ;;  %2432 = vadd.xlane.f32.xlu0 %v2431_v8 }
 0x29f   : > { %v5725_v12 = vadd.f32 %v3861_v6, %v2140_v5  ;;  %v2751_v19 = vsel %vm2394_vm0, %v2663_v9, 0.0 }
 0x2a0   : > { %2749 = vadd.xlane.f32.xlu1 %v2748_v13  ;;  %v1375_v14 = vpop.f32.mrb[28].mxu1 }
 0x2a1   : > { %v2145_v15 = vpop.f32.mrb[28].mxu0  ;;  %v3863_v17 = vadd.f32 %v5578_v27, %v1375_v14  ;;  %v1377_v18 = vpop.f32.mrb[29].mxu1  ;;  %v2434_v22 = vsel %vm2394_vm0, %v5725_v12, 0.0  ;;  %v2664_v24 = vmul.f32 %v5725_v12, %v5725_v12 }
 0x2a2   : > { %v2147_v20 = vpop.f32.mrb[29].mxu0  ;;  %2752 = vadd.xlane.f32.xlu0 %v2751_v19 }
 0x2a3   : > { %v5730_v21 = vadd.f32 %v3863_v17, %v2145_v15  ;;  %v2754_v35 = vsel %vm2394_vm0, %v2664_v24, 0.0 }
 0x2a4   : > { %2435 = vadd.xlane.f32.xlu1 %v2434_v22  ;;  %v1380_v25 = vpop.f32.mrb[30].mxu1 }
 0x2a5   : > { %v2150_v26 = vpop.f32.mrb[30].mxu0  ;;  %v3865_v28 = vadd.f32 %v5578_v27, %v1380_v25  ;;  %v1382_v29 = vpop.f32.mrb[31].mxu1  ;;  %v2437_v30 = vsel %vm2394_vm0, %v5730_v21, 0.0  ;;  %v2665_v31 = vmul.f32 %v5730_v21, %v5730_v21 }
 0x2a6   : > { %v2152_v33 = vpop.f32.mrb[31].mxu0  ;;  %2438 = vadd.xlane.f32.xlu0 %v2437_v30 }
 0x2a7   : > { %v5741_v34 = vadd.f32 %v3865_v28, %v2150_v26  ;;  %v2757_v42 = vsel %vm2394_vm0, %v2665_v31, 0.0 }
 0x2a8   : > { %2755 = vadd.xlane.f32.xlu1 %v2754_v35  ;;  %v1385_v36 = vpop.f32.mrb[32].mxu1 }
 0x2a9   : > { %v2155_v37 = vpop.f32.mrb[32].mxu0  ;;  %v3867_v40 = vadd.f32 %v5578_v27, %v1385_v36  ;;  %v1387_v41 = vpop.f32.mrb[33].mxu1  ;;  %v2440_v46 = vsel %vm2394_vm0, %v5741_v34, 0.0  ;;  %v2666_v47 = vmul.f32 %v5741_v34, %v5741_v34 }
 0x2aa   : > { %v2157_v44 = vpop.f32.mrb[33].mxu0  ;;  %2758 = vadd.xlane.f32.xlu0 %v2757_v42 }
 0x2ab   : > { %v5746_v45 = vadd.f32 %v3867_v40, %v2155_v37  ;;  %v2760_v58 = vsel %vm2394_vm0, %v2666_v47, 0.0 }
 0x2ac   : > { %2441 = vadd.xlane.f32.xlu1 %v2440_v46  ;;  %v1390_v48 = vpop.f32.mrb[34].mxu1 }
 0x2ad   : > { %v2160_v49 = vpop.f32.mrb[34].mxu0  ;;  %v3869_v51 = vadd.f32 %v5578_v27, %v1390_v48  ;;  %v1392_v0 = vpop.f32.mrb[35].mxu1  ;;  %v2443_v53 = vsel %vm2394_vm0, %v5746_v45, 0.0  ;;  %v2667_v55 = vmul.f32 %v5746_v45, %v5746_v45 }
 0x2ae   : > { %v2162_v56 = vpop.f32.mrb[35].mxu0  ;;  %2444 = vadd.xlane.f32.xlu0 %v2443_v53 }
 0x2af   : > { %v5757_v57 = vadd.f32 %v3869_v51, %v2160_v49  ;;  %v2763_v2 = vsel %vm2394_vm0, %v2667_v55, 0.0 }
 0x2b0   : > { %2761 = vadd.xlane.f32.xlu1 %v2760_v58  ;;  %v1395_v59 = vpop.f32.mrb[36].mxu1 }
 0x2b1   : > { %v2165_v60 = vpop.f32.mrb[36].mxu0  ;;  %v3871_v62 = vadd.f32 %v5578_v27, %v1395_v59  ;;  %v1397_v1 = vpop.f32.mrb[37].mxu1  ;;  %v2446_v6 = vsel %vm2394_vm0, %v5757_v57, 0.0  ;;  %v2668_v7 = vmul.f32 %v5757_v57, %v5757_v57 }
 0x2b2   : > { %v2167_v4 = vpop.f32.mrb[37].mxu0  ;;  %2764 = vadd.xlane.f32.xlu0 %v2763_v2 }
 0x2b3   : > { %v5762_v5 = vadd.f32 %v3871_v62, %v2165_v60  ;;  %v2766_v19 = vsel %vm2394_vm0, %v2668_v7, 0.0 }
 0x2b4   : > { %2447 = vadd.xlane.f32.xlu1 %v2446_v6  ;;  %v1400_v8 = vpop.f32.mrb[38].mxu1 }
 0x2b5   : > { %v2170_v9 = vpop.f32.mrb[38].mxu0  ;;  %v3873_v10 = vadd.f32 %v5578_v27, %v1400_v8  ;;  %v1402_v13 = vpop.f32.mrb[39].mxu1  ;;  %v2449_v14 = vsel %vm2394_vm0, %v5762_v5, 0.0  ;;  %v2669_v15 = vmul.f32 %v5762_v5, %v5762_v5 }
 0x2b6   : > { %v2172_v17 = vpop.f32.mrb[39].mxu0  ;;  %2450 = vadd.xlane.f32.xlu0 %v2449_v14 }
 0x2b7   : > { %v5773_v18 = vadd.f32 %v3873_v10, %v2170_v9  ;;  %v2769_v26 = vsel %vm2394_vm0, %v2669_v15, 0.0 }
 0x2b8   : > { %2767 = vadd.xlane.f32.xlu1 %v2766_v19  ;;  %v1405_v20 = vpop.f32.mrb[40].mxu1 }
 0x2b9   : > { %v2175_v22 = vpop.f32.mrb[40].mxu0  ;;  %v3875_v24 = vadd.f32 %v5578_v27, %v1405_v20  ;;  %v1407_v25 = vpop.f32.mrb[41].mxu1  ;;  %v2452_v30 = vsel %vm2394_vm0, %v5773_v18, 0.0  ;;  %v2670_v31 = vmul.f32 %v5773_v18, %v5773_v18 }
 0x2ba   : > { %v2177_v28 = vpop.f32.mrb[41].mxu0  ;;  %2770 = vadd.xlane.f32.xlu0 %v2769_v26 }
 0x2bb   : > { %v5778_v29 = vadd.f32 %v3875_v24, %v2175_v22  ;;  %v2772_v46 = vsel %vm2394_vm0, %v2670_v31, 0.0 }
 0x2bc   : > { %2453 = vadd.xlane.f32.xlu1 %v2452_v30  ;;  %v1410_v33 = vpop.f32.mrb[42].mxu1 }
 0x2bd   : > { %v2180_v35 = vpop.f32.mrb[42].mxu0  ;;  %v3877_v36 = vadd.f32 %v5578_v27, %v1410_v33  ;;  %v1412_v37 = vpop.f32.mrb[43].mxu1  ;;  %v2455_v40 = vsel %vm2394_vm0, %v5778_v29, 0.0  ;;  %v2671_v41 = vmul.f32 %v5778_v29, %v5778_v29 }
 0x2be   : > { %v2182_v42 = vpop.f32.mrb[43].mxu0  ;;  %2456 = vadd.xlane.f32.xlu0 %v2455_v40 }
 0x2bf   : > { %v5789_v44 = vadd.f32 %v3877_v36, %v2180_v35  ;;  %v2775_v0 = vsel %vm2394_vm0, %v2671_v41, 0.0 }
 0x2c0   : > { %2773 = vadd.xlane.f32.xlu1 %v2772_v46  ;;  %v1415_v47 = vpop.f32.mrb[44].mxu1 }
 0x2c1   : > { %v2185_v48 = vpop.f32.mrb[44].mxu0  ;;  %v3879_v49 = vadd.f32 %v5578_v27, %v1415_v47  ;;  %v1417_v51 = vpop.f32.mrb[45].mxu1  ;;  %v2458_v56 = vsel %vm2394_vm0, %v5789_v44, 0.0  ;;  %v2672_v58 = vmul.f32 %v5789_v44, %v5789_v44 }
 0x2c2   : > { %v2187_v53 = vpop.f32.mrb[45].mxu0  ;;  %2776 = vadd.xlane.f32.xlu0 %v2775_v0 }
 0x2c3   : > { %v5794_v55 = vadd.f32 %v3879_v49, %v2185_v48  ;;  %v2778_v8 = vsel %vm2394_vm0, %v2672_v58, 0.0 }
 0x2c4   : > { %2459 = vadd.xlane.f32.xlu1 %v2458_v56  ;;  %v1420_v59 = vpop.f32.mrb[46].mxu1 }
 0x2c5   : > { %v2190_v60 = vpop.f32.mrb[46].mxu0  ;;  %v3881_v62 = vadd.f32 %v5578_v27, %v1420_v59  ;;  %v1422_v1 = vpop.f32.mrb[47].mxu1  ;;  %v2461_v2 = vsel %vm2394_vm0, %v5794_v55, 0.0  ;;  %v2673_v4 = vmul.f32 %v5794_v55, %v5794_v55 }
 0x2c6   : > { %v2192_v6 = vpop.f32.mrb[47].mxu0  ;;  %2462 = vadd.xlane.f32.xlu0 %v2461_v2 }
 0x2c7   : > { %v5805_v7 = vadd.f32 %v3881_v62, %v2190_v60  ;;  %v2781_v15 = vsel %vm2394_vm0, %v2673_v4, 0.0 }
 0x2c8   : > { %2779 = vadd.xlane.f32.xlu1 %v2778_v8  ;;  %v1425_v9 = vpop.f32.mrb[48].mxu1 }
 0x2c9   : > { %v2195_v10 = vpop.f32.mrb[48].mxu0  ;;  %v3883_v13 = vadd.f32 %v5578_v27, %v1425_v9  ;;  %v1427_v14 = vpop.f32.mrb[49].mxu1  ;;  %v2464_v20 = vsel %vm2394_vm0, %v5805_v7, 0.0  ;;  %v2674_v22 = vmul.f32 %v5805_v7, %v5805_v7 }
 0x2ca   : > { %v2197_v17 = vpop.f32.mrb[49].mxu0  ;;  %2782 = vadd.xlane.f32.xlu0 %v2781_v15 }
 0x2cb   : > { %v5810_v19 = vadd.f32 %v3883_v13, %v2195_v10  ;;  %v2784_v36 = vsel %vm2394_vm0, %v2674_v22, 0.0 }
 0x2cc   : > { %2465 = vadd.xlane.f32.xlu1 %v2464_v20  ;;  %v1430_v24 = vpop.f32.mrb[50].mxu1 }
 0x2cd   : > { %v2200_v25 = vpop.f32.mrb[50].mxu0  ;;  %v3885_v26 = vadd.f32 %v5578_v27, %v1430_v24  ;;  %v1432_v28 = vpop.f32.mrb[51].mxu1  ;;  %v2467_v30 = vsel %vm2394_vm0, %v5810_v19, 0.0  ;;  %v2675_v31 = vmul.f32 %v5810_v19, %v5810_v19 }
 0x2ce   : > { %v2202_v33 = vpop.f32.mrb[51].mxu0  ;;  %2468 = vadd.xlane.f32.xlu0 %v2467_v30 }
 0x2cf   : > { %v5821_v35 = vadd.f32 %v3885_v26, %v2200_v25  ;;  %v2787_v46 = vsel %vm2394_vm0, %v2675_v31, 0.0 }
 0x2d0   : > { %2785 = vadd.xlane.f32.xlu1 %v2784_v36  ;;  %v1435_v37 = vpop.f32.mrb[52].mxu1 }
 0x2d1   : > { %v2205_v40 = vpop.f32.mrb[52].mxu0  ;;  %v3887_v41 = vadd.f32 %v5578_v27, %v1435_v37  ;;  %v1437_v42 = vpop.f32.mrb[53].mxu1  ;;  %v2470_v49 = vsel %vm2394_vm0, %v5821_v35, 0.0  ;;  %v2676_v51 = vmul.f32 %v5821_v35, %v5821_v35 }
 0x2d2   : > { %v2207_v47 = vpop.f32.mrb[53].mxu0  ;;  %2788 = vadd.xlane.f32.xlu0 %v2787_v46 }
 0x2d3   : > { %v5826_v48 = vadd.f32 %v3887_v41, %v2205_v40  ;;  %v2790_v2 = vsel %vm2394_vm0, %v2676_v51, 0.0 }
 0x2d4   : > { %2471 = vadd.xlane.f32.xlu1 %v2470_v49  ;;  %v1440_v0 = vpop.f32.mrb[54].mxu1 }
 0x2d5   : > { %v2210_v53 = vpop.f32.mrb[54].mxu0  ;;  %v3889_v56 = vadd.f32 %v5578_v27, %v1440_v0  ;;  %v1442_v58 = vpop.f32.mrb[55].mxu1  ;;  %v2473_v59 = vsel %vm2394_vm0, %v5826_v48, 0.0  ;;  %v2677_v60 = vmul.f32 %v5826_v48, %v5826_v48 }
 0x2d6   : > { %v2212_v62 = vpop.f32.mrb[55].mxu0  ;;  %2474 = vadd.xlane.f32.xlu0 %v2473_v59 }
 0x2d7   : > { %v5837_v1 = vadd.f32 %v3889_v56, %v2210_v53  ;;  %v2793_v10 = vsel %vm2394_vm0, %v2677_v60, 0.0 }
 0x2d8   : > { %2791 = vadd.xlane.f32.xlu1 %v2790_v2  ;;  %v1445_v4 = vpop.f32.mrb[56].mxu1 }
 0x2d9   : > { %v2215_v6 = vpop.f32.mrb[56].mxu0  ;;  %v3891_v8 = vadd.f32 %v5578_v27, %v1445_v4  ;;  %v1447_v9 = vpop.f32.mrb[57].mxu1  ;;  %v2476_v15 = vsel %vm2394_vm0, %v5837_v1, 0.0  ;;  %v2678_v17 = vmul.f32 %v5837_v1, %v5837_v1 }
 0x2da   : > { %v2217_v13 = vpop.f32.mrb[57].mxu0  ;;  %2794 = vadd.xlane.f32.xlu0 %v2793_v10 }
 0x2db   : > { %v5842_v14 = vadd.f32 %v3891_v8, %v2215_v6  ;;  %v2796_v33 = vsel %vm2394_vm0, %v2678_v17, 0.0 }
 0x2dc   : > { %2477 = vadd.xlane.f32.xlu1 %v2476_v15  ;;  %v1450_v20 = vpop.f32.mrb[58].mxu1 }
 0x2dd   : > { %v2220_v22 = vpop.f32.mrb[58].mxu0  ;;  %v3893_v24 = vadd.f32 %v5578_v27, %v1450_v20  ;;  %v1452_v25 = vpop.f32.mrb[59].mxu1  ;;  %v2479_v26 = vsel %vm2394_vm0, %v5842_v14, 0.0  ;;  %v2679_v28 = vmul.f32 %v5842_v14, %v5842_v14 }
 0x2de   : > { %v2222_v30 = vpop.f32.mrb[59].mxu0  ;;  %2480 = vadd.xlane.f32.xlu0 %v2479_v26 }
 0x2df   : > { %v5853_v31 = vadd.f32 %v3893_v24, %v2220_v22  ;;  %v2799_v42 = vsel %vm2394_vm0, %v2679_v28, 0.0 }
 0x2e0   : > { %2797 = vadd.xlane.f32.xlu1 %v2796_v33  ;;  %v1455_v36 = vpop.f32.mrb[60].mxu1 }
 0x2e1   : > { %v2225_v37 = vpop.f32.mrb[60].mxu0  ;;  %v3895_v40 = vadd.f32 %v5578_v27, %v1455_v36  ;;  %v1457_v41 = vpop.f32.mrb[61].mxu1  ;;  %v2482_v49 = vsel %vm2394_vm0, %v5853_v31, 0.0  ;;  %v2680_v51 = vmul.f32 %v5853_v31, %v5853_v31 }
 0x2e2   : > { %v2227_v46 = vpop.f32.mrb[61].mxu0  ;;  %2800 = vadd.xlane.f32.xlu0 %v2799_v42 }
 0x2e3   : > { %v5858_v47 = vadd.f32 %v3895_v40, %v2225_v37  ;;  %v2802_v4 = vsel %vm2394_vm0, %v2680_v51, 0.0 }
 0x2e4   : > { %2483 = vadd.xlane.f32.xlu1 %v2482_v49  ;;  %v1460_v0 = vpop.f32.mrb[62].mxu1 }
 0x2e5   : > { %v2230_v53 = vpop.f32.mrb[62].mxu0  ;;  %v3897_v56 = vadd.f32 %v5578_v27, %v1460_v0  ;;  %v1462_v58 = vpop.f32.mrb[63].mxu1  ;;  %v2485_v59 = vsel %vm2394_vm0, %v5858_v47, 0.0  ;;  %v2681_v60 = vmul.f32 %v5858_v47, %v5858_v47 }
 0x2e6   : > { %v2232_v62 = vpop.f32.mrb[63].mxu0  ;;  %2486 = vadd.xlane.f32.xlu0 %v2485_v59 }
 0x2e7   : > { %v5869_v2 = vadd.f32 %v3897_v56, %v2230_v53  ;;  %v2805_v13 = vsel %vm2394_vm0, %v2681_v60, 0.0 }
 0x2e8   : > { %2803 = vadd.xlane.f32.xlu1 %v2802_v4  ;;  %v1465_v6 = vpop.f32.mrb[64].mxu1 }
 0x2e9   : > { %v2235_v8 = vpop.f32.mrb[64].mxu0  ;;  %v3899_v9 = vadd.f32 %v5578_v27, %v1465_v6  ;;  %v1467_v10 = vpop.f32.mrb[65].mxu1  ;;  %v2488_v20 = vsel %vm2394_vm0, %v5869_v2, 0.0  ;;  %v2682_v22 = vmul.f32 %v5869_v2, %v5869_v2 }
 0x2ea   : > { %v2237_v15 = vpop.f32.mrb[65].mxu0  ;;  %2806 = vadd.xlane.f32.xlu0 %v2805_v13 }
 0x2eb   : > { %v5874_v17 = vadd.f32 %v3899_v9, %v2235_v8  ;;  %v2808_v40 = vsel %vm2394_vm0, %v2682_v22, 0.0 }
 0x2ec   : > { %2489 = vadd.xlane.f32.xlu1 %v2488_v20  ;;  %v1470_v24 = vpop.f32.mrb[66].mxu1 }
 0x2ed   : > { %v2240_v25 = vpop.f32.mrb[66].mxu0  ;;  %v3901_v26 = vadd.f32 %v5578_v27, %v1470_v24  ;;  %v1472_v28 = vpop.f32.mrb[67].mxu1  ;;  %v2491_v30 = vsel %vm2394_vm0, %v5874_v17, 0.0  ;;  %v2683_v33 = vmul.f32 %v5874_v17, %v5874_v17 }
 0x2ee   : > { %v2242_v36 = vpop.f32.mrb[67].mxu0  ;;  %2492 = vadd.xlane.f32.xlu0 %v2491_v30 }
 0x2ef   : > { %v5885_v37 = vadd.f32 %v3901_v26, %v2240_v25  ;;  %v2811_v51 = vsel %vm2394_vm0, %v2683_v33, 0.0 }
 0x2f0   : > { %2809 = vadd.xlane.f32.xlu1 %v2808_v40  ;;  %v1475_v41 = vpop.f32.mrb[68].mxu1 }
 0x2f1   : > { %v2245_v42 = vpop.f32.mrb[68].mxu0  ;;  %v3903_v46 = vadd.f32 %v5578_v27, %v1475_v41  ;;  %v1477_v49 = vpop.f32.mrb[69].mxu1  ;;  %v2494_v56 = vsel %vm2394_vm0, %v5885_v37, 0.0  ;;  %v2684_v58 = vmul.f32 %v5885_v37, %v5885_v37 }
 0x2f2   : > { %v2247_v0 = vpop.f32.mrb[69].mxu0  ;;  %2812 = vadd.xlane.f32.xlu0 %v2811_v51 }
 0x2f3   : > { %v5890_v53 = vadd.f32 %v3903_v46, %v2245_v42  ;;  %v2814_v13 = vsel %vm2394_vm0, %v2684_v58, 0.0 }
 0x2f4   : > { %2495 = vadd.xlane.f32.xlu1 %v2494_v56  ;;  %v1480_v59 = vpop.f32.mrb[70].mxu1 }
 0x2f5   : > { %v2250_v60 = vpop.f32.mrb[70].mxu0  ;;  %v3905_v62 = vadd.f32 %v5578_v27, %v1480_v59  ;;  %v1482_v4 = vpop.f32.mrb[71].mxu1  ;;  %v2497_v6 = vsel %vm2394_vm0, %v5890_v53, 0.0  ;;  %v2685_v8 = vmul.f32 %v5890_v53, %v5890_v53 }
 0x2f6   : > { %v2252_v9 = vpop.f32.mrb[71].mxu0  ;;  %2498 = vadd.xlane.f32.xlu0 %v2497_v6 }
 0x2f7   : > { %v5901_v10 = vadd.f32 %v3905_v62, %v2250_v60  ;;  %v2817_v25 = vsel %vm2394_vm0, %v2685_v8, 0.0 }
 0x2f8   : > { %2815 = vadd.xlane.f32.xlu1 %v2814_v13  ;;  %v1485_v15 = vpop.f32.mrb[72].mxu1 }
 0x2f9   : > { %v2255_v20 = vpop.f32.mrb[72].mxu0  ;;  %v3907_v22 = vadd.f32 %v5578_v27, %v1485_v15  ;;  %v1487_v24 = vpop.f32.mrb[73].mxu1  ;;  %v2500_v33 = vsel %vm2394_vm0, %v5901_v10, 0.0  ;;  %v2686_v36 = vmul.f32 %v5901_v10, %v5901_v10 }
 0x2fa   : > { %v2257_v26 = vpop.f32.mrb[73].mxu0  ;;  %2818 = vadd.xlane.f32.xlu0 %v2817_v25 }
 0x2fb   : > { %v5906_v28 = vadd.f32 %v3907_v22, %v2255_v20  ;;  %v2397_v30 = vpop.xlane.xlu0 %2396  ;;  %v2820_v60 = vsel %vm2394_vm0, %v2686_v36, 0.0 }
 0x2fc   : > { %v5912_v40 = vmul.f32 0.1, %v2397_v30  ;;  %2501 = vadd.xlane.f32.xlu1 %v2500_v33  ;;  %v1490_v41 = vpop.f32.mrb[74].mxu1 }
 0x2fd   : > { %v2260_v42 = vpop.f32.mrb[74].mxu0  ;;  %v3909_v46 = vadd.f32 %v5578_v27, %v1490_v41  ;;  %v1492_v49 = vpop.f32.mrb[75].mxu1  ;;  %v2503_v51 = vsel %vm2394_vm0, %v5906_v28, 0.0  ;;  %v2687_v0 = vmul.f32 %v5906_v28, %v5906_v28 }
 0x2fe   : > { %v2262_v56 = vpop.f32.mrb[75].mxu0  ;;  %2504 = vadd.xlane.f32.xlu0 %v2503_v51  ;;  %v2971_v62 = vmul.f32 %v5912_v40, %v5912_v40  ;;  %v5938_v49 = vld [vmem:[#allocation4] ss:$0 sm:$0xff] }
 0x2ff   : > { %v5919_v58 = vadd.f32 %v3909_v46, %v2260_v42  ;;  %v2717_v59 = vpop.xlane.xlu0 %2716  ;;  %v2823_v15 = vsel %vm2394_vm0, %v2687_v0, 0.0 }
 0x300   : > { %v2907_v4 = vmul.f32 0.1, %v2717_v59  ;;  %2821 = vadd.xlane.f32.xlu1 %v2820_v60  ;;  %v1495_v6 = vpop.f32.mrb[76].mxu1 }
 0x301   : > { %6689 = vst [vmem:[#allocation8_spill] sm:$0xff] %v5919_v58  ;;  %v2265_v8 = vpop.f32.mrb[76].mxu0  ;;  %v3911_v9 = vadd.f32 %v5578_v27, %v1495_v6  ;;  %v2720_v13 = vpop.xlane.xlu1 %2719  ;;  %v2506_v30 = vsel %vm2394_vm0, %v5919_v58, 0.0  ;;  %v2688_v33 = vmul.f32 %v5919_v58, %v5919_v58 }
 0x302   : > { %v3035_v20 = vsub.f32 %v2907_v4, %v2971_v62  ;;  %v2267_v22 = vpop.f32.mrb[77].mxu0  ;;  %v1497_v24 = vpop.f32.mrb[77].mxu1  ;;  %2824 = vadd.xlane.f32.xlu0 %v2823_v15  ;;  %v2908_v42 = vmul.f32 0.1, %v2720_v13 }
 0x303   : > { %v5926_v25 = vadd.f32 %v3911_v9, %v2265_v8  ;;  %v2400_v26 = vpop.xlane.xlu0 %2399  ;;  %v2826_v15 = vsel %vm2394_vm0, %v2688_v33, 0.0 }
 0x304   : > { %v3099_v36 = vmax.f32 %v3035_v20, 0.0  ;;  %v5932_v41 = vmul.f32 0.1, %v2400_v26  ;;  %2507 = vadd.xlane.f32.xlu1 %v2506_v30  ;;  %v1500_v27 = vpop.f32.mrb[78].mxu1 }
 0x305   : > { %6690 = vst [vmem:[#allocation9_spill] sm:$0xff] %v5926_v25  ;;  %v2270_v46 = vpop.f32.mrb[78].mxu0  ;;  %v3913_v51 = vadd.f32 %v5938_v49, %v1500_v27  ;;  %v2403_v0 = vpop.xlane.xlu1 %2402  ;;  %v2509_v56 = vsel %vm2394_vm0, %v5926_v25, 0.0  ;;  %v2689_v59 = vmul.f32 %v5926_v25, %v5926_v25  ;;  %v3163_v25 = vsub.f32 %v5586_v38, %v5912_v40 }
 0x306   : > { %v3227_v60 = vadd.f32 1e-05, %v3099_v36  ;;  %v2972_v62 = vmul.f32 %v5932_v41, %v5932_v41  ;;  %v2272_v4 = vpop.f32.mrb[79].mxu0  ;;  %v5947_v6 = vmul.f32 0.1, %v2403_v0  ;;  %v1502_v8 = vpop.f32.mrb[79].mxu1  ;;  %2510 = vadd.xlane.f32.xlu0 %v2509_v56 }
 0x307   : > { %v5949_v9 = vadd.f32 %v3913_v51, %v2270_v46  ;;  %v2723_v13 = vpop.xlane.xlu0 %2722  ;;  %v2829_v46 = vsel %vm2394_vm0, %v2689_v59, 0.0 }
 0x308   : > { %4272 = vrsqrt.f32 %v3227_v60  ;;  %v3036_v20 = vsub.f32 %v2908_v42, %v2972_v62  ;;  %v2973_v22 = vmul.f32 %v5947_v6, %v5947_v6  ;;  %2827 = vadd.xlane.f32.xlu1 %v2826_v15  ;;  %v1505_v24 = vpop.f32.mrb[80].mxu1  ;;  %v2909_v26 = vmul.f32 0.1, %v2723_v13 }
 0x309   : > { %6691 = vst [vmem:[#allocation10_spill] sm:$0xff] %v5949_v9  ;;  %v2275_v30 = vpop.f32.mrb[80].mxu0  ;;  %v3915_v36 = vadd.f32 %v5938_v49, %v1505_v24  ;;  %v2406_v27 = vpop.xlane.xlu1 %2405  ;;  %v2512_v4 = vsel %vm2394_vm0, %v5949_v9, 0.0  ;;  %v2690_v8 = vmul.f32 %v5949_v9, %v5949_v9 }
 0x30a   : > { %v3100_v51 = vmax.f32 %v3036_v20, 0.0  ;;  %v2277_v0 = vpop.f32.mrb[81].mxu0  ;;  %v5957_v33 = vmul.f32 0.1, %v2406_v27  ;;  %v1507_v42 = vpop.f32.mrb[81].mxu1  ;;  %2830 = vadd.xlane.f32.xlu0 %v2829_v46  ;;  %v3037_v56 = vsub.f32 %v2909_v26, %v2973_v22 }
 0x30b   : > { %v5959_v60 = vadd.f32 %v3915_v36, %v2275_v30  ;;  %v2409_v62 = vpop.xlane.xlu0 %2408 }
 0x30c   : > { %v3228_v13 = vadd.f32 1e-05, %v3100_v51  ;;  %v5965_v15 = vmul.f32 0.1, %v2409_v62  ;;  %2513 = vadd.xlane.f32.xlu1 %v2512_v4  ;;  %v1510_v59 = vpop.f32.mrb[82].mxu1  ;;  %v3101_v20 = vmax.f32 %v3037_v56, 0.0  ;;  %v2974_v27 = vmul.f32 %v5957_v33, %v5957_v33 }
 0x30d   : > { %6692 = vst [vmem:[#allocation11_spill] sm:$0xff] %v5959_v60  ;;  %v2280_v24 = vpop.f32.mrb[82].mxu0  ;;  %v3917_v22 = vadd.f32 %v5938_v49, %v1510_v59  ;;  %v2726_v26 = vpop.xlane.xlu1 %2725  ;;  %v2515_v30 = vsel %vm2394_vm0, %v5959_v60, 0.0  ;;  %v2691_v36 = vmul.f32 %v5959_v60, %v5959_v60  ;;  %v2832_v4 = vsel %vm2394_vm0, %v2690_v8, 0.0 }
 0x30e   : > { %4274 = vrsqrt.f32 %v3228_v13  ;;  %v2282_v46 = vpop.f32.mrb[83].mxu0  ;;  %v2910_v51 = vmul.f32 0.1, %v2726_v26  ;;  %v1512_v0 = vpop.f32.mrb[83].mxu1  ;;  %2516 = vadd.xlane.f32.xlu0 %v2515_v30  ;;  %v3229_v42 = vadd.f32 1e-05, %v3101_v20  ;;  %v2975_v59 = vmul.f32 %v5965_v15, %v5965_v15 }
 0x30f   : > { %v5979_v56 = vadd.f32 %v3917_v22, %v2280_v24  ;;  %v2729_v62 = vpop.xlane.xlu0 %2728  ;;  %v2835_v22 = vsel %vm2394_vm0, %v2691_v36, 0.0 }
 0x310   : > { %v3038_v9 = vsub.f32 %v2910_v51, %v2974_v27  ;;  %v2911_v60 = vmul.f32 0.1, %v2729_v62  ;;  %2833 = vadd.xlane.f32.xlu1 %v2832_v4  ;;  %v1515_v13 = vpop.f32.mrb[84].mxu1  ;;  %4276 = vrsqrt.f32 %v3229_v42 }
 0x311   : > { %v2285_v26 = vpop.f32.mrb[84].mxu0  ;;  %v3919_v20 = vadd.f32 %v5938_v49, %v1515_v13  ;;  %v2412_v24 = vpop.xlane.xlu1 %2411  ;;  %v2518_v40 = vsel %vm2394_vm0, %v5979_v56, 0.0  ;;  %v2692_v42 = vmul.f32 %v5979_v56, %v5979_v56 }
 0x312   : > { %v4273_v30 = vpop.eup %4272  ;;  %v3102_v8 = vmax.f32 %v3038_v9, 0.0  ;;  %v3039_v46 = vsub.f32 %v2911_v60, %v2975_v59  ;;  %v2287_v0 = vpop.f32.mrb[85].mxu0  ;;  %v5989_v58 = vmul.f32 0.1, %v2412_v24  ;;  %2836 = vadd.xlane.f32.xlu0 %v2835_v22 }
 0x313   : > { %v1517_v27 = vpop.f32.mrb[85].mxu1  ;;  %v3355_v51 = vmul.f32 %v4273_v30, %v3163_v25  ;;  %v5991_v62 = vadd.f32 %v3919_v20, %v2285_v26  ;;  %v2415_v38 = vpop.xlane.xlu0 %2414 }
 0x314   : > { %v3230_v9 = vadd.f32 1e-05, %v3102_v8  ;;  %v3103_v60 = vmax.f32 %v3039_v46, 0.0  ;;  %v2976_v36 = vmul.f32 %v5989_v58, %v5989_v58  ;;  %2519 = vadd.xlane.f32.xlu1 %v2518_v40  ;;  %v1520_v25 = vpop.f32.mrb[86].mxu1  ;;  %v6004_v59 = vmul.f32 0.1, %v2415_v38 }
 0x315   : > { %6693 = vst [vmem:[#allocation12_spill] sm:$0xff] %v5991_v62  ;;  %v3419_v4 = vmax.f32 %v3355_v51, 0.0  ;;  %v2290_v13 = vpop.f32.mrb[86].mxu0  ;;  %v3921_v26 = vadd.f32 %v5938_v49, %v1520_v25  ;;  %v2732_v20 = vpop.xlane.xlu1 %2731  ;;  %v2521_v24 = vsel %vm2394_vm0, %v5991_v62, 0.0  ;;  %v2693_v0 = vmul.f32 %v5991_v62, %v5991_v62 }
 0x316   : > { %4278 = vrsqrt.f32 %v3230_v9  ;;  %v3231_v22 = vadd.f32 1e-05, %v3103_v60  ;;  %v2292_v30 = vpop.f32.mrb[87].mxu0  ;;  %v2912_v8 = vmul.f32 0.1, %v2732_v20  ;;  %v1522_v46 = vpop.f32.mrb[87].mxu1  ;;  %2522 = vadd.xlane.f32.xlu0 %v2521_v24  ;;  %v3164_v27 = vsub.f32 %v5597_v50, %v5932_v41 }
 0x317   : > { %3483 = vst.msk [vmem:[%s6000_s4] sm:$0xff] %vm2394_vm0, %v3419_v4  ;;  %v6015_v51 = vadd.f32 %v3921_v26, %v2290_v13  ;;  %v2735_v38 = vpop.xlane.xlu0 %2734  ;;  %v2838_v40 = vsel %vm2394_vm0, %v2692_v42, 0.0  ;;  %v2977_v9 = vmul.f32 %v6004_v59, %v6004_v59  ;;  %v2841_v50 = vsel %vm2394_vm0, %v2693_v0, 0.0 }
 0x318   : > { %v4275_v25 = vpop.eup %4274  ;;  %4280 = vrsqrt.f32 %v3231_v22  ;;  %v3040_v60 = vsub.f32 %v2912_v8, %v2976_v36  ;;  %v2913_v20 = vmul.f32 0.1, %v2735_v38  ;;  %2839 = vadd.xlane.f32.xlu1 %v2838_v40  ;;  %v1525_v24 = vpop.f32.mrb[88].mxu1  ;;  %v3165_v41 = vsub.f32 %v5607_v61, %v5947_v6 }
 0x319   : > { %v3356_v30 = vmul.f32 %v4275_v25, %v3164_v27  ;;  %v2295_v46 = vpop.f32.mrb[88].mxu0  ;;  %v3923_v4 = vadd.f32 %v5938_v49, %v1525_v24  ;;  %v2418_v62 = vpop.xlane.xlu1 %2417  ;;  %v2524_v25 = vsel %vm2394_vm0, %v6015_v51, 0.0  ;;  %v2694_v0 = vmul.f32 %v6015_v51, %v6015_v51 }
 0x31a   : > { %v3104_v42 = vmax.f32 %v3040_v60, 0.0  ;;  %v3041_v13 = vsub.f32 %v2913_v20, %v2977_v9  ;;  %v2297_v26 = vpop.f32.mrb[89].mxu0  ;;  %v6024_v22 = vmul.f32 0.1, %v2418_v62  ;;  %v1527_v36 = vpop.f32.mrb[89].mxu1  ;;  %2842 = vadd.xlane.f32.xlu0 %v2841_v50 }
 0x31b   : > { %v4277_v8 = vpop.eup %4276  ;;  %v3420_v38 = vmax.f32 %v3356_v30, 0.0  ;;  %v6026_v27 = vadd.f32 %v3923_v4, %v2295_v46  ;;  %v2421_v40 = vpop.xlane.xlu0 %2420  ;;  %v3166_v26 = vsub.f32 %v5619_v11, %v5957_v33  ;;  %v3167_v33 = vsub.f32 %v5629_v23, %v5965_v15 }
 0x31c   : > { %v3357_v61 = vmul.f32 %v4277_v8, %v3165_v41  ;;  %v3232_v6 = vadd.f32 1e-05, %v3104_v42  ;;  %v3105_v9 = vmax.f32 %v3041_v13, 0.0  ;;  %2525 = vadd.xlane.f32.xlu1 %v2524_v25  ;;  %v1530_v60 = vpop.f32.mrb[90].mxu1  ;;  %v2978_v62 = vmul.f32 %v6024_v22, %v6024_v22 }
 0x31d   : > { %6694 = vst [vmem:[#allocation13_spill] sm:$0xff] %v6026_v27  ;;  %3484 = vst.msk [vmem:[%s6000_s4 + $0x8] sm:$0xff] %vm2394_vm0, %v3420_v38  ;;  %v6036_v20 = vmul.f32 0.1, %v2421_v40  ;;  %v2300_v24 = vpop.f32.mrb[90].mxu0  ;;  %v3925_v30 = vadd.f32 %v5938_v49, %v1530_v60  ;;  %v2738_v46 = vpop.xlane.xlu1 %2737  ;;  %v2527_v4 = vsel %vm2394_vm0, %v6026_v27, 0.0  ;;  %v2695_v25 = vmul.f32 %v6026_v27, %v6026_v27 }
 0x31e   : > { %v3421_v50 = vmax.f32 %v3357_v61, 0.0  ;;  %4282 = vrsqrt.f32 %v3232_v6  ;;  %v3233_v41 = vadd.f32 1e-05, %v3105_v9  ;;  %v2302_v42 = vpop.f32.mrb[91].mxu0  ;;  %v2914_v13 = vmul.f32 0.1, %v2738_v46  ;;  %2528 = vadd.xlane.f32.xlu0 %v2527_v4 }
 0x31f   : > { %v6043_v36 = vadd.f32 %v3925_v30, %v2300_v24  ;;  %v1532_v8 = vpop.f32.mrb[91].mxu1  ;;  %v2741_v38 = vpop.xlane.xlu0 %2740  ;;  %v2844_v40 = vsel %vm2394_vm0, %v2694_v0, 0.0  ;;  %v2979_v61 = vmul.f32 %v6036_v20, %v6036_v20  ;;  %v2847_v4 = vsel %vm2394_vm0, %v2695_v25, 0.0 }
 0x320   : > { %v4279_v60 = vpop.eup %4278  ;;  %3485 = vst.msk [vmem:[%s6000_s4 + $0x10] sm:$0xff] %vm2394_vm0, %v3421_v50  ;;  %4284 = vrsqrt.f32 %v3233_v41  ;;  %v3042_v6 = vsub.f32 %v2914_v13, %v2978_v62  ;;  %v2915_v9 = vmul.f32 0.1, %v2741_v38  ;;  %2845 = vadd.xlane.f32.xlu1 %v2844_v40  ;;  %v1535_v11 = vpop.f32.mrb[92].mxu1 }
 0x321   : > { %v3358_v24 = vmul.f32 %v4279_v60, %v3166_v26  ;;  %v2305_v30 = vpop.f32.mrb[92].mxu0  ;;  %v3927_v0 = vadd.f32 %v5938_v49, %v1535_v11  ;;  %v2424_v46 = vpop.xlane.xlu1 %2423  ;;  %v2530_v13 = vsel %vm2394_vm0, %v6043_v36, 0.0  ;;  %v2696_v40 = vmul.f32 %v6043_v36, %v6043_v36 }
 0x322   : > { %v4281_v42 = vpop.eup %4280  ;;  %v3106_v50 = vmax.f32 %v3042_v6, 0.0  ;;  %v3043_v41 = vsub.f32 %v2915_v9, %v2979_v61  ;;  %v2307_v8 = vpop.f32.mrb[93].mxu0  ;;  %v6056_v27 = vmul.f32 0.1, %v2424_v46  ;;  %2848 = vadd.xlane.f32.xlu0 %v2847_v4 }
 0x323   : > { %v1537_v62 = vpop.f32.mrb[93].mxu1  ;;  %v3422_v23 = vmax.f32 %v3358_v24, 0.0  ;;  %v3359_v15 = vmul.f32 %v4281_v42, %v3167_v33  ;;  %v6060_v26 = vadd.f32 %v3927_v0, %v2305_v30  ;;  %v2427_v38 = vpop.xlane.xlu0 %2426  ;;  %v3168_v8 = vsub.f32 %v5644_v39, %v5989_v58 }
 0x324   : > { %v3234_v25 = vadd.f32 1e-05, %v3106_v50  ;;  %v3107_v60 = vmax.f32 %v3043_v41, 0.0  ;;  %v2980_v61 = vmul.f32 %v6056_v27, %v6056_v27  ;;  %2531 = vadd.xlane.f32.xlu1 %v2530_v13  ;;  %v1540_v6 = vpop.f32.mrb[94].mxu1  ;;  %v6068_v11 = vmul.f32 0.1, %v2427_v38 }
 0x325   : > { %3486 = vst.msk [vmem:[%s6000_s4 + $0x18] sm:$0xff] %vm2394_vm0, %v3422_v23  ;;  %v3423_v9 = vmax.f32 %v3359_v15, 0.0  ;;  %v2310_v33 = vpop.f32.mrb[94].mxu0  ;;  %v3929_v24 = vadd.f32 %v5938_v49, %v1540_v6  ;;  %v2744_v30 = vpop.xlane.xlu1 %2743  ;;  %v2533_v0 = vsel %vm2394_vm0, %v6060_v26, 0.0  ;;  %v2697_v41 = vmul.f32 %v6060_v26, %v6060_v26 }
 0x326   : > { %4286 = vrsqrt.f32 %v3234_v25  ;;  %v3235_v46 = vadd.f32 1e-05, %v3107_v60  ;;  %v2312_v4 = vpop.f32.mrb[95].mxu0  ;;  %v2916_v42 = vmul.f32 0.1, %v2744_v30  ;;  %v1542_v50 = vpop.f32.mrb[95].mxu1  ;;  %2534 = vadd.xlane.f32.xlu0 %v2533_v0  ;;  %v2981_v38 = vmul.f32 %v6068_v11, %v6068_v11 }
 0x327   : > { %3487 = vst.msk [vmem:[%s6000_s4 + $0x20] sm:$0xff] %vm2394_vm0, %v3423_v9  ;;  %v6079_v62 = vadd.f32 %v3929_v24, %v2310_v33  ;;  %v2747_v13 = vpop.xlane.xlu0 %2746  ;;  %v2850_v23 = vsel %vm2394_vm0, %v2696_v40, 0.0  ;;  %v3169_v9 = vsub.f32 %v5653_v52, %v6004_v59  ;;  %v2853_v33 = vsel %vm2394_vm0, %v2697_v41, 0.0 }
 0x328   : > { %v4283_v15 = vpop.eup %4282  ;;  %4288 = vrsqrt.f32 %v3235_v46  ;;  %v3044_v25 = vsub.f32 %v2916_v42, %v2980_v61  ;;  %v2917_v60 = vmul.f32 0.1, %v2747_v13  ;;  %2851 = vadd.xlane.f32.xlu1 %v2850_v23  ;;  %v1545_v6 = vpop.f32.mrb[96].mxu1 }
 0x329   : > { %v3360_v30 = vmul.f32 %v4283_v15, %v3168_v8  ;;  %v2315_v0 = vpop.f32.mrb[96].mxu0  ;;  %v3931_v39 = vadd.f32 %v5938_v49, %v1545_v6  ;;  %v2430_v58 = vpop.xlane.xlu1 %2429  ;;  %v2536_v42 = vsel %vm2394_vm0, %v6079_v62, 0.0  ;;  %v2698_v41 = vmul.f32 %v6079_v62, %v6079_v62 }
 0x32a   : > { %v4285_v40 = vpop.eup %4284  ;;  %v3108_v24 = vmax.f32 %v3044_v25, 0.0  ;;  %v3045_v46 = vsub.f32 %v2917_v60, %v2981_v38  ;;  %v2317_v4 = vpop.f32.mrb[97].mxu0  ;;  %v6088_v50 = vmul.f32 0.1, %v2430_v58  ;;  %2854 = vadd.xlane.f32.xlu0 %v2853_v33 }
 0x32b   : > { %v1547_v61 = vpop.f32.mrb[97].mxu1  ;;  %v3424_v52 = vmax.f32 %v3360_v30, 0.0  ;;  %v3361_v59 = vmul.f32 %v4285_v40, %v3169_v9  ;;  %v6092_v8 = vadd.f32 %v3931_v39, %v2315_v0  ;;  %v2433_v13 = vpop.xlane.xlu0 %2432  ;;  %v3170_v4 = vsub.f32 %v5668_v3, %v6024_v22 }
 0x32c   : > { %v3236_v23 = vadd.f32 1e-05, %v3108_v24  ;;  %v3109_v15 = vmax.f32 %v3045_v46, 0.0  ;;  %v2982_v38 = vmul.f32 %v6088_v50, %v6088_v50  ;;  %2537 = vadd.xlane.f32.xlu1 %v2536_v42  ;;  %v1550_v25 = vpop.f32.mrb[98].mxu1  ;;  %v6100_v6 = vmul.f32 0.1, %v2433_v13 }
 0x32d   : > { %3488 = vst.msk [vmem:[%s6000_s4 + $0x28] sm:$0xff] %vm2394_vm0, %v3424_v52  ;;  %v3425_v60 = vmax.f32 %v3361_v59, 0.0  ;;  %v2320_v9 = vpop.f32.mrb[98].mxu0  ;;  %v3933_v30 = vadd.f32 %v5938_v49, %v1550_v25  ;;  %v2750_v0 = vpop.xlane.xlu1 %2749  ;;  %v2539_v39 = vsel %vm2394_vm0, %v6092_v8, 0.0  ;;  %v2699_v46 = vmul.f32 %v6092_v8, %v6092_v8 }
 0x32e   : > { %4290 = vrsqrt.f32 %v3236_v23  ;;  %v3237_v58 = vadd.f32 1e-05, %v3109_v15  ;;  %v2322_v33 = vpop.f32.mrb[99].mxu0  ;;  %v2918_v40 = vmul.f32 0.1, %v2750_v0  ;;  %v1552_v24 = vpop.f32.mrb[99].mxu1  ;;  %2540 = vadd.xlane.f32.xlu0 %v2539_v39  ;;  %v2983_v13 = vmul.f32 %v6100_v6, %v6100_v6 }
 0x32f   : > { %3489 = vst.msk [vmem:[%s6000_s4 + $0x30] sm:$0xff] %vm2394_vm0, %v3425_v60  ;;  %v6111_v61 = vadd.f32 %v3933_v30, %v2320_v9  ;;  %v2753_v42 = vpop.xlane.xlu0 %2752  ;;  %v2856_v52 = vsel %vm2394_vm0, %v2698_v41, 0.0  ;;  %v3171_v60 = vsub.f32 %v5677_v16, %v6036_v20  ;;  %v2859_v9 = vsel %vm2394_vm0, %v2699_v46, 0.0 }
 0x330   : > { %v4287_v59 = vpop.eup %4286  ;;  %4292 = vrsqrt.f32 %v3237_v58  ;;  %v3046_v23 = vsub.f32 %v2918_v40, %v2982_v38  ;;  %v2919_v15 = vmul.f32 0.1, %v2753_v42  ;;  %2857 = vadd.xlane.f32.xlu1 %v2856_v52  ;;  %v1555_v25 = vpop.f32.mrb[100].mxu1 }
 0x331   : > { %v3362_v0 = vmul.f32 %v4287_v59, %v3170_v4  ;;  %v2325_v39 = vpop.f32.mrb[100].mxu0  ;;  %v3935_v3 = vadd.f32 %v5938_v49, %v1555_v25  ;;  %v2436_v22 = vpop.xlane.xlu1 %2435  ;;  %v2542_v40 = vsel %vm2394_vm0, %v6111_v61, 0.0  ;;  %v2700_v46 = vmul.f32 %v6111_v61, %v6111_v61 }
 0x332   : > { %v4289_v41 = vpop.eup %4288  ;;  %v3110_v30 = vmax.f32 %v3046_v23, 0.0  ;;  %v3047_v58 = vsub.f32 %v2919_v15, %v2983_v13  ;;  %v2327_v33 = vpop.f32.mrb[101].mxu0  ;;  %v6120_v24 = vmul.f32 0.1, %v2436_v22  ;;  %2860 = vadd.xlane.f32.xlu0 %v2859_v9 }
 0x333   : > { %v1557_v38 = vpop.f32.mrb[101].mxu1  ;;  %v3426_v16 = vmax.f32 %v3362_v0, 0.0  ;;  %v3363_v20 = vmul.f32 %v4289_v41, %v3171_v60  ;;  %v6124_v4 = vadd.f32 %v3935_v3, %v2325_v39  ;;  %v2439_v42 = vpop.xlane.xlu0 %2438  ;;  %v3172_v33 = vsub.f32 %v5692_v32, %v6056_v27 }
 0x334   : > { %v3238_v52 = vadd.f32 1e-05, %v3110_v30  ;;  %v3111_v59 = vmax.f32 %v3047_v58, 0.0  ;;  %v2984_v13 = vmul.f32 %v6120_v24, %v6120_v24  ;;  %2543 = vadd.xlane.f32.xlu1 %v2542_v40  ;;  %v1560_v23 = vpop.f32.mrb[102].mxu1  ;;  %v6132_v25 = vmul.f32 0.1, %v2439_v42 }
 0x335   : > { %3490 = vst.msk [vmem:[%s6000_s4 + $0x38] sm:$0xff] %vm2394_vm0, %v3426_v16  ;;  %v3427_v15 = vmax.f32 %v3363_v20, 0.0  ;;  %v2330_v60 = vpop.f32.mrb[102].mxu0  ;;  %v3937_v0 = vadd.f32 %v5938_v49, %v1560_v23  ;;  %v2756_v39 = vpop.xlane.xlu1 %2755  ;;  %v2545_v3 = vsel %vm2394_vm0, %v6124_v4, 0.0  ;;  %v2701_v58 = vmul.f32 %v6124_v4, %v6124_v4 }
 0x336   : > { %4294 = vrsqrt.f32 %v3238_v52  ;;  %v3239_v22 = vadd.f32 1e-05, %v3111_v59  ;;  %v2332_v9 = vpop.f32.mrb[103].mxu0  ;;  %v2920_v41 = vmul.f32 0.1, %v2756_v39  ;;  %v1562_v30 = vpop.f32.mrb[103].mxu1  ;;  %2546 = vadd.xlane.f32.xlu0 %v2545_v3  ;;  %v2985_v42 = vmul.f32 %v6132_v25, %v6132_v25 }
 0x337   : > { %3491 = vst.msk [vmem:[%s6000_s4 + $0x40] sm:$0xff] %vm2394_vm0, %v3427_v15  ;;  %v6143_v38 = vadd.f32 %v3937_v0, %v2330_v60  ;;  %v2759_v40 = vpop.xlane.xlu0 %2758  ;;  %v2862_v16 = vsel %vm2394_vm0, %v2700_v46, 0.0  ;;  %v3173_v15 = vsub.f32 %v5698_v43, %v6068_v11  ;;  %v2865_v60 = vsel %vm2394_vm0, %v2701_v58, 0.0 }
 0x338   : > { %v4291_v20 = vpop.eup %4290  ;;  %4296 = vrsqrt.f32 %v3239_v22  ;;  %v3048_v52 = vsub.f32 %v2920_v41, %v2984_v13  ;;  %v2921_v59 = vmul.f32 0.1, %v2759_v40  ;;  %2863 = vadd.xlane.f32.xlu1 %v2862_v16  ;;  %v1565_v23 = vpop.f32.mrb[104].mxu1 }
 0x339   : > { %v3364_v39 = vmul.f32 %v4291_v20, %v3172_v33  ;;  %v2335_v3 = vpop.f32.mrb[104].mxu0  ;;  %v3939_v32 = vadd.f32 %v5938_v49, %v1565_v23  ;;  %v2442_v27 = vpop.xlane.xlu1 %2441  ;;  %v2548_v41 = vsel %vm2394_vm0, %v6143_v38, 0.0  ;;  %v2702_v58 = vmul.f32 %v6143_v38, %v6143_v38 }
 0x33a   : > { %v4293_v46 = vpop.eup %4292  ;;  %v3112_v0 = vmax.f32 %v3048_v52, 0.0  ;;  %v3049_v22 = vsub.f32 %v2921_v59, %v2985_v42  ;;  %v2337_v9 = vpop.f32.mrb[105].mxu0  ;;  %v6152_v30 = vmul.f32 0.1, %v2442_v27  ;;  %2866 = vadd.xlane.f32.xlu0 %v2865_v60 }
 0x33b   : > { %v1567_v13 = vpop.f32.mrb[105].mxu1  ;;  %v3428_v43 = vmax.f32 %v3364_v39, 0.0  ;;  %v3365_v11 = vmul.f32 %v4293_v46, %v3173_v15  ;;  %v6156_v33 = vadd.f32 %v3939_v32, %v2335_v3  ;;  %v2445_v40 = vpop.xlane.xlu0 %2444  ;;  %v3174_v9 = vsub.f32 %v5709_v54, %v6088_v50 }
 0x33c   : > { %v3240_v16 = vadd.f32 1e-05, %v3112_v0  ;;  %v3113_v20 = vmax.f32 %v3049_v22, 0.0  ;;  %v2986_v42 = vmul.f32 %v6152_v30, %v6152_v30  ;;  %2549 = vadd.xlane.f32.xlu1 %v2548_v41  ;;  %v1570_v52 = vpop.f32.mrb[106].mxu1  ;;  %v6164_v23 = vmul.f32 0.1, %v2445_v40 }
 0x33d   : > { %3492 = vst.msk [vmem:[%s6000_s4 + $0x48] sm:$0xff] %vm2394_vm0, %v3428_v43  ;;  %v3429_v59 = vmax.f32 %v3365_v11, 0.0  ;;  %v2340_v15 = vpop.f32.mrb[106].mxu0  ;;  %v3941_v39 = vadd.f32 %v5938_v49, %v1570_v52  ;;  %v2762_v3 = vpop.xlane.xlu1 %2761  ;;  %v2551_v32 = vsel %vm2394_vm0, %v6156_v33, 0.0  ;;  %v2703_v22 = vmul.f32 %v6156_v33, %v6156_v33 }
 0x33e   : > { %4298 = vrsqrt.f32 %v3240_v16  ;;  %v3241_v27 = vadd.f32 1e-05, %v3113_v20  ;;  %v2342_v60 = vpop.f32.mrb[107].mxu0  ;;  %v2922_v46 = vmul.f32 0.1, %v2762_v3  ;;  %v1572_v0 = vpop.f32.mrb[107].mxu1  ;;  %2552 = vadd.xlane.f32.xlu0 %v2551_v32  ;;  %v2987_v40 = vmul.f32 %v6164_v23, %v6164_v23 }
 0x33f   : > { %3493 = vst.msk [vmem:[%s6000_s4 + $0x50] sm:$0xff] %vm2394_vm0, %v3429_v59  ;;  %v6175_v13 = vadd.f32 %v3941_v39, %v2340_v15  ;;  %v2765_v41 = vpop.xlane.xlu0 %2764  ;;  %v2868_v43 = vsel %vm2394_vm0, %v2702_v58, 0.0  ;;  %v3175_v59 = vsub.f32 %v5714_v63, %v6100_v6  ;;  %v2871_v15 = vsel %vm2394_vm0, %v2703_v22, 0.0 }
 0x340   : > { %v4295_v11 = vpop.eup %4294  ;;  %4300 = vrsqrt.f32 %v3241_v27  ;;  %v3050_v16 = vsub.f32 %v2922_v46, %v2986_v42  ;;  %v2923_v20 = vmul.f32 0.1, %v2765_v41  ;;  %2869 = vadd.xlane.f32.xlu1 %v2868_v43  ;;  %v1575_v52 = vpop.f32.mrb[108].mxu1 }
 0x341   : > { %v3366_v3 = vmul.f32 %v4295_v11, %v3174_v9  ;;  %v2345_v32 = vpop.f32.mrb[108].mxu0  ;;  %v3943_v54 = vadd.f32 %v5938_v49, %v1575_v52  ;;  %v2448_v50 = vpop.xlane.xlu1 %2447  ;;  %v2554_v46 = vsel %vm2394_vm0, %v6175_v13, 0.0  ;;  %v2704_v22 = vmul.f32 %v6175_v13, %v6175_v13 }
 0x342   : > { %v4297_v58 = vpop.eup %4296  ;;  %v3114_v39 = vmax.f32 %v3050_v16, 0.0  ;;  %v3051_v27 = vsub.f32 %v2923_v20, %v2987_v40  ;;  %v2347_v60 = vpop.f32.mrb[109].mxu0  ;;  %v6184_v0 = vmul.f32 0.1, %v2448_v50  ;;  %2872 = vadd.xlane.f32.xlu0 %v2871_v15 }
 0x343   : > { %v1577_v42 = vpop.f32.mrb[109].mxu1  ;;  %v3430_v63 = vmax.f32 %v3366_v3, 0.0  ;;  %v3367_v6 = vmul.f32 %v4297_v58, %v3175_v59  ;;  %v6188_v9 = vadd.f32 %v3943_v54, %v2345_v32  ;;  %v2451_v41 = vpop.xlane.xlu0 %2450  ;;  %v3176_v60 = vsub.f32 %v5725_v12, %v6120_v24 }
 0x344   : > { %v3242_v43 = vadd.f32 1e-05, %v3114_v39  ;;  %v3115_v11 = vmax.f32 %v3051_v27, 0.0  ;;  %v2988_v40 = vmul.f32 %v6184_v0, %v6184_v0  ;;  %2555 = vadd.xlane.f32.xlu1 %v2554_v46  ;;  %v1580_v16 = vpop.f32.mrb[110].mxu1  ;;  %v6196_v52 = vmul.f32 0.1, %v2451_v41 }
 0x345   : > { %3494 = vst.msk [vmem:[%s6000_s4 + $0x58] sm:$0xff] %vm2394_vm0, %v3430_v63  ;;  %v3431_v20 = vmax.f32 %v3367_v6, 0.0  ;;  %v2350_v59 = vpop.f32.mrb[110].mxu0  ;;  %v3945_v3 = vadd.f32 %v5938_v49, %v1580_v16  ;;  %v2768_v32 = vpop.xlane.xlu1 %2767  ;;  %v2557_v54 = vsel %vm2394_vm0, %v6188_v9, 0.0  ;;  %v2705_v27 = vmul.f32 %v6188_v9, %v6188_v9 }
 0x346   : > { %4302 = vrsqrt.f32 %v3242_v43  ;;  %v3243_v50 = vadd.f32 1e-05, %v3115_v11  ;;  %v2352_v15 = vpop.f32.mrb[111].mxu0  ;;  %v2924_v58 = vmul.f32 0.1, %v2768_v32  ;;  %v1582_v39 = vpop.f32.mrb[111].mxu1  ;;  %2558 = vadd.xlane.f32.xlu0 %v2557_v54  ;;  %v2989_v41 = vmul.f32 %v6196_v52, %v6196_v52 }
 0x347   : > { %3495 = vst.msk [vmem:[%s6000_s4 + $0x60] sm:$0xff] %vm2394_vm0, %v3431_v20  ;;  %v6207_v42 = vadd.f32 %v3945_v3, %v2350_v59  ;;  %v2771_v46 = vpop.xlane.xlu0 %2770  ;;  %v2874_v63 = vsel %vm2394_vm0, %v2704_v22, 0.0  ;;  %v3177_v20 = vsub.f32 %v5730_v21, %v6132_v25  ;;  %v2877_v59 = vsel %vm2394_vm0, %v2705_v27, 0.0 }
 0x348   : > { %v4299_v6 = vpop.eup %4298  ;;  %4304 = vrsqrt.f32 %v3243_v50  ;;  %v3052_v43 = vsub.f32 %v2924_v58, %v2988_v40  ;;  %v2925_v11 = vmul.f32 0.1, %v2771_v46  ;;  %2875 = vadd.xlane.f32.xlu1 %v2874_v63  ;;  %v1585_v16 = vpop.f32.mrb[112].mxu1 }
 0x349   : > { %v3368_v32 = vmul.f32 %v4299_v6, %v3176_v60  ;;  %v2355_v54 = vpop.f32.mrb[112].mxu0  ;;  %v3947_v12 = vadd.f32 %v5938_v49, %v1585_v16  ;;  %v2454_v24 = vpop.xlane.xlu1 %2453  ;;  %v2560_v58 = vsel %vm2394_vm0, %v6207_v42, 0.0  ;;  %v2706_v27 = vmul.f32 %v6207_v42, %v6207_v42 }
 0x34a   : > { %v4301_v22 = vpop.eup %4300  ;;  %v3116_v3 = vmax.f32 %v3052_v43, 0.0  ;;  %v3053_v50 = vsub.f32 %v2925_v11, %v2989_v41  ;;  %v2357_v15 = vpop.f32.mrb[113].mxu0  ;;  %v6216_v39 = vmul.f32 0.1, %v2454_v24  ;;  %2878 = vadd.xlane.f32.xlu0 %v2877_v59 }
 0x34b   : > { %v1587_v40 = vpop.f32.mrb[113].mxu1  ;;  %v3432_v21 = vmax.f32 %v3368_v32, 0.0  ;;  %v3369_v25 = vmul.f32 %v4301_v22, %v3177_v20  ;;  %v6220_v60 = vadd.f32 %v3947_v12, %v2355_v54  ;;  %v2457_v46 = vpop.xlane.xlu0 %2456  ;;  %v3178_v15 = vsub.f32 %v5741_v34, %v6152_v30 }
 0x34c   : > { %v3244_v63 = vadd.f32 1e-05, %v3116_v3  ;;  %v3117_v6 = vmax.f32 %v3053_v50, 0.0  ;;  %v2990_v41 = vmul.f32 %v6216_v39, %v6216_v39  ;;  %2561 = vadd.xlane.f32.xlu1 %v2560_v58  ;;  %v1590_v43 = vpop.f32.mrb[114].mxu1  ;;  %v6228_v16 = vmul.f32 0.1, %v2457_v46 }
 0x34d   : > { %3496 = vst.msk [vmem:[%s6000_s4 + $0x68] sm:$0xff] %vm2394_vm0, %v3432_v21  ;;  %v3433_v11 = vmax.f32 %v3369_v25, 0.0  ;;  %v2360_v20 = vpop.f32.mrb[114].mxu0  ;;  %v3949_v32 = vadd.f32 %v5938_v49, %v1590_v43  ;;  %v2774_v54 = vpop.xlane.xlu1 %2773  ;;  %v2563_v12 = vsel %vm2394_vm0, %v6220_v60, 0.0  ;;  %v2707_v50 = vmul.f32 %v6220_v60, %v6220_v60 }
 0x34e   : > { %4306 = vrsqrt.f32 %v3244_v63  ;;  %v3245_v24 = vadd.f32 1e-05, %v3117_v6  ;;  %v2362_v59 = vpop.f32.mrb[115].mxu0  ;;  %v2926_v22 = vmul.f32 0.1, %v2774_v54  ;;  %v1592_v3 = vpop.f32.mrb[115].mxu1  ;;  %2564 = vadd.xlane.f32.xlu0 %v2563_v12  ;;  %v2991_v46 = vmul.f32 %v6228_v16, %v6228_v16 }
 0x34f   : > { %3497 = vst.msk [vmem:[%s6000_s4 + $0x70] sm:$0xff] %vm2394_vm0, %v3433_v11  ;;  %v6239_v40 = vadd.f32 %v3949_v32, %v2360_v20  ;;  %v2777_v58 = vpop.xlane.xlu0 %2776  ;;  %v2880_v21 = vsel %vm2394_vm0, %v2706_v27, 0.0  ;;  %v3179_v11 = vsub.f32 %v5746_v45, %v6164_v23  ;;  %v2883_v20 = vsel %vm2394_vm0, %v2707_v50, 0.0 }
 0x350   : > { %v4303_v25 = vpop.eup %4302  ;;  %4308 = vrsqrt.f32 %v3245_v24  ;;  %v3054_v63 = vsub.f32 %v2926_v22, %v2990_v41  ;;  %v2927_v6 = vmul.f32 0.1, %v2777_v58  ;;  %2881 = vadd.xlane.f32.xlu1 %v2880_v21  ;;  %v1595_v43 = vpop.f32.mrb[116].mxu1 }
 0x351   : > { %v3370_v54 = vmul.f32 %v4303_v25, %v3178_v15  ;;  %v2365_v12 = vpop.f32.mrb[116].mxu0  ;;  %v3951_v34 = vadd.f32 %v5938_v49, %v1595_v43  ;;  %v2460_v30 = vpop.xlane.xlu1 %2459  ;;  %v2566_v22 = vsel %vm2394_vm0, %v6239_v40, 0.0  ;;  %v2708_v50 = vmul.f32 %v6239_v40, %v6239_v40 }
 0x352   : > { %v4305_v27 = vpop.eup %4304  ;;  %v3118_v32 = vmax.f32 %v3054_v63, 0.0  ;;  %v3055_v24 = vsub.f32 %v2927_v6, %v2991_v46  ;;  %v2367_v59 = vpop.f32.mrb[117].mxu0  ;;  %v6248_v3 = vmul.f32 0.1, %v2460_v30  ;;  %2884 = vadd.xlane.f32.xlu0 %v2883_v20 }
 0x353   : > { %v1597_v41 = vpop.f32.mrb[117].mxu1  ;;  %v3434_v45 = vmax.f32 %v3370_v54, 0.0  ;;  %v3371_v23 = vmul.f32 %v4305_v27, %v3179_v11  ;;  %v6252_v15 = vadd.f32 %v3951_v34, %v2365_v12  ;;  %v2463_v58 = vpop.xlane.xlu0 %2462  ;;  %v3180_v59 = vsub.f32 %v5757_v57, %v6184_v0  ;;  %v6278_v57 = vld [vmem:[#allocation4] ss:$0 sm:$0xff] }
 0x354   : > { %v3246_v21 = vadd.f32 1e-05, %v3118_v32  ;;  %v3119_v25 = vmax.f32 %v3055_v24, 0.0  ;;  %v2992_v46 = vmul.f32 %v6248_v3, %v6248_v3  ;;  %2567 = vadd.xlane.f32.xlu1 %v2566_v22  ;;  %v1600_v63 = vpop.f32.mrb[118].mxu1  ;;  %v6260_v43 = vmul.f32 0.1, %v2463_v58 }
 0x355   : > { %3498 = vst.msk [vmem:[%s6000_s4 + $0x78] sm:$0xff] %vm2394_vm0, %v3434_v45  ;;  %v3435_v6 = vmax.f32 %v3371_v23, 0.0  ;;  %v2370_v11 = vpop.f32.mrb[118].mxu0  ;;  %v3953_v54 = vadd.f32 %v5938_v49, %v1600_v63  ;;  %v2780_v12 = vpop.xlane.xlu1 %2779  ;;  %v2569_v34 = vsel %vm2394_vm0, %v6252_v15, 0.0  ;;  %v2709_v24 = vmul.f32 %v6252_v15, %v6252_v15 }
 0x356   : > { %4310 = vrsqrt.f32 %v3246_v21  ;;  %v3247_v30 = vadd.f32 1e-05, %v3119_v25  ;;  %v2372_v20 = vpop.f32.mrb[119].mxu0  ;;  %v2928_v27 = vmul.f32 0.1, %v2780_v12  ;;  %v1602_v32 = vpop.f32.mrb[119].mxu1  ;;  %2570 = vadd.xlane.f32.xlu0 %v2569_v34  ;;  %v2993_v23 = vmul.f32 %v6260_v43, %v6260_v43 }
 0x357   : > { %3499 = vst.msk [vmem:[%s6000_s4 + $0x80] sm:$0xff] %vm2394_vm0, %v3435_v6  ;;  %v6271_v41 = vadd.f32 %v3953_v54, %v2370_v11  ;;  %v2783_v49 = vpop.xlane.xlu0 %2782  ;;  %v2886_v22 = vsel %vm2394_vm0, %v2708_v50, 0.0  ;;  %v3181_v63 = vsub.f32 %v5762_v5, %v6196_v52  ;;  %v2889_v50 = vsel %vm2394_vm0, %v2709_v24, 0.0 }
 0x358   : > { %v4307_v45 = vpop.eup %4306  ;;  %4312 = vrsqrt.f32 %v3247_v30  ;;  %v3056_v58 = vsub.f32 %v2928_v27, %v2992_v46  ;;  %v2929_v21 = vmul.f32 0.1, %v2783_v49  ;;  %2887 = vadd.xlane.f32.xlu1 %v2886_v22  ;;  %v1605_v25 = vpop.f32.mrb[120].mxu1 }
 0x359   : > { %v3372_v6 = vmul.f32 %v4307_v45, %v3180_v59  ;;  %v2375_v12 = vpop.f32.mrb[120].mxu0  ;;  %v3955_v0 = vadd.f32 %v6278_v57, %v1605_v25  ;;  %v2466_v11 = vpop.xlane.xlu1 %2465  ;;  %v2572_v5 = vsel %vm2394_vm0, %v6271_v41, 0.0  ;;  %v2710_v24 = vmul.f32 %v6271_v41, %v6271_v41 }
 0x35a   : > { %v4309_v54 = vpop.eup %4308  ;;  %v3120_v34 = vmax.f32 %v3056_v58, 0.0  ;;  %v3057_v30 = vsub.f32 %v2929_v21, %v2993_v23  ;;  %v2377_v46 = vpop.f32.mrb[121].mxu0  ;;  %v6282_v20 = vmul.f32 0.1, %v2466_v11  ;;  %2890 = vadd.xlane.f32.xlu0 %v2889_v50 }
 0x35b   : > { %v1607_v27 = vpop.f32.mrb[121].mxu1  ;;  %v3436_v52 = vmax.f32 %v3372_v6, 0.0  ;;  %v3373_v32 = vmul.f32 %v4309_v54, %v3181_v63  ;;  %v6286_v59 = vadd.f32 %v3955_v0, %v2375_v12  ;;  %v2469_v49 = vpop.xlane.xlu0 %2468  ;;  %v3182_v46 = vsub.f32 %v5773_v18, %v6216_v39 }
 0x35c   : > { %v3248_v22 = vadd.f32 1e-05, %v3120_v34  ;;  %v3121_v45 = vmax.f32 %v3057_v30, 0.0  ;;  %v2994_v23 = vmul.f32 %v6282_v20, %v6282_v20  ;;  %2573 = vadd.xlane.f32.xlu1 %v2572_v5  ;;  %v1610_v58 = vpop.f32.mrb[122].mxu1  ;;  %v6294_v25 = vmul.f32 0.1, %v2469_v49 }
 0x35d   : > { %3500 = vst.msk [vmem:[%s6000_s4 + $0x88] sm:$0xff] %vm2394_vm0, %v3436_v52  ;;  %v3437_v21 = vmax.f32 %v3373_v32, 0.0  ;;  %v2380_v63 = vpop.f32.mrb[122].mxu0  ;;  %v3957_v6 = vadd.f32 %v6278_v57, %v1610_v58  ;;  %v2786_v12 = vpop.xlane.xlu1 %2785  ;;  %v2575_v0 = vsel %vm2394_vm0, %v6286_v59, 0.0  ;;  %v2711_v30 = vmul.f32 %v6286_v59, %v6286_v59 }
 0x35e   : > { %4314 = vrsqrt.f32 %v3248_v22  ;;  %v3249_v11 = vadd.f32 1e-05, %v3121_v45  ;;  %v2382_v50 = vpop.f32.mrb[123].mxu0  ;;  %v2930_v54 = vmul.f32 0.1, %v2786_v12  ;;  %v1612_v34 = vpop.f32.mrb[123].mxu1  ;;  %2576 = vadd.xlane.f32.xlu0 %v2575_v0  ;;  %v2995_v49 = vmul.f32 %v6294_v25, %v6294_v25 }
 0x35f   : > { %3501 = vst.msk [vmem:[%s6000_s4 + $0x90] sm:$0xff] %vm2394_vm0, %v3437_v21  ;;  %v6305_v27 = vadd.f32 %v3957_v6, %v2380_v63  ;;  %v2789_v5 = vpop.xlane.xlu0 %2788  ;;  %v2892_v52 = vsel %vm2394_vm0, %v2710_v24, 0.0  ;;  %v3183_v21 = vsub.f32 %v5778_v29, %v6228_v16  ;;  %v2895_v63 = vsel %vm2394_vm0, %v2711_v30, 0.0 }
 0x360   : > { %v4311_v32 = vpop.eup %4310  ;;  %4316 = vrsqrt.f32 %v3249_v11  ;;  %v3058_v22 = vsub.f32 %v2930_v54, %v2994_v23  ;;  %v2931_v45 = vmul.f32 0.1, %v2789_v5  ;;  %2893 = vadd.xlane.f32.xlu1 %v2892_v52  ;;  %v1615_v58 = vpop.f32.mrb[124].mxu1 }
 0x361   : > { %v3374_v12 = vmul.f32 %v4311_v32, %v3182_v46  ;;  %v2385_v0 = vpop.f32.mrb[124].mxu0  ;;  %v3959_v18 = vadd.f32 %v6278_v57, %v1615_v58  ;;  %v2472_v39 = vpop.xlane.xlu1 %2471  ;;  %v2578_v54 = vsel %vm2394_vm0, %v6305_v27, 0.0  ;;  %v2712_v30 = vmul.f32 %v6305_v27, %v6305_v27 }
 0x362   : > { %v4313_v24 = vpop.eup %4312  ;;  %v3122_v6 = vmax.f32 %v3058_v22, 0.0  ;;  %v3059_v11 = vsub.f32 %v2931_v45, %v2995_v49  ;;  %v2387_v50 = vpop.f32.mrb[125].mxu0  ;;  %v6314_v34 = vmul.f32 0.1, %v2472_v39  ;;  %2896 = vadd.xlane.f32.xlu0 %v2895_v63 }
 0x363   : > { %v1617_v23 = vpop.f32.mrb[125].mxu1  ;;  %v3438_v29 = vmax.f32 %v3374_v12, 0.0  ;;  %v3375_v16 = vmul.f32 %v4313_v24, %v3183_v21  ;;  %v6318_v46 = vadd.f32 %v3959_v18, %v2385_v0  ;;  %v2475_v5 = vpop.xlane.xlu0 %2474  ;;  %v3184_v50 = vsub.f32 %v5789_v44, %v6248_v3 }
 0x364   : > { %v3250_v52 = vadd.f32 1e-05, %v3122_v6  ;;  %v3123_v32 = vmax.f32 %v3059_v11, 0.0  ;;  %v2996_v49 = vmul.f32 %v6314_v34, %v6314_v34  ;;  %2579 = vadd.xlane.f32.xlu1 %v2578_v54  ;;  %v1620_v22 = vpop.f32.mrb[126].mxu1  ;;  %v6326_v58 = vmul.f32 0.1, %v2475_v5 }
 0x365   : > { %3502 = vst.msk [vmem:[%s6000_s4 + $0x98] sm:$0xff] %vm2394_vm0, %v3438_v29  ;;  %v3439_v45 = vmax.f32 %v3375_v16, 0.0  ;;  %v2390_v21 = vpop.f32.mrb[126].mxu0  ;;  %v3961_v12 = vadd.f32 %v6278_v57, %v1620_v22  ;;  %v2792_v0 = vpop.xlane.xlu1 %2791  ;;  %v2581_v18 = vsel %vm2394_vm0, %v6318_v46, 0.0  ;;  %v2713_v11 = vmul.f32 %v6318_v46, %v6318_v46 }
 0x366   : > { %4318 = vrsqrt.f32 %v3250_v52  ;;  %v3251_v39 = vadd.f32 1e-05, %v3123_v32  ;;  %v2392_v63 = vpop.f32.mrb[127].mxu0  ;;  %v2932_v24 = vmul.f32 0.1, %v2792_v0  ;;  %v1622_v6 = vpop.f32.mrb[127].mxu1  ;;  %2582 = vadd.xlane.f32.xlu0 %v2581_v18  ;;  %v2997_v16 = vmul.f32 %v6326_v58, %v6326_v58 }
 0x367   : > { %3503 = vst.msk [vmem:[%s6000_s4 + $0xa0] sm:$0xff] %vm2394_vm0, %v3439_v45  ;;  %v6337_v23 = vadd.f32 %v3961_v12, %v2390_v21  ;;  %v2795_v57 = vpop.xlane.xlu0 %2794  ;;  %v2898_v54 = vsel %vm2394_vm0, %v2712_v30, 0.0  ;;  %v3185_v32 = vsub.f32 %v5794_v55, %v6260_v43  ;;  %v2901_v44 = vsel %vm2394_vm0, %v2713_v11, 0.0 }
 0x368   : > { %v4315_v29 = vpop.eup %4314  ;;  %4320 = vrsqrt.f32 %v3251_v39  ;;  %v3060_v5 = vsub.f32 %v2932_v24, %v2996_v49  ;;  %v2933_v52 = vmul.f32 0.1, %v2795_v57  ;;  %2899 = vadd.xlane.f32.xlu1 %v2898_v54 }
 0x369   : > { %v3376_v22 = vmul.f32 %v4315_v29, %v3184_v50  ;;  %v2478_v45 = vpop.xlane.xlu1 %2477  ;;  %v2584_v39 = vsel %vm2394_vm0, %v6337_v23, 0.0  ;;  %v2714_v55 = vmul.f32 %v6337_v23, %v6337_v23  ;;  %v3186_v29 = vsub.f32 %v5805_v7, %v6282_v20 }
 0x36a   : > { %v4317_v3 = vpop.eup %4316  ;;  %v3124_v21 = vmax.f32 %v3060_v5, 0.0  ;;  %v3061_v12 = vsub.f32 %v2933_v52, %v2997_v16  ;;  %v6345_v30 = vmul.f32 0.1, %v2478_v45  ;;  %2902 = vadd.xlane.f32.xlu0 %v2901_v44  ;;  %v3187_v44 = vsub.f32 %v5810_v19, %v6294_v25 }
 0x36b   : > { %v3440_v0 = vmax.f32 %v3376_v22, 0.0  ;;  %v3377_v18 = vmul.f32 %v4317_v3, %v3185_v32  ;;  %v2481_v49 = vpop.xlane.xlu0 %2480  ;;  %v2904_v5 = vsel %vm2394_vm0, %v2714_v55, 0.0 }
 0x36c   : > { %v3252_v43 = vadd.f32 1e-05, %v3124_v21  ;;  %v3125_v63 = vmax.f32 %v3061_v12, 0.0  ;;  %2585 = vadd.xlane.f32.xlu1 %v2584_v39  ;;  %v6353_v6 = vmul.f32 0.1, %v2481_v49  ;;  %v2998_v57 = vmul.f32 %v6345_v30, %v6345_v30 }
 0x36d   : > { %3504 = vst.msk [vmem:[%s6000_s4 + $0xa8] sm:$0xff] %vm2394_vm0, %v3440_v0  ;;  %v3441_v24 = vmax.f32 %v3377_v18, 0.0  ;;  %v2798_v11 = vpop.xlane.xlu1 %2797 }
 0x36e   : > { %4322 = vrsqrt.f32 %v3252_v43  ;;  %v3253_v50 = vadd.f32 1e-05, %v3125_v63  ;;  %v2934_v54 = vmul.f32 0.1, %v2798_v11  ;;  %v2999_v32 = vmul.f32 %v6353_v6, %v6353_v6 }
 0x36f   : > { %3505 = vst.msk [vmem:[%s6000_s4 + $0xb0] sm:$0xff] %vm2394_vm0, %v3441_v24  ;;  %v2801_v16 = vpop.xlane.xlu0 %2800 }
 0x370   : > { %v4319_v52 = vpop.eup %4318  ;;  %4324 = vrsqrt.f32 %v3253_v50  ;;  %v3062_v22 = vsub.f32 %v2934_v54, %v2998_v57  ;;  %v2935_v45 = vmul.f32 0.1, %v2801_v16  ;;  %2905 = vadd.xlane.f32.xlu1 %v2904_v5  ;;  %v3188_v57 = vsub.f32 %v5821_v35, %v6314_v34 }
 0x371   : > { %v3378_v3 = vmul.f32 %v4319_v52, %v3186_v29  ;;  %v2484_v21 = vpop.xlane.xlu1 %2483 }
 0x372   : > { %v4321_v12 = vpop.eup %4320  ;;  %v3126_v0 = vmax.f32 %v3062_v22, 0.0  ;;  %v3063_v7 = vsub.f32 %v2935_v45, %v2999_v32  ;;  %v6366_v20 = vmul.f32 0.1, %v2484_v21  ;;  %v3189_v32 = vsub.f32 %v5826_v48, %v6326_v58 }
 0x373   : > { %v3442_v18 = vmax.f32 %v3378_v3, 0.0  ;;  %v3379_v49 = vmul.f32 %v4321_v12, %v3187_v44  ;;  %v2487_v39 = vpop.xlane.xlu0 %2486 }
 0x374   : > { %v3254_v55 = vadd.f32 1e-05, %v3126_v0  ;;  %v3127_v43 = vmax.f32 %v3063_v7, 0.0  ;;  %v6370_v24 = vmul.f32 0.1, %v2487_v39  ;;  %v3000_v25 = vmul.f32 %v6366_v20, %v6366_v20 }
 0x375   : > { %3506 = vst.msk [vmem:[%s6000_s4 + $0xb8] sm:$0xff] %vm2394_vm0, %v3442_v18  ;;  %v3443_v63 = vmax.f32 %v3379_v49, 0.0  ;;  %v2804_v11 = vpop.xlane.xlu1 %2803 }
 0x376   : > { %4326 = vrsqrt.f32 %v3254_v55  ;;  %v3255_v19 = vadd.f32 1e-05, %v3127_v43  ;;  %v2936_v50 = vmul.f32 0.1, %v2804_v11  ;;  %v3001_v16 = vmul.f32 %v6370_v24, %v6370_v24 }
 0x377   : > { %3507 = vst.msk [vmem:[%s6000_s4 + $0xc0] sm:$0xff] %vm2394_vm0, %v3443_v63  ;;  %v2807_v54 = vpop.xlane.xlu0 %2806  ;;  %v3190_v63 = vsub.f32 %v5837_v1, %v6345_v30 }
 0x378   : > { %v4323_v29 = vpop.eup %4322  ;;  %4328 = vrsqrt.f32 %v3255_v19  ;;  %v3064_v5 = vsub.f32 %v2936_v50, %v3000_v25  ;;  %v2937_v52 = vmul.f32 0.1, %v2807_v54  ;;  %v3191_v54 = vsub.f32 %v5842_v14, %v6353_v6 }
 0x379   : > { %v3380_v22 = vmul.f32 %v4323_v29, %v3188_v57  ;;  %v2490_v45 = vpop.xlane.xlu1 %2489 }
 0x37a   : > { %v4325_v44 = vpop.eup %4324  ;;  %v3128_v3 = vmax.f32 %v3064_v5, 0.0  ;;  %v3065_v21 = vsub.f32 %v2937_v52, %v3001_v16  ;;  %v6382_v12 = vmul.f32 0.1, %v2490_v45 }
 0x37b   : > { %v3444_v35 = vmax.f32 %v3380_v22, 0.0  ;;  %v3381_v34 = vmul.f32 %v4325_v44, %v3189_v32  ;;  %v2493_v0 = vpop.xlane.xlu0 %2492 }
 0x37c   : > { %v3256_v7 = vadd.f32 1e-05, %v3128_v3  ;;  %v3129_v18 = vmax.f32 %v3065_v21, 0.0  ;;  %v6386_v39 = vmul.f32 0.1, %v2493_v0  ;;  %v3002_v58 = vmul.f32 %v6382_v12, %v6382_v12 }
 0x37d   : > { %3508 = vst.msk [vmem:[%s6000_s4 + $0xc8] sm:$0xff] %vm2394_vm0, %v3444_v35  ;;  %v3445_v49 = vmax.f32 %v3381_v34, 0.0  ;;  %v2810_v55 = vpop.xlane.xlu1 %2809 }
 0x37e   : > { %4330 = vrsqrt.f32 %v3256_v7  ;;  %v3257_v48 = vadd.f32 1e-05, %v3129_v18  ;;  %v2938_v43 = vmul.f32 0.1, %v2810_v55  ;;  %v3003_v25 = vmul.f32 %v6386_v39, %v6386_v39 }
 0x37f   : > { %3509 = vst.msk [vmem:[%s6000_s4 + $0xd0] sm:$0xff] %vm2394_vm0, %v3445_v49  ;;  %v2813_v11 = vpop.xlane.xlu0 %2812  ;;  %v3192_v7 = vsub.f32 %v5853_v31, %v6366_v20 }
 0x380   : > { %v4327_v19 = vpop.eup %4326  ;;  %4332 = vrsqrt.f32 %v3257_v48  ;;  %v3066_v50 = vsub.f32 %v2938_v43, %v3002_v58  ;;  %v2939_v57 = vmul.f32 0.1, %v2813_v11  ;;  %v3193_v43 = vsub.f32 %v5858_v47, %v6370_v24 }
 0x381   : > { %v3382_v29 = vmul.f32 %v4327_v19, %v3190_v63  ;;  %v2496_v16 = vpop.xlane.xlu1 %2495 }
 0x382   : > { %v4329_v5 = vpop.eup %4328  ;;  %v3130_v52 = vmax.f32 %v3066_v50, 0.0  ;;  %v3067_v32 = vsub.f32 %v2939_v57, %v3003_v25  ;;  %v6398_v22 = vmul.f32 0.1, %v2496_v16 }
 0x383   : > { %v3446_v1 = vmax.f32 %v3382_v29, 0.0  ;;  %v3383_v30 = vmul.f32 %v4329_v5, %v3191_v54  ;;  %v2499_v45 = vpop.xlane.xlu0 %2498 }
 0x384   : > { %v3258_v44 = vadd.f32 1e-05, %v3130_v52  ;;  %v3131_v3 = vmax.f32 %v3067_v32, 0.0  ;;  %v6402_v35 = vmul.f32 0.1, %v2499_v45  ;;  %v3004_v6 = vmul.f32 %v6398_v22, %v6398_v22 }
 0x385   : > { %3510 = vst.msk [vmem:[%s6000_s4 + $0xd8] sm:$0xff] %vm2394_vm0, %v3446_v1  ;;  %v3447_v21 = vmax.f32 %v3383_v30, 0.0  ;;  %v2816_v34 = vpop.xlane.xlu1 %2815  ;;  %v3194_v30 = vsub.f32 %v5869_v2, %v6382_v12 }
 0x386   : > { %4334 = vrsqrt.f32 %v3258_v44  ;;  %v3259_v14 = vadd.f32 1e-05, %v3131_v3  ;;  %v2940_v0 = vmul.f32 0.1, %v2816_v34  ;;  %v3005_v55 = vmul.f32 %v6402_v35, %v6402_v35 }
 0x387   : > { %3511 = vst.msk [vmem:[%s6000_s4 + $0xe0] sm:$0xff] %vm2394_vm0, %v3447_v21  ;;  %v2819_v18 = vpop.xlane.xlu0 %2818 }
 0x388   : > { %v4331_v49 = vpop.eup %4330  ;;  %4336 = vrsqrt.f32 %v3259_v14  ;;  %v3068_v48 = vsub.f32 %v2940_v0, %v3004_v6  ;;  %v2941_v58 = vmul.f32 0.1, %v2819_v18  ;;  %v3195_v14 = vsub.f32 %v5874_v17, %v6386_v39 }
 0x389   : > { %v3384_v63 = vmul.f32 %v4331_v49, %v3192_v7  ;;  %v2502_v11 = vpop.xlane.xlu1 %2501 }
 0x38a   : > { %v4333_v19 = vpop.eup %4332  ;;  %v3132_v25 = vmax.f32 %v3068_v48, 0.0  ;;  %v3069_v50 = vsub.f32 %v2941_v58, %v3005_v55  ;;  %v6414_v57 = vmul.f32 0.1, %v2502_v11 }
 0x38b   : > { %v3448_v31 = vmax.f32 %v3384_v63, 0.0  ;;  %v3385_v20 = vmul.f32 %v4333_v19, %v3193_v43  ;;  %v2505_v54 = vpop.xlane.xlu0 %2504 }
 0x38c   : > { %v3260_v29 = vadd.f32 1e-05, %v3132_v25  ;;  %v3133_v16 = vmax.f32 %v3069_v50, 0.0  ;;  %v6418_v52 = vmul.f32 0.1, %v2505_v54  ;;  %v3006_v24 = vmul.f32 %v6414_v57, %v6414_v57 }
 0x38d   : > { %3512 = vst.msk [vmem:[%s6000_s4 + $0xe8] sm:$0xff] %vm2394_vm0, %v3448_v31  ;;  %v3449_v5 = vmax.f32 %v3385_v20, 0.0  ;;  %v2822_v32 = vpop.xlane.xlu1 %2821  ;;  %v3196_v50 = vsub.f32 %v5885_v37, %v6398_v22 }
 0x38e   : > { %4338 = vrsqrt.f32 %v3260_v29  ;;  %v3261_v47 = vadd.f32 1e-05, %v3133_v16  ;;  %v2942_v1 = vmul.f32 0.1, %v2822_v32  ;;  %v3007_v3 = vmul.f32 %v6418_v52, %v6418_v52 }
 0x38f   : > { %3513 = vst.msk [vmem:[%s6000_s4 + $0xf0] sm:$0xff] %vm2394_vm0, %v3449_v5  ;;  %v2825_v45 = vpop.xlane.xlu0 %2824  ;;  %v3197_v5 = vsub.f32 %v5890_v53, %v6402_v35 }
 0x390   : > { %v4335_v44 = vpop.eup %4334  ;;  %4340 = vrsqrt.f32 %v3261_v47  ;;  %v3070_v21 = vsub.f32 %v2942_v1, %v3006_v24  ;;  %v2943_v34 = vmul.f32 0.1, %v2825_v45 }
 0x391   : > { %v3386_v6 = vmul.f32 %v4335_v44, %v3194_v30  ;;  %v2508_v0 = vpop.xlane.xlu1 %2507 }
 0x392   : > { %v4337_v7 = vpop.eup %4336  ;;  %v3134_v18 = vmax.f32 %v3070_v21, 0.0  ;;  %v3071_v49 = vsub.f32 %v2943_v34, %v3007_v3  ;;  %v6430_v55 = vmul.f32 0.1, %v2508_v0 }
 0x393   : > { %v3450_v2 = vmax.f32 %v3386_v6, 0.0  ;;  %v3387_v12 = vmul.f32 %v4337_v7, %v3195_v14  ;;  %v2511_v48 = vpop.xlane.xlu0 %2510  ;;  %v3198_v7 = vsub.f32 %v5901_v10, %v6414_v57 }
 0x394   : > { %v3262_v58 = vadd.f32 1e-05, %v3134_v18  ;;  %v3135_v43 = vmax.f32 %v3071_v49, 0.0  ;;  %v6434_v11 = vmul.f32 0.1, %v2511_v48  ;;  %v3008_v39 = vmul.f32 %v6430_v55, %v6430_v55 }
 0x395   : > { %3514 = vst.msk [vmem:[%s6000_s4 + $0xf8] sm:$0xff] %vm2394_vm0, %v3450_v2  ;;  %v3451_v63 = vmax.f32 %v3387_v12, 0.0  ;;  %v2828_v19 = vpop.xlane.xlu1 %2827 }
 0x396   : > { %4342 = vrsqrt.f32 %v3262_v58  ;;  %v3263_v17 = vadd.f32 1e-05, %v3135_v43  ;;  %v2944_v25 = vmul.f32 0.1, %v2828_v19  ;;  %v3009_v54 = vmul.f32 %v6434_v11, %v6434_v11 }
 0x397   : > { %3515 = vst.msk [vmem:[%s6000_s4 + $0x100] sm:$0xff] %vm2394_vm0, %v3451_v63  ;;  %v2831_v31 = vpop.xlane.xlu0 %2830  ;;  %v3199_v58 = vsub.f32 %v5906_v28, %v6418_v52 }
 0x398   : > { %v4339_v20 = vpop.eup %4338  ;;  %4344 = vrsqrt.f32 %v3263_v17  ;;  %v3072_v29 = vsub.f32 %v2944_v25, %v3008_v39  ;;  %v2945_v16 = vmul.f32 0.1, %v2831_v31 }
 0x399   : > { %v3388_v32 = vmul.f32 %v4339_v20, %v3196_v50  ;;  %v2514_v47 = vpop.xlane.xlu1 %2513 }
 0x39a   : > { %v4341_v24 = vpop.eup %4340  ;;  %v3136_v1 = vmax.f32 %v3072_v29, 0.0  ;;  %v3073_v30 = vsub.f32 %v2945_v16, %v3009_v54  ;;  %v6446_v45 = vmul.f32 0.1, %v2514_v47 }
 0x39b   : > { %v3452_v37 = vmax.f32 %v3388_v32, 0.0  ;;  %v3389_v22 = vmul.f32 %v4341_v24, %v3197_v5  ;;  %v2517_v44 = vpop.xlane.xlu0 %2516  ;;  %v6695_v32 = vld [vmem:[#allocation8_spill] sm:$0xff] }
 0x39c   : > { %v3264_v3 = vadd.f32 1e-05, %v3136_v1  ;;  %v3137_v21 = vmax.f32 %v3073_v30, 0.0  ;;  %v6450_v14 = vmul.f32 0.1, %v2517_v44  ;;  %v3010_v35 = vmul.f32 %v6446_v45, %v6446_v45  ;;  %v6696_v44 = vld [vmem:[#allocation9_spill] sm:$0xff] }
 0x39d   : > { %3516 = vst.msk [vmem:[%s6000_s4 + $0x108] sm:$0xff] %vm2394_vm0, %v3452_v37  ;;  %v3453_v34 = vmax.f32 %v3389_v22, 0.0  ;;  %v2834_v6 = vpop.xlane.xlu1 %2833  ;;  %v3200_v47 = vsub.f32 %v6695_v32, %v6430_v55 }
 0x39e   : > { %4346 = vrsqrt.f32 %v3264_v3  ;;  %v3265_v53 = vadd.f32 1e-05, %v3137_v21  ;;  %v2946_v0 = vmul.f32 0.1, %v2834_v6  ;;  %v3011_v2 = vmul.f32 %v6450_v14, %v6450_v14 }
 0x39f   : > { %3517 = vst.msk [vmem:[%s6000_s4 + $0x110] sm:$0xff] %vm2394_vm0, %v3453_v34  ;;  %v2837_v18 = vpop.xlane.xlu0 %2836  ;;  %v3201_v3 = vsub.f32 %v6696_v44, %v6434_v11 }
 0x3a0   : > { %v4343_v49 = vpop.eup %4342  ;;  %4348 = vrsqrt.f32 %v3265_v53  ;;  %v3074_v12 = vsub.f32 %v2946_v0, %v3010_v35  ;;  %v2947_v48 = vmul.f32 0.1, %v2837_v18 }
 0x3a1   : > { %v3390_v43 = vmul.f32 %v4343_v49, %v3198_v7  ;;  %v2520_v63 = vpop.xlane.xlu1 %2519 }
 0x3a2   : > { %v4345_v19 = vpop.eup %4344  ;;  %v3138_v17 = vmax.f32 %v3074_v12, 0.0  ;;  %v3075_v39 = vsub.f32 %v2947_v48, %v3011_v2  ;;  %v6462_v25 = vmul.f32 0.1, %v2520_v63 }
 0x3a3   : > { %v3454_v10 = vmax.f32 %v3390_v43, 0.0  ;;  %v3391_v57 = vmul.f32 %v4345_v19, %v3199_v58  ;;  %v2523_v50 = vpop.xlane.xlu0 %2522  ;;  %v6697_v19 = vld [vmem:[#allocation10_spill] sm:$0xff] }
 0x3a4   : > { %v3266_v31 = vadd.f32 1e-05, %v3138_v17  ;;  %v3139_v20 = vmax.f32 %v3075_v39, 0.0  ;;  %v6466_v29 = vmul.f32 0.1, %v2523_v50  ;;  %v3012_v52 = vmul.f32 %v6462_v25, %v6462_v25 }
 0x3a5   : > { %3518 = vst.msk [vmem:[%s6000_s4 + $0x118] sm:$0xff] %vm2394_vm0, %v3454_v10  ;;  %v3455_v54 = vmax.f32 %v3391_v57, 0.0  ;;  %v2840_v16 = vpop.xlane.xlu1 %2839  ;;  %v3202_v17 = vsub.f32 %v6697_v19, %v6446_v45 }
 0x3a6   : > { %4350 = vrsqrt.f32 %v3266_v31  ;;  %v3267_v28 = vadd.f32 1e-05, %v3139_v20  ;;  %v2948_v5 = vmul.f32 0.1, %v2840_v16  ;;  %v3013_v30 = vmul.f32 %v6466_v29, %v6466_v29  ;;  %v6698_v20 = vld [vmem:[#allocation11_spill] sm:$0xff] }
 0x3a7   : > { %3519 = vst.msk [vmem:[%s6000_s4 + $0x120] sm:$0xff] %vm2394_vm0, %v3455_v54  ;;  %v2843_v24 = vpop.xlane.xlu0 %2842  ;;  %v3203_v54 = vsub.f32 %v6698_v20, %v6450_v14 }
 0x3a8   : > { %v4347_v1 = vpop.eup %4346  ;;  %4352 = vrsqrt.f32 %v3267_v28  ;;  %v3076_v37 = vsub.f32 %v2948_v5, %v3012_v52  ;;  %v2949_v22 = vmul.f32 0.1, %v2843_v24 }
 0x3a9   : > { %v3392_v21 = vmul.f32 %v4347_v1, %v3200_v47  ;;  %v2526_v34 = vpop.xlane.xlu1 %2525 }
 0x3aa   : > { %v4349_v6 = vpop.eup %4348  ;;  %v3140_v53 = vmax.f32 %v3076_v37, 0.0  ;;  %v3077_v35 = vsub.f32 %v2949_v22, %v3013_v30  ;;  %v6478_v0 = vmul.f32 0.1, %v2526_v34 }
 0x3ab   : > { %v3456_v55 = vmax.f32 %v3392_v21, 0.0  ;;  %v3393_v7 = vmul.f32 %v4349_v6, %v3201_v3  ;;  %v2529_v18 = vpop.xlane.xlu0 %2528  ;;  %v3204_v6 = vsub.f32 %v5979_v56, %v6462_v25 }
 0x3ac   : > { %v3268_v49 = vadd.f32 1e-05, %v3140_v53  ;;  %v3141_v2 = vmax.f32 %v3077_v35, 0.0  ;;  %v6482_v48 = vmul.f32 0.1, %v2529_v18  ;;  %v3014_v43 = vmul.f32 %v6478_v0, %v6478_v0 }
 0x3ad   : > { %3520 = vst.msk [vmem:[%s6000_s4 + $0x128] sm:$0xff] %vm2394_vm0, %v3456_v55  ;;  %v3457_v12 = vmax.f32 %v3393_v7, 0.0  ;;  %v2846_v58 = vpop.xlane.xlu1 %2845 }
 0x3ae   : > { %4354 = vrsqrt.f32 %v3268_v49  ;;  %v3269_v11 = vadd.f32 1e-05, %v3141_v2  ;;  %v2950_v63 = vmul.f32 0.1, %v2846_v58  ;;  %v3015_v57 = vmul.f32 %v6482_v48, %v6482_v48  ;;  %v6699_v49 = vld [vmem:[#allocation12_spill] sm:$0xff] }
 0x3af   : > { %3521 = vst.msk [vmem:[%s6000_s4 + $0x130] sm:$0xff] %vm2394_vm0, %v3457_v12  ;;  %v2849_v39 = vpop.xlane.xlu0 %2848  ;;  %v3205_v2 = vsub.f32 %v6699_v49, %v6466_v29 }
 0x3b0   : > { %v4351_v10 = vpop.eup %4350  ;;  %4356 = vrsqrt.f32 %v3269_v11  ;;  %v3078_v50 = vsub.f32 %v2950_v63, %v3014_v43  ;;  %v2951_v31 = vmul.f32 0.1, %v2849_v39 }
 0x3b1   : > { %v3394_v16 = vmul.f32 %v4351_v10, %v3202_v17  ;;  %v2532_v28 = vpop.xlane.xlu1 %2531 }
 0x3b2   : > { %v4353_v52 = vpop.eup %4352  ;;  %v3142_v5 = vmax.f32 %v3078_v50, 0.0  ;;  %v3079_v32 = vsub.f32 %v2951_v31, %v3015_v57  ;;  %v6494_v47 = vmul.f32 0.1, %v2532_v28 }
 0x3b3   : > { %v3458_v45 = vmax.f32 %v3394_v16, 0.0  ;;  %v3395_v24 = vmul.f32 %v4353_v52, %v3203_v54  ;;  %v2535_v1 = vpop.xlane.xlu0 %2534  ;;  %v3206_v16 = vsub.f32 %v6015_v51, %v6478_v0 }
 0x3b4   : > { %v3270_v30 = vadd.f32 1e-05, %v3142_v5  ;;  %v3143_v37 = vmax.f32 %v3079_v32, 0.0  ;;  %v6498_v44 = vmul.f32 0.1, %v2535_v1  ;;  %v3016_v21 = vmul.f32 %v6494_v47, %v6494_v47 }
 0x3b5   : > { %3522 = vst.msk [vmem:[%s6000_s4 + $0x138] sm:$0xff] %vm2394_vm0, %v3458_v45  ;;  %v3459_v22 = vmax.f32 %v3395_v24, 0.0  ;;  %v2852_v3 = vpop.xlane.xlu1 %2851  ;;  %v6700_v24 = vld [vmem:[#allocation13_spill] sm:$0xff] }
 0x3b6   : > { %4358 = vrsqrt.f32 %v3270_v30  ;;  %v3271_v14 = vadd.f32 1e-05, %v3143_v37  ;;  %v2952_v34 = vmul.f32 0.1, %v2852_v3  ;;  %v3017_v55 = vmul.f32 %v6498_v44, %v6498_v44 }
 0x3b7   : > { %3523 = vst.msk [vmem:[%s6000_s4 + $0x140] sm:$0xff] %vm2394_vm0, %v3459_v22  ;;  %v2855_v53 = vpop.xlane.xlu0 %2854  ;;  %v3207_v1 = vsub.f32 %v6700_v24, %v6482_v48 }
 0x3b8   : > { %v4355_v35 = vpop.eup %4354  ;;  %4360 = vrsqrt.f32 %v3271_v14  ;;  %v3080_v7 = vsub.f32 %v2952_v34, %v3016_v21  ;;  %v2953_v18 = vmul.f32 0.1, %v2855_v53 }
 0x3b9   : > { %v3396_v12 = vmul.f32 %v4355_v35, %v3204_v6  ;;  %v2538_v58 = vpop.xlane.xlu1 %2537 }
 0x3ba   : > { %v4357_v11 = vpop.eup %4356  ;;  %v3144_v43 = vmax.f32 %v3080_v7, 0.0  ;;  %v3081_v63 = vsub.f32 %v2953_v18, %v3017_v55  ;;  %v6510_v19 = vmul.f32 0.1, %v2538_v58 }
 0x3bb   : > { %v3460_v56 = vmax.f32 %v3396_v12, 0.0  ;;  %v3397_v25 = vmul.f32 %v4357_v11, %v3205_v2  ;;  %v2541_v17 = vpop.xlane.xlu0 %2540  ;;  %v3208_v2 = vsub.f32 %v6043_v36, %v6494_v47 }
 0x3bc   : > { %v3272_v39 = vadd.f32 1e-05, %v3144_v43  ;;  %v3145_v10 = vmax.f32 %v3081_v63, 0.0  ;;  %v6514_v50 = vmul.f32 0.1, %v2541_v17  ;;  %v3018_v20 = vmul.f32 %v6510_v19, %v6510_v19 }
 0x3bd   : > { %3524 = vst.msk [vmem:[%s6000_s4 + $0x148] sm:$0xff] %vm2394_vm0, %v3460_v56  ;;  %v3461_v57 = vmax.f32 %v3397_v25, 0.0  ;;  %v2858_v31 = vpop.xlane.xlu1 %2857  ;;  %v3209_v56 = vsub.f32 %v6060_v26, %v6498_v44 }
 0x3be   : > { %4362 = vrsqrt.f32 %v3272_v39  ;;  %v3273_v29 = vadd.f32 1e-05, %v3145_v10  ;;  %v2954_v54 = vmul.f32 0.1, %v2858_v31  ;;  %v3019_v5 = vmul.f32 %v6514_v50, %v6514_v50 }
 0x3bf   : > { %3525 = vst.msk [vmem:[%s6000_s4 + $0x150] sm:$0xff] %vm2394_vm0, %v3461_v57  ;;  %v2861_v28 = vpop.xlane.xlu0 %2860 }
 0x3c0   : > { %v4359_v52 = vpop.eup %4358  ;;  %4364 = vrsqrt.f32 %v3273_v29  ;;  %v3082_v32 = vsub.f32 %v2954_v54, %v3018_v20  ;;  %v2955_v45 = vmul.f32 0.1, %v2861_v28 }
 0x3c1   : > { %v3398_v30 = vmul.f32 %v4359_v52, %v3206_v16  ;;  %v2544_v37 = vpop.xlane.xlu1 %2543 }
 0x3c2   : > { %v4361_v22 = vpop.eup %4360  ;;  %v3146_v3 = vmax.f32 %v3082_v32, 0.0  ;;  %v3083_v14 = vsub.f32 %v2955_v45, %v3019_v5  ;;  %v6526_v21 = vmul.f32 0.1, %v2544_v37  ;;  %v3210_v32 = vsub.f32 %v6079_v62, %v6510_v19 }
 0x3c3   : > { %v3462_v51 = vmax.f32 %v3398_v30, 0.0  ;;  %v3399_v0 = vmul.f32 %v4361_v22, %v3207_v1  ;;  %v2547_v34 = vpop.xlane.xlu0 %2546  ;;  %v3211_v22 = vsub.f32 %v6092_v8, %v6514_v50 }
 0x3c4   : > { %v3274_v6 = vadd.f32 1e-05, %v3146_v3  ;;  %v3147_v53 = vmax.f32 %v3083_v14, 0.0  ;;  %v6530_v55 = vmul.f32 0.1, %v2547_v34  ;;  %v3020_v18 = vmul.f32 %v6526_v21, %v6526_v21 }
 0x3c5   : > { %3526 = vst.msk [vmem:[%s6000_s4 + $0x158] sm:$0xff] %vm2394_vm0, %v3462_v51  ;;  %v3463_v35 = vmax.f32 %v3399_v0, 0.0  ;;  %v2864_v7 = vpop.xlane.xlu1 %2863 }
 0x3c6   : > { %4366 = vrsqrt.f32 %v3274_v6  ;;  %v3275_v48 = vadd.f32 1e-05, %v3147_v53  ;;  %v2956_v49 = vmul.f32 0.1, %v2864_v7  ;;  %v3021_v11 = vmul.f32 %v6530_v55, %v6530_v55 }
 0x3c7   : > { %3527 = vst.msk [vmem:[%s6000_s4 + $0x160] sm:$0xff] %vm2394_vm0, %v3463_v35  ;;  %v2867_v12 = vpop.xlane.xlu0 %2866 }
 0x3c8   : > { %v4363_v58 = vpop.eup %4362  ;;  %4368 = vrsqrt.f32 %v3275_v48  ;;  %v3084_v43 = vsub.f32 %v2956_v49, %v3020_v18  ;;  %v2957_v63 = vmul.f32 0.1, %v2867_v12  ;;  %v3212_v12 = vsub.f32 %v6111_v61, %v6526_v21 }
 0x3c9   : > { %v3400_v25 = vmul.f32 %v4363_v58, %v3208_v2  ;;  %v2550_v17 = vpop.xlane.xlu1 %2549 }
 0x3ca   : > { %v4365_v39 = vpop.eup %4364  ;;  %v3148_v10 = vmax.f32 %v3084_v43, 0.0  ;;  %v3085_v57 = vsub.f32 %v2957_v63, %v3021_v11  ;;  %v6542_v31 = vmul.f32 0.1, %v2550_v17 }
 0x3cb   : > { %v3464_v36 = vmax.f32 %v3400_v25, 0.0  ;;  %v3401_v47 = vmul.f32 %v4365_v39, %v3209_v56  ;;  %v2553_v29 = vpop.xlane.xlu0 %2552  ;;  %v3213_v25 = vsub.f32 %v6124_v4, %v6530_v55 }
 0x3cc   : > { %v3276_v20 = vadd.f32 1e-05, %v3148_v10  ;;  %v3149_v54 = vmax.f32 %v3085_v57, 0.0  ;;  %v6546_v28 = vmul.f32 0.1, %v2553_v29  ;;  %v3022_v44 = vmul.f32 %v6542_v31, %v6542_v31 }
 0x3cd   : > { %3528 = vst.msk [vmem:[%s6000_s4 + $0x168] sm:$0xff] %vm2394_vm0, %v3464_v36  ;;  %v3465_v16 = vmax.f32 %v3401_v47, 0.0  ;;  %v2870_v52 = vpop.xlane.xlu1 %2869 }
 0x3ce   : > { %4370 = vrsqrt.f32 %v3276_v20  ;;  %v3277_v26 = vadd.f32 1e-05, %v3149_v54  ;;  %v2958_v5 = vmul.f32 0.1, %v2870_v52  ;;  %v3023_v1 = vmul.f32 %v6546_v28, %v6546_v28 }
 0x3cf   : > { %3529 = vst.msk [vmem:[%s6000_s4 + $0x170] sm:$0xff] %vm2394_vm0, %v3465_v16  ;;  %v2873_v45 = vpop.xlane.xlu0 %2872 }
 0x3d0   : > { %v4367_v24 = vpop.eup %4366  ;;  %4372 = vrsqrt.f32 %v3277_v26  ;;  %v3086_v30 = vsub.f32 %v2958_v5, %v3022_v44  ;;  %v2959_v37 = vmul.f32 0.1, %v2873_v45  ;;  %v3214_v5 = vsub.f32 %v6143_v38, %v6542_v31 }
 0x3d1   : > { %v3402_v3 = vmul.f32 %v4367_v24, %v3210_v32  ;;  %v2556_v14 = vpop.xlane.xlu1 %2555 }
 0x3d2   : > { %v4369_v51 = vpop.eup %4368  ;;  %v3150_v0 = vmax.f32 %v3086_v30, 0.0  ;;  %v3087_v34 = vsub.f32 %v2959_v37, %v3023_v1  ;;  %v6558_v6 = vmul.f32 0.1, %v2556_v14  ;;  %v3215_v37 = vsub.f32 %v6156_v33, %v6546_v28 }
 0x3d3   : > { %v3466_v62 = vmax.f32 %v3402_v3, 0.0  ;;  %v3403_v19 = vmul.f32 %v4369_v51, %v3211_v22  ;;  %v2559_v53 = vpop.xlane.xlu0 %2558 }
 0x3d4   : > { %v3278_v35 = vadd.f32 1e-05, %v3150_v0  ;;  %v3151_v7 = vmax.f32 %v3087_v34, 0.0  ;;  %v6562_v18 = vmul.f32 0.1, %v2559_v53  ;;  %v3024_v50 = vmul.f32 %v6558_v6, %v6558_v6 }
 0x3d5   : > { %3530 = vst.msk [vmem:[%s6000_s4 + $0x178] sm:$0xff] %vm2394_vm0, %v3466_v62  ;;  %v3467_v48 = vmax.f32 %v3403_v19, 0.0  ;;  %v2876_v49 = vpop.xlane.xlu1 %2875 }
 0x3d6   : > { %4374 = vrsqrt.f32 %v3278_v35  ;;  %v3279_v8 = vadd.f32 1e-05, %v3151_v7  ;;  %v2960_v2 = vmul.f32 0.1, %v2876_v49  ;;  %v3025_v43 = vmul.f32 %v6562_v18, %v6562_v18 }
 0x3d7   : > { %3531 = vst.msk [vmem:[%s6000_s4 + $0x180] sm:$0xff] %vm2394_vm0, %v3467_v48  ;;  %v2879_v58 = vpop.xlane.xlu0 %2878 }
 0x3d8   : > { %v4371_v11 = vpop.eup %4370  ;;  %4376 = vrsqrt.f32 %v3279_v8  ;;  %v3088_v63 = vsub.f32 %v2960_v2, %v3024_v50  ;;  %v2961_v56 = vmul.f32 0.1, %v2879_v58  ;;  %v3216_v8 = vsub.f32 %v6175_v13, %v6558_v6 }
 0x3d9   : > { %v3404_v17 = vmul.f32 %v4371_v11, %v3212_v12  ;;  %v2562_v39 = vpop.xlane.xlu1 %2561 }
 0x3da   : > { %v4373_v10 = vpop.eup %4372  ;;  %v3152_v57 = vmax.f32 %v3088_v63, 0.0  ;;  %v3089_v36 = vsub.f32 %v2961_v56, %v3025_v43  ;;  %v6574_v47 = vmul.f32 0.1, %v2562_v39  ;;  %v3217_v43 = vsub.f32 %v6188_v9, %v6562_v18 }
 0x3db   : > { %v3468_v61 = vmax.f32 %v3404_v17, 0.0  ;;  %v3405_v21 = vmul.f32 %v4373_v10, %v3213_v25  ;;  %v2565_v29 = vpop.xlane.xlu0 %2564 }
 0x3dc   : > { %v3280_v20 = vadd.f32 1e-05, %v3152_v57  ;;  %v3153_v54 = vmax.f32 %v3089_v36, 0.0  ;;  %v6578_v52 = vmul.f32 0.1, %v2565_v29  ;;  %v3026_v55 = vmul.f32 %v6574_v47, %v6574_v47 }
 0x3dd   : > { %3532 = vst.msk [vmem:[%s6000_s4 + $0x188] sm:$0xff] %vm2394_vm0, %v3468_v61  ;;  %v3469_v16 = vmax.f32 %v3405_v21, 0.0  ;;  %v2882_v26 = vpop.xlane.xlu1 %2881 }
 0x3de   : > { %4378 = vrsqrt.f32 %v3280_v20  ;;  %v3281_v4 = vadd.f32 1e-05, %v3153_v54  ;;  %v2962_v44 = vmul.f32 0.1, %v2882_v26  ;;  %v3027_v24 = vmul.f32 %v6578_v52, %v6578_v52 }
 0x3df   : > { %3533 = vst.msk [vmem:[%s6000_s4 + $0x190] sm:$0xff] %vm2394_vm0, %v3469_v16  ;;  %v2885_v32 = vpop.xlane.xlu0 %2884  ;;  %v3218_v16 = vsub.f32 %v6207_v42, %v6574_v47 }
 0x3e0   : > { %v4375_v45 = vpop.eup %4374  ;;  %4380 = vrsqrt.f32 %v3281_v4  ;;  %v3090_v1 = vsub.f32 %v2962_v44, %v3026_v55  ;;  %v2963_v30 = vmul.f32 0.1, %v2885_v32  ;;  %v3219_v32 = vsub.f32 %v6220_v60, %v6578_v52 }
 0x3e1   : > { %v3406_v22 = vmul.f32 %v4375_v45, %v3214_v5  ;;  %v2568_v3 = vpop.xlane.xlu1 %2567 }
 0x3e2   : > { %v4377_v14 = vpop.eup %4376  ;;  %v3154_v51 = vmax.f32 %v3090_v1, 0.0  ;;  %v3091_v0 = vsub.f32 %v2963_v30, %v3027_v24  ;;  %v6590_v34 = vmul.f32 0.1, %v2568_v3 }
 0x3e3   : > { %v3470_v38 = vmax.f32 %v3406_v22, 0.0  ;;  %v3407_v31 = vmul.f32 %v4377_v14, %v3215_v37  ;;  %v2571_v62 = vpop.xlane.xlu0 %2570 }
 0x3e4   : > { %v3282_v19 = vadd.f32 1e-05, %v3154_v51  ;;  %v3155_v53 = vmax.f32 %v3091_v0, 0.0  ;;  %v6594_v7 = vmul.f32 0.1, %v2571_v62  ;;  %v3028_v28 = vmul.f32 %v6590_v34, %v6590_v34 }
 0x3e5   : > { %3534 = vst.msk [vmem:[%s6000_s4 + $0x198] sm:$0xff] %vm2394_vm0, %v3470_v38  ;;  %v3471_v35 = vmax.f32 %v3407_v31, 0.0  ;;  %v2888_v48 = vpop.xlane.xlu1 %2887 }
 0x3e6   : > { %4382 = vrsqrt.f32 %v3282_v19  ;;  %v3283_v33 = vadd.f32 1e-05, %v3155_v53  ;;  %v2964_v49 = vmul.f32 0.1, %v2888_v48  ;;  %v3029_v12 = vmul.f32 %v6594_v7, %v6594_v7 }
 0x3e7   : > { %3535 = vst.msk [vmem:[%s6000_s4 + $0x1a0] sm:$0xff] %vm2394_vm0, %v3471_v35  ;;  %v2891_v50 = vpop.xlane.xlu0 %2890  ;;  %v3220_v19 = vsub.f32 %v6239_v40, %v6590_v34 }
 0x3e8   : > { %v4379_v2 = vpop.eup %4378  ;;  %4384 = vrsqrt.f32 %v3283_v33  ;;  %v3092_v58 = vsub.f32 %v2964_v49, %v3028_v28  ;;  %v2965_v11 = vmul.f32 0.1, %v2891_v50  ;;  %v3221_v49 = vsub.f32 %v6252_v15, %v6594_v7 }
 0x3e9   : > { %v3408_v63 = vmul.f32 %v4379_v2, %v3216_v8  ;;  %v2574_v56 = vpop.xlane.xlu1 %2573 }
 0x3ea   : > { %v4381_v25 = vpop.eup %4380  ;;  %v3156_v17 = vmax.f32 %v3092_v58, 0.0  ;;  %v3093_v39 = vsub.f32 %v2965_v11, %v3029_v12  ;;  %v6606_v10 = vmul.f32 0.1, %v2574_v56 }
 0x3eb   : > { %v3472_v13 = vmax.f32 %v3408_v63, 0.0  ;;  %v3409_v6 = vmul.f32 %v4381_v25, %v3217_v43  ;;  %v2577_v57 = vpop.xlane.xlu0 %2576 }
 0x3ec   : > { %v3284_v36 = vadd.f32 1e-05, %v3156_v17  ;;  %v3157_v61 = vmax.f32 %v3093_v39, 0.0  ;;  %v6610_v29 = vmul.f32 0.1, %v2577_v57  ;;  %v3030_v18 = vmul.f32 %v6606_v10, %v6606_v10 }
 0x3ed   : > { %3536 = vst.msk [vmem:[%s6000_s4 + $0x1a8] sm:$0xff] %vm2394_vm0, %v3472_v13  ;;  %v3473_v21 = vmax.f32 %v3409_v6, 0.0  ;;  %v2894_v20 = vpop.xlane.xlu1 %2893  ;;  %v3222_v7 = vsub.f32 %v6271_v41, %v6606_v10 }
 0x3ee   : > { %4386 = vrsqrt.f32 %v3284_v36  ;;  %v3285_v9 = vadd.f32 1e-05, %v3157_v61  ;;  %v2966_v54 = vmul.f32 0.1, %v2894_v20  ;;  %v3031_v55 = vmul.f32 %v6610_v29, %v6610_v29 }
 0x3ef   : > { %3537 = vst.msk [vmem:[%s6000_s4 + $0x1b0] sm:$0xff] %vm2394_vm0, %v3473_v21  ;;  %v2897_v26 = vpop.xlane.xlu0 %2896  ;;  %v3223_v57 = vsub.f32 %v6286_v59, %v6610_v29 }
 0x3f0   : > { %v4383_v4 = vpop.eup %4382  ;;  %4388 = vrsqrt.f32 %v3285_v9  ;;  %v3094_v44 = vsub.f32 %v2966_v54, %v3030_v18  ;;  %v2967_v5 = vmul.f32 0.1, %v2897_v26 }
 0x3f1   : > { %v3410_v45 = vmul.f32 %v4383_v4, %v3218_v16  ;;  %v2580_v24 = vpop.xlane.xlu1 %2579 }
 0x3f2   : > { %v4385_v1 = vpop.eup %4384  ;;  %v3158_v30 = vmax.f32 %v3094_v44, 0.0  ;;  %v3095_v37 = vsub.f32 %v2967_v5, %v3031_v55  ;;  %v2648_v22 = vmul.f32 0.1, %v2580_v24 }
 0x3f3   : > { %v3474_v42 = vmax.f32 %v3410_v45, 0.0  ;;  %v3411_v47 = vmul.f32 %v4385_v1, %v3219_v32  ;;  %v2583_v3 = vpop.xlane.xlu0 %2582 }
 0x3f4   : > { %v3286_v14 = vadd.f32 1e-05, %v3158_v30  ;;  %v3159_v51 = vmax.f32 %v3095_v37, 0.0  ;;  %v2649_v38 = vmul.f32 0.1, %v2583_v3  ;;  %v3032_v60 = vmul.f32 %v2648_v22, %v2648_v22 }
 0x3f5   : > { %3538 = vst.msk [vmem:[%s6000_s4 + $0x1b8] sm:$0xff] %vm2394_vm0, %v3474_v42  ;;  %v3475_v0 = vmax.f32 %v3411_v47, 0.0  ;;  %v2900_v31 = vpop.xlane.xlu1 %2899  ;;  %v3224_v41 = vsub.f32 %v6305_v27, %v2648_v22 }
 0x3f6   : > { %4390 = vrsqrt.f32 %v3286_v14  ;;  %v3287_v62 = vadd.f32 1e-05, %v3159_v51  ;;  %v2968_v52 = vmul.f32 0.1, %v2900_v31  ;;  %v3033_v48 = vmul.f32 %v2649_v38, %v2649_v38 }
 0x3f7   : > { %3539 = vst.msk [vmem:[%s6000_s4 + $0x1c0] sm:$0xff] %vm2394_vm0, %v3475_v0  ;;  %v2903_v53 = vpop.xlane.xlu0 %2902  ;;  %v3225_v59 = vsub.f32 %v6318_v46, %v2649_v38 }
 0x3f8   : > { %v4387_v35 = vpop.eup %4386  ;;  %4392 = vrsqrt.f32 %v3287_v62  ;;  %v3096_v33 = vsub.f32 %v2968_v52, %v3032_v60  ;;  %v2969_v28 = vmul.f32 0.1, %v2903_v53 }
 0x3f9   : > { %v3412_v8 = vmul.f32 %v4387_v35, %v3220_v19  ;;  %v2586_v50 = vpop.xlane.xlu1 %2585 }
 0x3fa   : > { %v4389_v2 = vpop.eup %4388  ;;  %v3160_v12 = vmax.f32 %v3096_v33, 0.0  ;;  %v3097_v58 = vsub.f32 %v2969_v28, %v3033_v48  ;;  %v2650_v11 = vmul.f32 0.1, %v2586_v50 }
 0x3fb   : > { %v3476_v43 = vmax.f32 %v3412_v8, 0.0  ;;  %v3413_v63 = vmul.f32 %v4389_v2, %v3221_v49 }
 0x3fc   : > { %v3288_v40 = vadd.f32 1e-05, %v3160_v12  ;;  %v3161_v34 = vmax.f32 %v3097_v58, 0.0  ;;  %v3034_v39 = vmul.f32 %v2650_v11, %v2650_v11  ;;  %v3226_v44 = vsub.f32 %v6337_v23, %v2650_v11 }
 0x3fd   : > { %3540 = vst.msk [vmem:[%s6000_s4 + $0x1c8] sm:$0xff] %vm2394_vm0, %v3476_v43  ;;  %v3477_v56 = vmax.f32 %v3413_v63, 0.0  ;;  %v2906_v25 = vpop.xlane.xlu1 %2905 }
 0x3fe   : > { %4394 = vrsqrt.f32 %v3288_v40  ;;  %v3289_v17 = vadd.f32 1e-05, %v3161_v34  ;;  %v2970_v15 = vmul.f32 0.1, %v2906_v25 }
 0x3ff   : > { %3541 = vst.msk [vmem:[%s6000_s4 + $0x1d0] sm:$0xff] %vm2394_vm0, %v3477_v56 }
 0x400   : > { %v4391_v13 = vpop.eup %4390  ;;  %4396 = vrsqrt.f32 %v3289_v17  ;;  %v3098_v6 = vsub.f32 %v2970_v15, %v3034_v39 }
 0x401   : > { %v3414_v36 = vmul.f32 %v4391_v13, %v3222_v7 }
 0x402   : > { %v4393_v61 = vpop.eup %4392  ;;  %v3162_v21 = vmax.f32 %v3098_v6, 0.0 }
 0x403   : > { %v3478_v20 = vmax.f32 %v3414_v36, 0.0  ;;  %v3415_v9 = vmul.f32 %v4393_v61, %v3223_v57 }
 0x404   : > { %v3290_v18 = vadd.f32 1e-05, %v3162_v21 }
 0x405   : > { %3542 = vst.msk [vmem:[%s6000_s4 + $0x1d8] sm:$0xff] %vm2394_vm0, %v3478_v20  ;;  %v3479_v54 = vmax.f32 %v3415_v9, 0.0 }
 0x406   : > { %4398 = vrsqrt.f32 %v3290_v18 }
 0x407   : > { %3543 = vst.msk [vmem:[%s6000_s4 + $0x1e0] sm:$0xff] %vm2394_vm0, %v3479_v54 }
 0x408   : > { %v4395_v10 = vpop.eup %4394 }
 0x409   : > { %v3416_v29 = vmul.f32 %v4395_v10, %v3224_v41 }
 0x40a   : > { %v4397_v16 = vpop.eup %4396 }
 0x40b   : > { %v3480_v26 = vmax.f32 %v3416_v29, 0.0  ;;  %v3417_v4 = vmul.f32 %v4397_v16, %v3225_v59 }
 0x40d   : > { %3544 = vst.msk [vmem:[%s6000_s4 + $0x1e8] sm:$0xff] %vm2394_vm0, %v3480_v26  ;;  %v3481_v55 = vmax.f32 %v3417_v4, 0.0 }
 0x40f   : > { %3545 = vst.msk [vmem:[%s6000_s4 + $0x1f0] sm:$0xff] %vm2394_vm0, %v3481_v55 }
 0x410   : > { %v4399_v5 = vpop.eup %4398 }
 0x411   : > { %v3418_v32 = vmul.f32 %v4399_v5, %v3226_v44 }
 0x413   : > { %v3482_v45 = vmax.f32 %v3418_v32, 0.0 }
 0x415   : > { %3546 = vst.msk [vmem:[%s6000_s4 + $0x1f8] sm:$0xff] %vm2394_vm0, %v3482_v45 }
 0x416 PF: > { %p14_p3 = scmp.ge.s32.totalorder %s4545_s17, 4   ;;  %s6701_s12 = smov %s4490_s13 }
 0x417   : > { %s6702_s13 = smov %s4494_s14  ;;  %s6703_s14 = smov %s4555_s20 }
 0x418   : > { %s6704_s15 = smov %s4545_s17  ;;  %16 = sbr.rel (!%p14_p3) target bundleno = 4 (0x4), region = 76 }
 0x41f   :  { %3569 = vsyncpa [#allocation3], 1 }
 0x420   :  { %3571 = vsyncpa [#allocation3 + $0x1], 1 }
 0x421   :  { %3572 = vsyncpa [#allocation5], 1 }

</bundles_post_ra>
